<compile_context>
chip_gen: v7x
topology: tpu7x:2x2x1
jax: 0.10.0
libtpu: 0.0.40
codegen_flags: <defaults>
</compile_context>

<pallas_src>
import functools
import math

import jax
import jax.numpy as jnp
from jax.experimental import pallas as pl
from jax.experimental.pallas import tpu as pltpu


_VMEM_LIMIT_BYTES = 64 * 1024 * 1024   # explicit scoped-VMEM budget (all gens)
_TV_VOCAB = 512                        # vocab tile / vocab padding granularity


# ----------------------------- Pallas kernels ------------------------------

def _gelu_new(x):
    # GPT-Neo uses the tanh ("new") GELU approximation (f32 math -> EUP).
    return 0.5 * x * (1.0 + jnp.tanh(
        math.sqrt(2.0 / math.pi) * (x + 0.044715 * x * x * x)))


def _ln_matmul_kernel(x_ref, g_ref, b_ref, w_ref, bias_ref, o_ref, xn_sc, *,
                      act):
    """Fused LayerNorm + matmul (+ optional GELU).

    Grid = (token tiles, output-feature tiles); the feature axis is the inner
    'arbitrary' axis so the normalized activations (xn) are computed once per
    token tile and cached in a (tm, D) bf16 VMEM scratch."""
    j = pl.program_id(1)

    @pl.when(j == 0)
    def _():
        x = x_ref[...].astype(jnp.float32)                 # [tm, D]
        mu = jnp.mean(x, axis=-1, keepdims=True)
        xc = x - mu
        var = jnp.mean(xc * xc, axis=-1, keepdims=True)
        xn = (xc * jax.lax.rsqrt(var + 1e-5)) * g_ref[...] + b_ref[...]
        xn_sc[...] = xn.astype(xn_sc.dtype)

    y = jnp.dot(xn_sc[...], w_ref[...],                    # bf16 x bf16 -> f32
                preferred_element_type=jnp.float32)        # [tm, tn]
    y = y + bias_ref[...]
    if act:
        y = _gelu_new(y)
    o_ref[...] = y.astype(o_ref.dtype)


def _matmul_residual_kernel(x_ref, w_ref, bias_ref, res_ref, o_ref, acc_ref):
    """K-tiled matmul with f32 VMEM accumulator; adds bias + residual at the
    final reduction step."""
    k = pl.program_id(2)

    @pl.when(k == 0)
    def _():
        acc_ref[...] = jnp.zeros_like(acc_ref[...])

    acc_ref[...] += jnp.dot(x_ref[...].astype(jnp.bfloat16), w_ref[...],
                            preferred_element_type=jnp.float32)

    @pl.when(k == pl.num_programs(2) - 1)
    def _():
        o_ref[...] = (acc_ref[...] + bias_ref[...]
                      + res_ref[...].astype(jnp.float32)).astype(o_ref.dtype)


def _flash_attn_kernel(q_ref, k_ref, v_ref, mask_ref, o_ref,
                       m_sc, l_sc, acc_sc):
    """Flash-style causal attention.  Grid = (B, H, Sq tiles, Skv tiles);
    q/k/v blocks are head slices taken directly from the packed QKV tensor.
    Online softmax state lives in VMEM scratch across the KV axis.  Fully
    masked (upper-triangular) KV blocks skip the score/softmax/PV body."""
    qi = pl.program_id(2)
    ki = pl.program_id(3)
    tq = q_ref.shape[1]
    tkv = k_ref.shape[1]

    @pl.when(ki == 0)
    def _():
        m_sc[...] = jnp.full_like(m_sc[...], -1e30)
        l_sc[...] = jnp.zeros_like(l_sc[...])
        acc_sc[...] = jnp.zeros_like(acc_sc[...])

    # The block is needed iff its minimum column index can be <= max row index.
    @pl.when(ki * tkv <= qi * tq + (tq - 1))
    def _():
        q = q_ref[0].astype(jnp.bfloat16)                  # [tq, Dh]
        k = k_ref[0].astype(jnp.bfloat16)                  # [tkv, Dh]
        v = v_ref[0].astype(jnp.bfloat16)                  # [tkv, Dh]

        # GPT-Neo does NOT scale attention scores by 1/sqrt(head_dim).
        s = jax.lax.dot_general(q, k, (((1,), (1,)), ((), ())),
                                preferred_element_type=jnp.float32)  # [tq,tkv]

        row = qi * tq + jax.lax.broadcasted_iota(jnp.int32, (tq, tkv), 0)
        col = ki * tkv + jax.lax.broadcasted_iota(jnp.int32, (tq, tkv), 1)
        pad = mask_ref[0] > 0.5                            # [1, tkv]
        allowed = jnp.logical_and(col <= row, pad)
        s = jnp.where(allowed, s, -1e30)

        m_prev = m_sc[...]
        m_new = jnp.maximum(m_prev, jnp.max(s, axis=-1, keepdims=True))
        alpha = jnp.exp(m_prev - m_new)
        p = jnp.exp(s - m_new)
        l_sc[...] = alpha * l_sc[...] + jnp.sum(p, axis=-1, keepdims=True)
        acc_sc[...] = alpha * acc_sc[...] + jnp.dot(
            p.astype(jnp.bfloat16), v, preferred_element_type=jnp.float32)
        m_sc[...] = m_new

    @pl.when(ki == pl.num_programs(3) - 1)
    def _():
        # Exact division (not approx reciprocal) for parity with HF.
        o_ref[0] = (acc_sc[...] / l_sc[...]).astype(o_ref.dtype)


def _lnf_head_ce_kernel(x_ref, g_ref, b_ref, wt_ref, lbl_ref, valid_ref,
                        logits_ref, nll_ref, xn_sc, m_sc, l_sc, tgt_sc, *,
                        v_actual):
    """Fused final LayerNorm + tied LM head + per-token cross-entropy.
    Grid = (token tiles, vocab tiles); vocab is the inner 'arbitrary' axis with
    an online logsumexp + target-logit accumulation in scratch.  The LM head
    contracts a pre-transposed [D, Vp] wte.T in natural orientation; padded
    vocab columns (col >= v_actual) are masked to -inf.  Logits tiles are also
    written out in bf16 (the reference returns logits)."""
    j = pl.program_id(1)
    tv = logits_ref.shape[1]

    @pl.when(j == 0)
    def _():
        x = x_ref[...].astype(jnp.float32)
        mu = jnp.mean(x, axis=-1, keepdims=True)
        xc = x - mu
        var = jnp.mean(xc * xc, axis=-1, keepdims=True)
        xn = (xc * jax.lax.rsqrt(var + 1e-5)) * g_ref[...] + b_ref[...]
        xn_sc[...] = xn.astype(xn_sc.dtype)
        m_sc[...] = jnp.full_like(m_sc[...], -1e30)
        l_sc[...] = jnp.zeros_like(l_sc[...])
        tgt_sc[...] = jnp.zeros_like(tgt_sc[...])

    logits = jnp.dot(xn_sc[...], wt_ref[...],
                     preferred_element_type=jnp.float32)   # [tm, tv]

    col = j * tv + jax.lax.broadcasted_iota(jnp.int32, logits.shape, 1)
    logits = jnp.where(col < v_actual, logits, -1e30)      # mask vocab padding
    logits_ref[...] = logits.astype(logits_ref.dtype)

    m_prev = m_sc[...]
    m_new = jnp.maximum(m_prev, jnp.max(logits, axis=-1, keepdims=True))
    l_sc[...] = l_sc[...] * jnp.exp(m_prev - m_new) + jnp.sum(
        jnp.exp(logits - m_new), axis=-1, keepdims=True)
    m_sc[...] = m_new

    hit = col == lbl_ref[...]                              # labels < v_actual
    tgt_sc[...] += jnp.sum(jnp.where(hit, logits, 0.0), axis=-1, keepdims=True)

    @pl.when(j == pl.num_programs(1) - 1)
    def _():
        lse = m_sc[...] + jnp.log(l_sc[...])
        nll_ref[...] = (lse - tgt_sc[...]) * valid_ref[...]


# ------------------------------ wrappers ------------------------------------

def ln_matmul(x, g, b, w_bf16, bias, *, act=False, out_dtype=jnp.bfloat16,
              tm=512, tn=256):
    N, D = x.shape
    Dout = w_bf16.shape[1]
    tm = min(tm, N)
    tn = min(tn, Dout)
    assert N % tm == 0 and Dout % tn == 0
    kernel = functools.partial(_ln_matmul_kernel, act=act)
    return pl.pallas_call(
        kernel,
        grid=(N // tm, Dout // tn),
        in_specs=[
            pl.BlockSpec((tm, D), lambda i, j: (i, 0)),
            pl.BlockSpec((1, D), lambda i, j: (0, 0)),
            pl.BlockSpec((1, D), lambda i, j: (0, 0)),
            pl.BlockSpec((D, tn), lambda i, j: (0, j)),
            pl.BlockSpec((1, tn), lambda i, j: (0, j)),
        ],
        out_specs=pl.BlockSpec((tm, tn), lambda i, j: (i, j)),
        out_shape=jax.ShapeDtypeStruct((N, Dout), out_dtype),
        scratch_shapes=[pltpu.VMEM((tm, D), jnp.bfloat16)],
        compiler_params=pltpu.CompilerParams(
            dimension_semantics=("parallel", "arbitrary"),
            vmem_limit_bytes=_VMEM_LIMIT_BYTES),
    )(x, g.reshape(1, D), b.reshape(1, D), w_bf16, bias.reshape(1, Dout))


def matmul_residual(x, w_bf16, bias, res, *, tm=512, tn=256, tk=512):
    N, K = x.shape
    Dout = w_bf16.shape[1]
    tm = min(tm, N)
    tn = min(tn, Dout)
    tk = min(tk, K)
    assert N % tm == 0 and Dout % tn == 0 and K % tk == 0
    return pl.pallas_call(
        _matmul_residual_kernel,
        grid=(N // tm, Dout // tn, K // tk),
        in_specs=[
            pl.BlockSpec((tm, tk), lambda i, j, k: (i, k)),
            pl.BlockSpec((tk, tn), lambda i, j, k: (k, j)),
            pl.BlockSpec((1, tn), lambda i, j, k: (0, j)),
            pl.BlockSpec((tm, tn), lambda i, j, k: (i, j)),
        ],
        out_specs=pl.BlockSpec((tm, tn), lambda i, j, k: (i, j)),
        out_shape=jax.ShapeDtypeStruct((N, Dout), jnp.float32),
        scratch_shapes=[pltpu.VMEM((tm, tn), jnp.float32)],
        compiler_params=pltpu.CompilerParams(
            dimension_semantics=("parallel", "parallel", "arbitrary"),
            vmem_limit_bytes=_VMEM_LIMIT_BYTES),
    )(x, w_bf16, bias.reshape(1, Dout), res)


def flash_attention(qkv, key_mask, *, n_head, out_dtype=jnp.bfloat16,
                    tq=256, tkv=256):
    """qkv: [B, S, 3D] packed as [q | k | v] with heads contiguous inside each.
    key_mask: [B, 1, S] float (1 = keep).  Returns [B, S, D]."""
    B, S, threeD = qkv.shape
    D = threeD // 3
    H = n_head
    Dh = D // H
    assert D % H == 0 and Dh % 128 == 0, "head_dim must be a multiple of 128"
    tq = min(tq, S)
    tkv = min(tkv, S)
    assert S % tq == 0 and S % tkv == 0

    q_spec = pl.BlockSpec((1, tq, Dh), lambda b, h, qi, ki: (b, qi, h))
    k_spec = pl.BlockSpec((1, tkv, Dh), lambda b, h, qi, ki: (b, ki, H + h))
    v_spec = pl.BlockSpec((1, tkv, Dh), lambda b, h, qi, ki: (b, ki, 2 * H + h))
    m_spec = pl.BlockSpec((1, 1, tkv), lambda b, h, qi, ki: (b, 0, ki))
    o_spec = pl.BlockSpec((1, tq, Dh), lambda b, h, qi, ki: (b, qi, h))

    return pl.pallas_call(
        _flash_attn_kernel,
        grid=(B, H, S // tq, S // tkv),
        in_specs=[q_spec, k_spec, v_spec, m_spec],
        out_specs=o_spec,
        out_shape=jax.ShapeDtypeStruct((B, S, D), out_dtype),
        scratch_shapes=[pltpu.VMEM((tq, 1), jnp.float32),
                        pltpu.VMEM((tq, 1), jnp.float32),
                        pltpu.VMEM((tq, Dh), jnp.float32)],
        compiler_params=pltpu.CompilerParams(
            dimension_semantics=("parallel", "parallel", "parallel",
                                 "arbitrary"),
            vmem_limit_bytes=_VMEM_LIMIT_BYTES),
    )(qkv, qkv, qkv, key_mask)


def lnf_lmhead_ce(x, g, b, wte_t_bf16, labels, valid, *, v_actual,
                  tm=512, tv=_TV_VOCAB):
    """wte_t_bf16: pre-transposed, vocab-padded tied LM head [D, Vp] bf16."""
    N, D = x.shape
    Vp = wte_t_bf16.shape[1]
    tm = min(tm, N)
    tv = min(tv, Vp)
    assert N % tm == 0 and Vp % tv == 0
    kernel = functools.partial(_lnf_head_ce_kernel, v_actual=v_actual)
    logits, nll = pl.pallas_call(
        kernel,
        grid=(N // tm, Vp // tv),
        in_specs=[
            pl.BlockSpec((tm, D), lambda i, j: (i, 0)),
            pl.BlockSpec((1, D), lambda i, j: (0, 0)),
            pl.BlockSpec((1, D), lambda i, j: (0, 0)),
            pl.BlockSpec((D, tv), lambda i, j: (0, j)),
            pl.BlockSpec((tm, 1), lambda i, j: (i, 0)),
            pl.BlockSpec((tm, 1), lambda i, j: (i, 0)),
        ],
        out_specs=[
            pl.BlockSpec((tm, tv), lambda i, j: (i, j)),
            pl.BlockSpec((tm, 1), lambda i, j: (i, 0)),
        ],
        out_shape=[
            jax.ShapeDtypeStruct((N, Vp), jnp.bfloat16),   # halve logits writeback
            jax.ShapeDtypeStruct((N, 1), jnp.float32),
        ],
        scratch_shapes=[
            pltpu.VMEM((tm, D), jnp.bfloat16),
            pltpu.VMEM((tm, 1), jnp.float32),
            pltpu.VMEM((tm, 1), jnp.float32),
            pltpu.VMEM((tm, 1), jnp.float32),
        ],
        compiler_params=pltpu.CompilerParams(
            dimension_semantics=("parallel", "arbitrary"),
            vmem_limit_bytes=_VMEM_LIMIT_BYTES),
    )(x, g.reshape(1, D), b.reshape(1, D), wte_t_bf16,
      labels.reshape(N, 1).astype(jnp.int32),
      valid.reshape(N, 1).astype(jnp.float32))
    return logits, nll


# --------------------------- parameter init ---------------------------------

def init_params(key, *, vocab, d_model, n_layer, n_head, d_ff, max_pos, rank):
    del n_head
    n_keys = 4 + n_layer * 16
    keys = iter(jax.random.split(key, n_keys))

    def rnd(shape, std=0.02):
        return std * jax.random.normal(next(keys), shape, jnp.float32)

    params = {
        'wte': rnd((vocab, d_model)),
        'wpe': rnd((max_pos, d_model)),
        'lnf_g': jnp.ones((d_model,), jnp.float32),
        'lnf_b': jnp.zeros((d_model,), jnp.float32),
        'layers': [],
    }
    for _ in range(n_layer):
        lp = {
            'ln1_g': jnp.ones((d_model,), jnp.float32),
            'ln1_b': jnp.zeros((d_model,), jnp.float32),
            'q_w': rnd((d_model, d_model)),
            'k_w': rnd((d_model, d_model)),
            'v_w': rnd((d_model, d_model)),
            'out_w': rnd((d_model, d_model)),
            'out_b': jnp.zeros((d_model,), jnp.float32),
            'ln2_g': jnp.ones((d_model,), jnp.float32),
            'ln2_b': jnp.zeros((d_model,), jnp.float32),
            # MLP c_fc with LoRA (A stored as [Din, r], B as [r, Dout])
            'fc_w': rnd((d_model, d_ff)),
            'fc_b': jnp.zeros((d_ff,), jnp.float32),
            'fc_la': rnd((d_model, rank)),
            'fc_lb': jnp.zeros((rank, d_ff), jnp.float32),   # PEFT inits B = 0
            'fc_lbias': jnp.zeros((d_ff,), jnp.float32),     # bias='lora_only'
            # MLP c_proj with LoRA
            'proj_w': rnd((d_ff, d_model)),
            'proj_b': jnp.zeros((d_model,), jnp.float32),
            'proj_la': rnd((d_ff, rank)),
            'proj_lb': jnp.zeros((rank, d_model), jnp.float32),
            'proj_lbias': jnp.zeros((d_model,), jnp.float32),
        }
        params['layers'].append(lp)
    return params


def prepare_inference_weights(params, scaling, *, vocab_tile=_TV_VOCAB):
    """ONE-TIME weight preparation (hoisted OUT of the jitted forward):
    merge LoRA adapters (W + scaling * A @ B, bias + lora_bias), concat the
    q/k/v projections into one [D, 3D] weight, pre-transpose + vocab-pad the
    tied LM head (wte.T -> [D, Vp]), and pre-cast matmul operands to bf16."""
    V, D = params['wte'].shape
    Vp = ((V + vocab_tile - 1) // vocab_tile) * vocab_tile
    wte_t = params['wte'].T                                   # [D, V]
    if Vp > V:
        wte_t = jnp.pad(wte_t, ((0, 0), (0, Vp - V)))
    w = {
        'wte': params['wte'],                                 # f32, embedding gather
        'wpe': params['wpe'],
        'wte_t_bf16': wte_t.astype(jnp.bfloat16),             # [D, Vp] LM head
        'lnf_g': params['lnf_g'],
        'lnf_b': params['lnf_b'],
        'layers': [],
    }
    for lp in params['layers']:
        wqkv = jnp.concatenate([lp['q_w'], lp['k_w'], lp['v_w']], axis=1)
        fc_w = lp['fc_w'] + scaling * (lp['fc_la'] @ lp['fc_lb'])
        proj_w = lp['proj_w'] + scaling * (lp['proj_la'] @ lp['proj_lb'])
        w['layers'].append({
            'ln1_g': lp['ln1_g'], 'ln1_b': lp['ln1_b'],
            'wqkv': wqkv.astype(jnp.bfloat16),
            'out_w': lp['out_w'].astype(jnp.bfloat16),
            'out_b': lp['out_b'],
            'ln2_g': lp['ln2_g'], 'ln2_b': lp['ln2_b'],
            'fc_w': fc_w.astype(jnp.bfloat16),
            'fc_b': lp['fc_b'] + lp['fc_lbias'],
            'proj_w': proj_w.astype(jnp.bfloat16),
            'proj_b': lp['proj_b'] + lp['proj_lbias'],
        })
    return w


# ------------------------------ forward -------------------------------------

def lora_gpt_neo_forward(w, input_ids, attention_mask, steer_values, *,
                         n_head):
    """Forward on pre-prepared (LoRA-merged, bf16-cast) weights `w`."""
    del steer_values  # unused by the LoRA variant's forward (API parity only)
    B, S = input_ids.shape
    V, D = w['wte'].shape
    H = n_head

    # embeddings (gather + add) stay in plain JAX; tiny relative to the rest
    x = (w['wte'][input_ids] +
         w['wpe'][jnp.arange(S)][None, :, :]).reshape(B * S, D)
    x = x.astype(jnp.float32)
    key_mask = attention_mask.astype(jnp.float32).reshape(B, 1, S)
    qkv_zero_bias = jnp.zeros((3 * D,), jnp.float32)  # GPT-Neo q/k/v: no bias

    for lp in w['layers']:
        # --- attention block: LN1+QKV -> flash attention -> out-proj+residual
        qkv = ln_matmul(x, lp['ln1_g'], lp['ln1_b'], lp['wqkv'], qkv_zero_bias,
                        out_dtype=jnp.bfloat16)
        attn = flash_attention(qkv.reshape(B, S, 3 * D), key_mask, n_head=H)
        x = matmul_residual(attn.reshape(B * S, D), lp['out_w'], lp['out_b'], x)

        # --- MLP block (LoRA merged): LN2+c_fc+GELU -> c_proj+residual
        ff = ln_matmul(x, lp['ln2_g'], lp['ln2_b'], lp['fc_w'], lp['fc_b'],
                       act=True, out_dtype=jnp.bfloat16)
        x = matmul_residual(ff, lp['proj_w'], lp['proj_b'], x)

    # causal-LM loss with labels = input_ids: row (b, s) predicts token s+1;
    # last row of each sequence is invalid (weight 0).
    shift_labels = jnp.pad(input_ids[:, 1:], ((0, 0), (0, 1)))
    valid = jnp.concatenate(
        [jnp.ones((B, S - 1), jnp.float32), jnp.zeros((B, 1), jnp.float32)],
        axis=1)

    logits, nll = lnf_lmhead_ce(x, w['lnf_g'], w['lnf_b'], w['wte_t_bf16'],
                                shift_labels.reshape(B * S),
                                valid.reshape(B * S), v_actual=V)
    logits = logits[:, :V].reshape(B, S, V)      # drop vocab padding columns
    loss = jnp.sum(nll) / (B * (S - 1))
    return loss, logits


# -------------------------------- main ---------------------------------------

if __name__ == "__main__":
    # small GPT-Neo-like config (Dh = D/H = 128 to keep head slices lane-aligned)
    VOCAB = 256
    D_MODEL = 256
    N_LAYER = 2
    N_HEAD = 2
    D_FF = 1024
    MAX_POS = 16
    RANK = 4          # LoraConfig(r=rank)
    EPSILON = 8.0     # LoraConfig(lora_alpha=epsilon)
    SCALING = EPSILON / RANK

    B, S = 2, 8

    root = jax.random.PRNGKey(0)
    k_param, k_ids, k_steer = jax.random.split(root, 3)

    params = init_params(k_param, vocab=VOCAB, d_model=D_MODEL,
                         n_layer=N_LAYER, n_head=N_HEAD, d_ff=D_FF,
                         max_pos=MAX_POS, rank=RANK)

    # One-time weight preparation (LoRA merge / concat / bf16 cast / wte.T),
    # performed OUTSIDE the jitted forward so it is not re-run per call.
    weights = prepare_inference_weights(params, SCALING)
    weights = jax.block_until_ready(weights)

    input_ids = jax.random.randint(k_ids, (B, S), 0, VOCAB, dtype=jnp.int32)
    attention_mask = jnp.ones((B, S), dtype=jnp.int32)
    steer_values = jax.random.normal(k_steer, (B, 1), jnp.float32)  # unused

    fwd = jax.jit(functools.partial(lora_gpt_neo_forward, n_head=N_HEAD))
    loss, logits = fwd(weights, input_ids, attention_mask, steer_values)

    jax.block_until_ready(loss)
    jax.block_until_ready(logits)
    assert logits.shape == (B, S, VOCAB)
    assert bool(jnp.isfinite(loss))
    print("KERNEL_OK")
</pallas_src>

<mosaic_0001>
module attributes {stable_mosaic.version = 11 : i64} {
  func.func @_ln_matmul_kernel(%arg0: i32, %arg1: i32, %arg2: memref<16x256xf32, #tpu.memory_space<vmem>>, %arg3: memref<1x256xf32, #tpu.memory_space<vmem>>, %arg4: memref<1x256xf32, #tpu.memory_space<vmem>>, %arg5: memref<256x256xbf16, #tpu.memory_space<vmem>>, %arg6: memref<1x256xf32, #tpu.memory_space<vmem>>, %arg7: memref<16x256xbf16, #tpu.memory_space<vmem>>, %arg8: memref<16x256xbf16, #tpu.memory_space<vmem>>) attributes {dimension_semantics = [#tpu.dimension_semantics<parallel>, #tpu.dimension_semantics<arbitrary>], iteration_bounds = array<i64: 1, 3>, scalar_prefetch = 0 : i64, scratch_operands = 1 : i64, tpu.core_type = #tpu.core_type<tc>, window_params = [{transform_indices = @transform_0, window_bounds = array<i64: 16, 256>}, {pipeline_mode = #tpu.pipeline_mode<synchronous>, transform_indices = @transform_1, window_bounds = array<i64: 1, 256>}, {pipeline_mode = #tpu.pipeline_mode<synchronous>, transform_indices = @transform_2, window_bounds = array<i64: 1, 256>}, {transform_indices = @transform_3, window_bounds = array<i64: 256, 256>}, {transform_indices = @transform_4, window_bounds = array<i64: 1, 256>}, {transform_indices = @transform_5, window_bounds = array<i64: 16, 256>}]} {
    %c0_i32 = arith.constant 0 : i32
    %0 = arith.cmpi eq, %arg1, %c0_i32 : i32
    %1 = arith.extui %0 : i1 to i32
    %c0_i32_0 = arith.constant 0 : i32
    %2 = arith.cmpi ne, %1, %c0_i32_0 : i32
    scf.if %2 {
      %c0_8 = arith.constant 0 : index
      %c0_9 = arith.constant 0 : index
      %11 = vector.load %arg2[%c0_8, %c0_9] : memref<16x256xf32, #tpu.memory_space<vmem>>, vector<16x256xf32>
      %cst_10 = arith.constant dense<0.000000e+00> : vector<16xf32>
      %12 = vector.multi_reduction <add>, %11, %cst_10 [1] : vector<16x256xf32> to vector<16xf32>
      %13 = vector.shape_cast %12 : vector<16xf32> to vector<16x1xf32>
      %cst_11 = arith.constant 2.560000e+02 : f32
      %14 = vector.broadcast %cst_11 : f32 to vector<16x1xf32>
      %15 = arith.divf %13, %14 : vector<16x1xf32>
      %16 = vector.broadcast %15 : vector<16x1xf32> to vector<16x256xf32>
      %17 = arith.subf %11, %16 : vector<16x256xf32>
      %18 = arith.mulf %17, %17 : vector<16x256xf32>
      %cst_12 = arith.constant dense<0.000000e+00> : vector<16xf32>
      %19 = vector.multi_reduction <add>, %18, %cst_12 [1] : vector<16x256xf32> to vector<16xf32>
      %20 = vector.shape_cast %19 : vector<16xf32> to vector<16x1xf32>
      %cst_13 = arith.constant 2.560000e+02 : f32
      %21 = vector.broadcast %cst_13 : f32 to vector<16x1xf32>
      %22 = arith.divf %20, %21 : vector<16x1xf32>
      %cst_14 = arith.constant 9.99999974E-6 : f32
      %23 = vector.broadcast %cst_14 : f32 to vector<16x1xf32>
      %24 = arith.addf %22, %23 : vector<16x1xf32>
      %25 = math.rsqrt %24 : vector<16x1xf32>
      %26 = vector.broadcast %25 : vector<16x1xf32> to vector<16x256xf32>
      %27 = arith.mulf %17, %26 : vector<16x256xf32>
      %c0_15 = arith.constant 0 : index
      %c0_16 = arith.constant 0 : index
      %28 = vector.load %arg3[%c0_15, %c0_16] : memref<1x256xf32, #tpu.memory_space<vmem>>, vector<1x256xf32>
      %29 = vector.broadcast %28 : vector<1x256xf32> to vector<16x256xf32>
      %30 = arith.mulf %27, %29 : vector<16x256xf32>
      %c0_17 = arith.constant 0 : index
      %c0_18 = arith.constant 0 : index
      %31 = vector.load %arg4[%c0_17, %c0_18] : memref<1x256xf32, #tpu.memory_space<vmem>>, vector<1x256xf32>
      %32 = vector.broadcast %31 : vector<1x256xf32> to vector<16x256xf32>
      %33 = arith.addf %30, %32 : vector<16x256xf32>
      %34 = arith.truncf %33 : vector<16x256xf32> to vector<16x256xbf16>
      %c0_19 = arith.constant 0 : index
      %c0_20 = arith.constant 0 : index
      %35 = vector.load %arg8[%c0_19, %c0_20] : memref<16x256xbf16, #tpu.memory_space<vmem>>, vector<16x256xbf16>
      tpu.vector_store %arg8[%c0_19, %c0_20], %34 {strides = array<i32>} : memref<16x256xbf16, #tpu.memory_space<vmem>>, vector<16x256xbf16>,
    } else {
    }
    %c0 = arith.constant 0 : index
    %c0_1 = arith.constant 0 : index
    %3 = vector.load %arg8[%c0, %c0_1] : memref<16x256xbf16, #tpu.memory_space<vmem>>, vector<16x256xbf16>
    %c0_2 = arith.constant 0 : index
    %c0_3 = arith.constant 0 : index
    %4 = vector.load %arg5[%c0_2, %c0_3] : memref<256x256xbf16, #tpu.memory_space<vmem>>, vector<256x256xbf16>
    %cst = arith.constant dense<0.000000e+00> : vector<16x256xf32>
    %5 = tpu.matmul %3, %4, %cst {dimension_numbers = #tpu.dot_dimension_numbers<[1], [0], [0], [1], [0, 0, 1, 1], [], []>} : vector<16x256xbf16>, vector<256x256xbf16>, vector<16x256xf32> -> vector<16x256xf32>
    %c0_4 = arith.constant 0 : index
    %c0_5 = arith.constant 0 : index
    %6 = vector.load %arg6[%c0_4, %c0_5] : memref<1x256xf32, #tpu.memory_space<vmem>>, vector<1x256xf32>
    %7 = vector.broadcast %6 : vector<1x256xf32> to vector<16x256xf32>
    %8 = arith.addf %5, %7 : vector<16x256xf32>
    %9 = arith.truncf %8 : vector<16x256xf32> to vector<16x256xbf16>
    %c0_6 = arith.constant 0 : index
    %c0_7 = arith.constant 0 : index
    %10 = vector.load %arg7[%c0_6, %c0_7] : memref<16x256xbf16, #tpu.memory_space<vmem>>, vector<16x256xbf16>
    tpu.vector_store %arg7[%c0_6, %c0_7], %9 {strides = array<i32>} : memref<16x256xbf16, #tpu.memory_space<vmem>>, vector<16x256xbf16>,
    return
  }
  func.func @transform_0(%arg0: i32, %arg1: i32) -> (i32, i32) {
    %c0_i32 = arith.constant 0 : i32
    %c0_i32_0 = arith.constant 0 : i32
    return %arg0, %c0_i32 : i32, i32
  }
  func.func @transform_1(%arg0: i32, %arg1: i32) -> (i32, i32) {
    %c0_i32 = arith.constant 0 : i32
    %c0_i32_0 = arith.constant 0 : i32
    %c0_i32_1 = arith.constant 0 : i32
    return %c0_i32, %c0_i32_0 : i32, i32
  }
  func.func @transform_2(%arg0: i32, %arg1: i32) -> (i32, i32) {
    %c0_i32 = arith.constant 0 : i32
    %c0_i32_0 = arith.constant 0 : i32
    %c0_i32_1 = arith.constant 0 : i32
    return %c0_i32, %c0_i32_0 : i32, i32
  }
  func.func @transform_3(%arg0: i32, %arg1: i32) -> (i32, i32) {
    %c0_i32 = arith.constant 0 : i32
    %c0_i32_0 = arith.constant 0 : i32
    return %c0_i32, %arg1 : i32, i32
  }
  func.func @transform_4(%arg0: i32, %arg1: i32) -> (i32, i32) {
    %c0_i32 = arith.constant 0 : i32
    %c0_i32_0 = arith.constant 0 : i32
    return %c0_i32, %arg1 : i32, i32
  }
  func.func @transform_5(%arg0: i32, %arg1: i32) -> (i32, i32) {
    %c0_i32 = arith.constant 0 : i32
    return %arg0, %arg1 : i32, i32
  }
}

module attributes {stable_mosaic.version = 11 : i64} {
  func.func @_flash_attn_kernel(%arg0: i32, %arg1: i32, %arg2: i32, %arg3: i32, %arg4: memref<1x8x128xbf16, #tpu.memory_space<vmem>>, %arg5: memref<1x8x128xbf16, #tpu.memory_space<vmem>>, %arg6: memref<1x8x128xbf16, #tpu.memory_space<vmem>>, %arg7: memref<1x1x8xf32, #tpu.memory_space<vmem>>, %arg8: memref<1x8x128xbf16, #tpu.memory_space<vmem>>, %arg9: memref<8x1xf32, #tpu.memory_space<vmem>>, %arg10: memref<8x1xf32, #tpu.memory_space<vmem>>, %arg11: memref<8x128xf32, #tpu.memory_space<vmem>>) attributes {dimension_semantics = [#tpu.dimension_semantics<parallel>, #tpu.dimension_semantics<parallel>, #tpu.dimension_semantics<parallel>, #tpu.dimension_semantics<arbitrary>], iteration_bounds = array<i64: 2, 2, 1, 1>, scalar_prefetch = 0 : i64, scratch_operands = 3 : i64, tpu.core_type = #tpu.core_type<tc>, window_params = [{transform_indices = @transform_0, window_bounds = array<i64: 1, 8, 128>}, {transform_indices = @transform_1, window_bounds = array<i64: 1, 8, 128>}, {transform_indices = @transform_2, window_bounds = array<i64: 1, 8, 128>}, {transform_indices = @transform_3, window_bounds = array<i64: 1, 1, 8>}, {transform_indices = @transform_4, window_bounds = array<i64: 1, 8, 128>}]} {
    %c0_i32 = arith.constant 0 : i32
    %0 = arith.cmpi eq, %arg3, %c0_i32 : i32
    %1 = arith.extui %0 : i1 to i32
    %c0_i32_0 = arith.constant 0 : i32
    %2 = arith.cmpi ne, %1, %c0_i32_0 : i32
    scf.if %2 {
      %cst = arith.constant -1.000000e+30 : f32
      %12 = vector.broadcast %cst : f32 to vector<8x1xf32>
      %c0 = arith.constant 0 : index
      %c0_5 = arith.constant 0 : index
      %13 = vector.load %arg9[%c0, %c0_5] : memref<8x1xf32, #tpu.memory_space<vmem>>, vector<8x1xf32>
      tpu.vector_store %arg9[%c0, %c0_5], %12 {strides = array<i32>} : memref<8x1xf32, #tpu.memory_space<vmem>>, vector<8x1xf32>,
      %cst_6 = arith.constant 0.000000e+00 : f32
      %14 = vector.broadcast %cst_6 : f32 to vector<8x1xf32>
      %c0_7 = arith.constant 0 : index
      %c0_8 = arith.constant 0 : index
      %15 = vector.load %arg10[%c0_7, %c0_8] : memref<8x1xf32, #tpu.memory_space<vmem>>, vector<8x1xf32>
      tpu.vector_store %arg10[%c0_7, %c0_8], %14 {strides = array<i32>} : memref<8x1xf32, #tpu.memory_space<vmem>>, vector<8x1xf32>,
      %cst_9 = arith.constant 0.000000e+00 : f32
      %16 = vector.broadcast %cst_9 : f32 to vector<8x128xf32>
      %c0_10 = arith.constant 0 : index
      %c0_11 = arith.constant 0 : index
      %17 = vector.load %arg11[%c0_10, %c0_11] : memref<8x128xf32, #tpu.memory_space<vmem>>, vector<8x128xf32>
      tpu.vector_store %arg11[%c0_10, %c0_11], %16 {strides = array<i32>} : memref<8x128xf32, #tpu.memory_space<vmem>>, vector<8x128xf32>,
    } else {
    }
    %c8_i32 = arith.constant 8 : i32
    %3 = arith.muli %arg3, %c8_i32 : i32
    %c8_i32_1 = arith.constant 8 : i32
    %4 = arith.muli %arg2, %c8_i32_1 : i32
    %c7_i32 = arith.constant 7 : i32
    %5 = arith.addi %4, %c7_i32 : i32
    %6 = arith.cmpi sle, %3, %5 : i32
    %7 = arith.extui %6 : i1 to i32
    %c0_i32_2 = arith.constant 0 : i32
    %8 = arith.cmpi ne, %7, %c0_i32_2 : i32
    scf.if %8 {
      %c0 = arith.constant 0 : index
      %c0_5 = arith.constant 0 : index
      %c0_6 = arith.constant 0 : index
      %12 = vector.load %arg4[%c0, %c0_5, %c0_6] : memref<1x8x128xbf16, #tpu.memory_space<vmem>>, vector<1x8x128xbf16>
      %13 = vector.shape_cast %12 : vector<1x8x128xbf16> to vector<8x128xbf16>
      %c0_7 = arith.constant 0 : index
      %c0_8 = arith.constant 0 : index
      %c0_9 = arith.constant 0 : index
      %14 = vector.load %arg5[%c0_7, %c0_8, %c0_9] : memref<1x8x128xbf16, #tpu.memory_space<vmem>>, vector<1x8x128xbf16>
      %15 = vector.shape_cast %14 : vector<1x8x128xbf16> to vector<8x128xbf16>
      %c0_10 = arith.constant 0 : index
      %c0_11 = arith.constant 0 : index
      %c0_12 = arith.constant 0 : index
      %16 = vector.load %arg6[%c0_10, %c0_11, %c0_12] : memref<1x8x128xbf16, #tpu.memory_space<vmem>>, vector<1x8x128xbf16>
      %17 = vector.shape_cast %16 : vector<1x8x128xbf16> to vector<8x128xbf16>
      %cst = arith.constant dense<0.000000e+00> : vector<8x8xf32>
      %18 = tpu.matmul %13, %15, %cst {dimension_numbers = #tpu.dot_dimension_numbers<[1], [1], [0], [0], [0, 0, 1, 0], [], []>} : vector<8x128xbf16>, vector<8x128xbf16>, vector<8x8xf32> -> vector<8x8xf32>
      %c8_i32_13 = arith.constant 8 : i32
      %19 = arith.muli %arg2, %c8_i32_13 : i32
      %20 = tpu.iota {dimensions = array<i32: 0>} : vector<8x8xi32>
      %21 = vector.broadcast %19 : i32 to vector<8x8xi32>
      %22 = arith.addi %21, %20 : vector<8x8xi32>
      %c8_i32_14 = arith.constant 8 : i32
      %23 = arith.muli %arg3, %c8_i32_14 : i32
      %24 = tpu.iota {dimensions = array<i32: 1>} : vector<8x8xi32>
      %25 = vector.broadcast %23 : i32 to vector<8x8xi32>
      %26 = arith.addi %25, %24 : vector<8x8xi32>
      %c0_15 = arith.constant 0 : index
      %c0_16 = arith.constant 0 : index
      %c0_17 = arith.constant 0 : index
      %27 = vector.load %arg7[%c0_15, %c0_16, %c0_17] : memref<1x1x8xf32, #tpu.memory_space<vmem>>, vector<1x1x8xf32>
      %28 = vector.shape_cast %27 : vector<1x1x8xf32> to vector<1x8xf32>
      %cst_18 = arith.constant 5.000000e-01 : f32
      %29 = vector.broadcast %cst_18 : f32 to vector<1x8xf32>
      %30 = arith.cmpf ogt, %28, %29 : vector<1x8xf32>
      %31 = arith.cmpi sle, %26, %22 : vector<8x8xi32>
      %32 = vector.broadcast %30 : vector<1x8xi1> to vector<8x8xi1>
      %33 = arith.andi %31, %32 : vector<8x8xi1>
      %cst_19 = arith.constant -1.000000e+30 : f32
      %34 = vector.broadcast %cst_19 : f32 to vector<8x8xf32>
      %35 = arith.select %33, %18, %34 : vector<8x8xi1>, vector<8x8xf32>
      %c0_20 = arith.constant 0 : index
      %c0_21 = arith.constant 0 : index
      %36 = vector.load %arg9[%c0_20, %c0_21] : memref<8x1xf32, #tpu.memory_space<vmem>>, vector<8x1xf32>
      %cst_22 = arith.constant dense<0xFF800000> : vector<8xf32>
      %37 = vector.multi_reduction <maximumf>, %35, %cst_22 [1] : vector<8x8xf32> to vector<8xf32>
      %38 = vector.shape_cast %37 : vector<8xf32> to vector<8x1xf32>
      %39 = arith.maximumf %36, %38 : vector<8x1xf32>
      %40 = arith.subf %36, %39 : vector<8x1xf32>
      %41 = math.exp %40 : vector<8x1xf32>
      %42 = vector.broadcast %39 : vector<8x1xf32> to vector<8x8xf32>
      %43 = arith.subf %35, %42 : vector<8x8xf32>
      %44 = math.exp %43 : vector<8x8xf32>
      %c0_23 = arith.constant 0 : index
      %c0_24 = arith.constant 0 : index
      %45 = vector.load %arg10[%c0_23, %c0_24] : memref<8x1xf32, #tpu.memory_space<vmem>>, vector<8x1xf32>
      %46 = arith.mulf %41, %45 : vector<8x1xf32>
      %cst_25 = arith.constant dense<0.000000e+00> : vector<8xf32>
      %47 = vector.multi_reduction <add>, %44, %cst_25 [1] : vector<8x8xf32> to vector<8xf32>
      %48 = vector.shape_cast %47 : vector<8xf32> to vector<8x1xf32>
      %49 = arith.addf %46, %48 : vector<8x1xf32>
      %c0_26 = arith.constant 0 : index
      %c0_27 = arith.constant 0 : index
      %50 = vector.load %arg10[%c0_26, %c0_27] : memref<8x1xf32, #tpu.memory_space<vmem>>, vector<8x1xf32>
      tpu.vector_store %arg10[%c0_26, %c0_27], %49 {strides = array<i32>} : memref<8x1xf32, #tpu.memory_space<vmem>>, vector<8x1xf32>,
      %c0_28 = arith.constant 0 : index
      %c0_29 = arith.constant 0 : index
      %51 = vector.load %arg11[%c0_28, %c0_29] : memref<8x128xf32, #tpu.memory_space<vmem>>, vector<8x128xf32>
      %52 = vector.broadcast %41 : vector<8x1xf32> to vector<8x128xf32>
      %53 = arith.mulf %52, %51 : vector<8x128xf32>
      %54 = arith.truncf %44 : vector<8x8xf32> to vector<8x8xbf16>
      %cst_30 = arith.constant dense<0.000000e+00> : vector<8x128xf32>
      %55 = tpu.matmul %54, %17, %cst_30 {dimension_numbers = #tpu.dot_dimension_numbers<[1], [0], [0], [1], [0, 0, 1, 1], [], []>} : vector<8x8xbf16>, vector<8x128xbf16>, vector<8x128xf32> -> vector<8x128xf32>
      %56 = arith.addf %53, %55 : vector<8x128xf32>
      %c0_31 = arith.constant 0 : index
      %c0_32 = arith.constant 0 : index
      %57 = vector.load %arg11[%c0_31, %c0_32] : memref<8x128xf32, #tpu.memory_space<vmem>>, vector<8x128xf32>
      tpu.vector_store %arg11[%c0_31, %c0_32], %56 {strides = array<i32>} : memref<8x128xf32, #tpu.memory_space<vmem>>, vector<8x128xf32>,
      %c0_33 = arith.constant 0 : index
      %c0_34 = arith.constant 0 : index
      %58 = vector.load %arg9[%c0_33, %c0_34] : memref<8x1xf32, #tpu.memory_space<vmem>>, vector<8x1xf32>
      tpu.vector_store %arg9[%c0_33, %c0_34], %39 {strides = array<i32>} : memref<8x1xf32, #tpu.memory_space<vmem>>, vector<8x1xf32>,
    } else {
    }
    %c0_i32_3 = arith.constant 0 : i32
    %9 = arith.cmpi eq, %arg3, %c0_i32_3 : i32
    %10 = arith.extui %9 : i1 to i32
    %c0_i32_4 = arith.constant 0 : i32
    %11 = arith.cmpi ne, %10, %c0_i32_4 : i32
    scf.if %11 {
      %c0 = arith.constant 0 : index
      %c0_5 = arith.constant 0 : index
      %12 = vector.load %arg11[%c0, %c0_5] : memref<8x128xf32, #tpu.memory_space<vmem>>, vector<8x128xf32>
      %c0_6 = arith.constant 0 : index
      %c0_7 = arith.constant 0 : index
      %13 = vector.load %arg10[%c0_6, %c0_7] : memref<8x1xf32, #tpu.memory_space<vmem>>, vector<8x1xf32>
      %14 = vector.broadcast %13 : vector<8x1xf32> to vector<8x128xf32>
      %15 = arith.divf %12, %14 : vector<8x128xf32>
      %16 = arith.truncf %15 : vector<8x128xf32> to vector<8x128xbf16>
      %c0_8 = arith.constant 0 : index
      %c0_9 = arith.constant 0 : index
      %c0_10 = arith.constant 0 : index
      %17 = vector.load %arg8[%c0_8, %c0_9, %c0_10] : memref<1x8x128xbf16, #tpu.memory_space<vmem>>, vector<1x8x128xbf16>
      %18 = vector.shape_cast %17 : vector<1x8x128xbf16> to vector<8x128xbf16>
      %19 = vector.shape_cast %16 : vector<8x128xbf16> to vector<1x8x128xbf16>
      tpu.vector_store %arg8[%c0_8, %c0_9, %c0_10], %19 {strides = array<i32>} : memref<1x8x128xbf16, #tpu.memory_space<vmem>>, vector<1x8x128xbf16>,
    } else {
    }
    return
  }
  func.func @transform_0(%arg0: i32, %arg1: i32, %arg2: i32, %arg3: i32) -> (i32, i32, i32) {
    %c0_i32 = arith.constant 0 : i32
    return %arg0, %arg2, %arg1 : i32, i32, i32
  }
  func.func @transform_1(%arg0: i32, %arg1: i32, %arg2: i32, %arg3: i32) -> (i32, i32, i32) {
    %c2_i32 = arith.constant 2 : i32
    %0 = arith.addi %c2_i32, %arg1 : i32
    %c0_i32 = arith.constant 0 : i32
    return %arg0, %arg3, %0 : i32, i32, i32
  }
  func.func @transform_2(%arg0: i32, %arg1: i32, %arg2: i32, %arg3: i32) -> (i32, i32, i32) {
    %c4_i32 = arith.constant 4 : i32
    %0 = arith.addi %c4_i32, %arg1 : i32
    %c0_i32 = arith.constant 0 : i32
    return %arg0, %arg3, %0 : i32, i32, i32
  }
  func.func @transform_3(%arg0: i32, %arg1: i32, %arg2: i32, %arg3: i32) -> (i32, i32, i32) {
    %c0_i32 = arith.constant 0 : i32
    %c0_i32_0 = arith.constant 0 : i32
    return %arg0, %c0_i32, %arg3 : i32, i32, i32
  }
  func.func @transform_4(%arg0: i32, %arg1: i32, %arg2: i32, %arg3: i32) -> (i32, i32, i32) {
    %c0_i32 = arith.constant 0 : i32
    return %arg0, %arg2, %arg1 : i32, i32, i32
  }
}

module attributes {stable_mosaic.version = 11 : i64} {
  func.func @_matmul_residual_kernel(%arg0: i32, %arg1: i32, %arg2: i32, %arg3: memref<16x256xbf16, #tpu.memory_space<vmem>>, %arg4: memref<256x256xbf16, #tpu.memory_space<vmem>>, %arg5: memref<1x256xf32, #tpu.memory_space<vmem>>, %arg6: memref<16x256xf32, #tpu.memory_space<vmem>>, %arg7: memref<16x256xf32, #tpu.memory_space<vmem>>, %arg8: memref<16x256xf32, #tpu.memory_space<vmem>>) attributes {dimension_semantics = [#tpu.dimension_semantics<parallel>, #tpu.dimension_semantics<parallel>, #tpu.dimension_semantics<arbitrary>], iteration_bounds = array<i64: 1, 1, 1>, scalar_prefetch = 0 : i64, scratch_operands = 1 : i64, tpu.core_type = #tpu.core_type<tc>, window_params = [{transform_indices = @transform_0, window_bounds = array<i64: 16, 256>}, {transform_indices = @transform_1, window_bounds = array<i64: 256, 256>}, {transform_indices = @transform_2, window_bounds = array<i64: 1, 256>}, {transform_indices = @transform_3, window_bounds = array<i64: 16, 256>}, {transform_indices = @transform_4, window_bounds = array<i64: 16, 256>}]} {
    %c0_i32 = arith.constant 0 : i32
    %0 = arith.cmpi eq, %arg2, %c0_i32 : i32
    %1 = arith.extui %0 : i1 to i32
    %c0_i32_0 = arith.constant 0 : i32
    %2 = arith.cmpi ne, %1, %c0_i32_0 : i32
    scf.if %2 {
      %cst_10 = arith.constant 0.000000e+00 : f32
      %12 = vector.broadcast %cst_10 : f32 to vector<16x256xf32>
      %c0_11 = arith.constant 0 : index
      %c0_12 = arith.constant 0 : index
      %13 = vector.load %arg8[%c0_11, %c0_12] : memref<16x256xf32, #tpu.memory_space<vmem>>, vector<16x256xf32>
      tpu.vector_store %arg8[%c0_11, %c0_12], %12 {strides = array<i32>} : memref<16x256xf32, #tpu.memory_space<vmem>>, vector<16x256xf32>,
    } else {
    }
    %c0 = arith.constant 0 : index
    %c0_1 = arith.constant 0 : index
    %3 = vector.load %arg8[%c0, %c0_1] : memref<16x256xf32, #tpu.memory_space<vmem>>, vector<16x256xf32>
    %c0_2 = arith.constant 0 : index
    %c0_3 = arith.constant 0 : index
    %4 = vector.load %arg3[%c0_2, %c0_3] : memref<16x256xbf16, #tpu.memory_space<vmem>>, vector<16x256xbf16>
    %c0_4 = arith.constant 0 : index
    %c0_5 = arith.constant 0 : index
    %5 = vector.load %arg4[%c0_4, %c0_5] : memref<256x256xbf16, #tpu.memory_space<vmem>>, vector<256x256xbf16>
    %cst = arith.constant dense<0.000000e+00> : vector<16x256xf32>
    %6 = tpu.matmul %4, %5, %cst {dimension_numbers = #tpu.dot_dimension_numbers<[1], [0], [0], [1], [0, 0, 1, 1], [], []>} : vector<16x256xbf16>, vector<256x256xbf16>, vector<16x256xf32> -> vector<16x256xf32>
    %7 = arith.addf %3, %6 : vector<16x256xf32>
    %c0_6 = arith.constant 0 : index
    %c0_7 = arith.constant 0 : index
    %8 = vector.load %arg8[%c0_6, %c0_7] : memref<16x256xf32, #tpu.memory_space<vmem>>, vector<16x256xf32>
    tpu.vector_store %arg8[%c0_6, %c0_7], %7 {strides = array<i32>} : memref<16x256xf32, #tpu.memory_space<vmem>>, vector<16x256xf32>,
    %c0_i32_8 = arith.constant 0 : i32
    %9 = arith.cmpi eq, %arg2, %c0_i32_8 : i32
    %10 = arith.extui %9 : i1 to i32
    %c0_i32_9 = arith.constant 0 : i32
    %11 = arith.cmpi ne, %10, %c0_i32_9 : i32
    scf.if %11 {
      %c0_10 = arith.constant 0 : index
      %c0_11 = arith.constant 0 : index
      %12 = vector.load %arg8[%c0_10, %c0_11] : memref<16x256xf32, #tpu.memory_space<vmem>>, vector<16x256xf32>
      %c0_12 = arith.constant 0 : index
      %c0_13 = arith.constant 0 : index
      %13 = vector.load %arg5[%c0_12, %c0_13] : memref<1x256xf32, #tpu.memory_space<vmem>>, vector<1x256xf32>
      %14 = vector.broadcast %13 : vector<1x256xf32> to vector<16x256xf32>
      %15 = arith.addf %12, %14 : vector<16x256xf32>
      %c0_14 = arith.constant 0 : index
      %c0_15 = arith.constant 0 : index
      %16 = vector.load %arg6[%c0_14, %c0_15] : memref<16x256xf32, #tpu.memory_space<vmem>>, vector<16x256xf32>
      %17 = arith.addf %15, %16 : vector<16x256xf32>
      %c0_16 = arith.constant 0 : index
      %c0_17 = arith.constant 0 : index
      %18 = vector.load %arg7[%c0_16, %c0_17] : memref<16x256xf32, #tpu.memory_space<vmem>>, vector<16x256xf32>
      tpu.vector_store %arg7[%c0_16, %c0_17], %17 {strides = array<i32>} : memref<16x256xf32, #tpu.memory_space<vmem>>, vector<16x256xf32>,
    } else {
    }
    return
  }
  func.func @transform_0(%arg0: i32, %arg1: i32, %arg2: i32) -> (i32, i32) {
    %c0_i32 = arith.constant 0 : i32
    return %arg0, %arg2 : i32, i32
  }
  func.func @transform_1(%arg0: i32, %arg1: i32, %arg2: i32) -> (i32, i32) {
    %c0_i32 = arith.constant 0 : i32
    return %arg2, %arg1 : i32, i32
  }
  func.func @transform_2(%arg0: i32, %arg1: i32, %arg2: i32) -> (i32, i32) {
    %c0_i32 = arith.constant 0 : i32
    %c0_i32_0 = arith.constant 0 : i32
    return %c0_i32, %arg1 : i32, i32
  }
  func.func @transform_3(%arg0: i32, %arg1: i32, %arg2: i32) -> (i32, i32) {
    %c0_i32 = arith.constant 0 : i32
    return %arg0, %arg1 : i32, i32
  }
  func.func @transform_4(%arg0: i32, %arg1: i32, %arg2: i32) -> (i32, i32) {
    %c0_i32 = arith.constant 0 : i32
    return %arg0, %arg1 : i32, i32
  }
}

module attributes {stable_mosaic.version = 11 : i64} {
  func.func @_ln_matmul_kernel(%arg0: i32, %arg1: i32, %arg2: memref<16x256xf32, #tpu.memory_space<vmem>>, %arg3: memref<1x256xf32, #tpu.memory_space<vmem>>, %arg4: memref<1x256xf32, #tpu.memory_space<vmem>>, %arg5: memref<256x256xbf16, #tpu.memory_space<vmem>>, %arg6: memref<1x256xf32, #tpu.memory_space<vmem>>, %arg7: memref<16x256xbf16, #tpu.memory_space<vmem>>, %arg8: memref<16x256xbf16, #tpu.memory_space<vmem>>) attributes {dimension_semantics = [#tpu.dimension_semantics<parallel>, #tpu.dimension_semantics<arbitrary>], iteration_bounds = array<i64: 1, 4>, scalar_prefetch = 0 : i64, scratch_operands = 1 : i64, tpu.core_type = #tpu.core_type<tc>, window_params = [{transform_indices = @transform_0, window_bounds = array<i64: 16, 256>}, {pipeline_mode = #tpu.pipeline_mode<synchronous>, transform_indices = @transform_1, window_bounds = array<i64: 1, 256>}, {pipeline_mode = #tpu.pipeline_mode<synchronous>, transform_indices = @transform_2, window_bounds = array<i64: 1, 256>}, {transform_indices = @transform_3, window_bounds = array<i64: 256, 256>}, {transform_indices = @transform_4, window_bounds = array<i64: 1, 256>}, {transform_indices = @transform_5, window_bounds = array<i64: 16, 256>}]} {
    %c0_i32 = arith.constant 0 : i32
    %0 = arith.cmpi eq, %arg1, %c0_i32 : i32
    %1 = arith.extui %0 : i1 to i32
    %c0_i32_0 = arith.constant 0 : i32
    %2 = arith.cmpi ne, %1, %c0_i32_0 : i32
    scf.if %2 {
      %c0_12 = arith.constant 0 : index
      %c0_13 = arith.constant 0 : index
      %24 = vector.load %arg2[%c0_12, %c0_13] : memref<16x256xf32, #tpu.memory_space<vmem>>, vector<16x256xf32>
      %cst_14 = arith.constant dense<0.000000e+00> : vector<16xf32>
      %25 = vector.multi_reduction <add>, %24, %cst_14 [1] : vector<16x256xf32> to vector<16xf32>
      %26 = vector.shape_cast %25 : vector<16xf32> to vector<16x1xf32>
      %cst_15 = arith.constant 2.560000e+02 : f32
      %27 = vector.broadcast %cst_15 : f32 to vector<16x1xf32>
      %28 = arith.divf %26, %27 : vector<16x1xf32>
      %29 = vector.broadcast %28 : vector<16x1xf32> to vector<16x256xf32>
      %30 = arith.subf %24, %29 : vector<16x256xf32>
      %31 = arith.mulf %30, %30 : vector<16x256xf32>
      %cst_16 = arith.constant dense<0.000000e+00> : vector<16xf32>
      %32 = vector.multi_reduction <add>, %31, %cst_16 [1] : vector<16x256xf32> to vector<16xf32>
      %33 = vector.shape_cast %32 : vector<16xf32> to vector<16x1xf32>
      %cst_17 = arith.constant 2.560000e+02 : f32
      %34 = vector.broadcast %cst_17 : f32 to vector<16x1xf32>
      %35 = arith.divf %33, %34 : vector<16x1xf32>
      %cst_18 = arith.constant 9.99999974E-6 : f32
      %36 = vector.broadcast %cst_18 : f32 to vector<16x1xf32>
      %37 = arith.addf %35, %36 : vector<16x1xf32>
      %38 = math.rsqrt %37 : vector<16x1xf32>
      %39 = vector.broadcast %38 : vector<16x1xf32> to vector<16x256xf32>
      %40 = arith.mulf %30, %39 : vector<16x256xf32>
      %c0_19 = arith.constant 0 : index
      %c0_20 = arith.constant 0 : index
      %41 = vector.load %arg3[%c0_19, %c0_20] : memref<1x256xf32, #tpu.memory_space<vmem>>, vector<1x256xf32>
      %42 = vector.broadcast %41 : vector<1x256xf32> to vector<16x256xf32>
      %43 = arith.mulf %40, %42 : vector<16x256xf32>
      %c0_21 = arith.constant 0 : index
      %c0_22 = arith.constant 0 : index
      %44 = vector.load %arg4[%c0_21, %c0_22] : memref<1x256xf32, #tpu.memory_space<vmem>>, vector<1x256xf32>
      %45 = vector.broadcast %44 : vector<1x256xf32> to vector<16x256xf32>
      %46 = arith.addf %43, %45 : vector<16x256xf32>
      %47 = arith.truncf %46 : vector<16x256xf32> to vector<16x256xbf16>
      %c0_23 = arith.constant 0 : index
      %c0_24 = arith.constant 0 : index
      %48 = vector.load %arg8[%c0_23, %c0_24] : memref<16x256xbf16, #tpu.memory_space<vmem>>, vector<16x256xbf16>
      tpu.vector_store %arg8[%c0_23, %c0_24], %47 {strides = array<i32>} : memref<16x256xbf16, #tpu.memory_space<vmem>>, vector<16x256xbf16>,
    } else {
    }
    %c0 = arith.constant 0 : index
    %c0_1 = arith.constant 0 : index
    %3 = vector.load %arg8[%c0, %c0_1] : memref<16x256xbf16, #tpu.memory_space<vmem>>, vector<16x256xbf16>
    %c0_2 = arith.constant 0 : index
    %c0_3 = arith.constant 0 : index
    %4 = vector.load %arg5[%c0_2, %c0_3] : memref<256x256xbf16, #tpu.memory_space<vmem>>, vector<256x256xbf16>
    %cst = arith.constant dense<0.000000e+00> : vector<16x256xf32>
    %5 = tpu.matmul %3, %4, %cst {dimension_numbers = #tpu.dot_dimension_numbers<[1], [0], [0], [1], [0, 0, 1, 1], [], []>} : vector<16x256xbf16>, vector<256x256xbf16>, vector<16x256xf32> -> vector<16x256xf32>
    %c0_4 = arith.constant 0 : index
    %c0_5 = arith.constant 0 : index
    %6 = vector.load %arg6[%c0_4, %c0_5] : memref<1x256xf32, #tpu.memory_space<vmem>>, vector<1x256xf32>
    %7 = vector.broadcast %6 : vector<1x256xf32> to vector<16x256xf32>
    %8 = arith.addf %5, %7 : vector<16x256xf32>
    %cst_6 = arith.constant 5.000000e-01 : f32
    %9 = vector.broadcast %cst_6 : f32 to vector<16x256xf32>
    %10 = arith.mulf %9, %8 : vector<16x256xf32>
    %cst_7 = arith.constant 4.471500e-02 : f32
    %11 = vector.broadcast %cst_7 : f32 to vector<16x256xf32>
    %12 = arith.mulf %11, %8 : vector<16x256xf32>
    %13 = arith.mulf %12, %8 : vector<16x256xf32>
    %14 = arith.mulf %13, %8 : vector<16x256xf32>
    %15 = arith.addf %8, %14 : vector<16x256xf32>
    %cst_8 = arith.constant 0.797884583 : f32
    %16 = vector.broadcast %cst_8 : f32 to vector<16x256xf32>
    %17 = arith.mulf %16, %15 : vector<16x256xf32>
    %18 = math.tanh %17 : vector<16x256xf32>
    %cst_9 = arith.constant 1.000000e+00 : f32
    %19 = vector.broadcast %cst_9 : f32 to vector<16x256xf32>
    %20 = arith.addf %19, %18 : vector<16x256xf32>
    %21 = arith.mulf %10, %20 : vector<16x256xf32>
    %22 = arith.truncf %21 : vector<16x256xf32> to vector<16x256xbf16>
    %c0_10 = arith.constant 0 : index
    %c0_11 = arith.constant 0 : index
    %23 = vector.load %arg7[%c0_10, %c0_11] : memref<16x256xbf16, #tpu.memory_space<vmem>>, vector<16x256xbf16>
    tpu.vector_store %arg7[%c0_10, %c0_11], %22 {strides = array<i32>} : memref<16x256xbf16, #tpu.memory_space<vmem>>, vector<16x256xbf16>,
    return
  }
  func.func @transform_0(%arg0: i32, %arg1: i32) -> (i32, i32) {
    %c0_i32 = arith.constant 0 : i32
    %c0_i32_0 = arith.constant 0 : i32
    return %arg0, %c0_i32 : i32, i32
  }
  func.func @transform_1(%arg0: i32, %arg1: i32) -> (i32, i32) {
    %c0_i32 = arith.constant 0 : i32
    %c0_i32_0 = arith.constant 0 : i32
    %c0_i32_1 = arith.constant 0 : i32
    return %c0_i32, %c0_i32_0 : i32, i32
  }
  func.func @transform_2(%arg0: i32, %arg1: i32) -> (i32, i32) {
    %c0_i32 = arith.constant 0 : i32
    %c0_i32_0 = arith.constant 0 : i32
    %c0_i32_1 = arith.constant 0 : i32
    return %c0_i32, %c0_i32_0 : i32, i32
  }
  func.func @transform_3(%arg0: i32, %arg1: i32) -> (i32, i32) {
    %c0_i32 = arith.constant 0 : i32
    %c0_i32_0 = arith.constant 0 : i32
    return %c0_i32, %arg1 : i32, i32
  }
  func.func @transform_4(%arg0: i32, %arg1: i32) -> (i32, i32) {
    %c0_i32 = arith.constant 0 : i32
    %c0_i32_0 = arith.constant 0 : i32
    return %c0_i32, %arg1 : i32, i32
  }
  func.func @transform_5(%arg0: i32, %arg1: i32) -> (i32, i32) {
    %c0_i32 = arith.constant 0 : i32
    return %arg0, %arg1 : i32, i32
  }
}

module attributes {stable_mosaic.version = 11 : i64} {
  func.func @_matmul_residual_kernel(%arg0: i32, %arg1: i32, %arg2: i32, %arg3: memref<16x512xbf16, #tpu.memory_space<vmem>>, %arg4: memref<512x256xbf16, #tpu.memory_space<vmem>>, %arg5: memref<1x256xf32, #tpu.memory_space<vmem>>, %arg6: memref<16x256xf32, #tpu.memory_space<vmem>>, %arg7: memref<16x256xf32, #tpu.memory_space<vmem>>, %arg8: memref<16x256xf32, #tpu.memory_space<vmem>>) attributes {dimension_semantics = [#tpu.dimension_semantics<parallel>, #tpu.dimension_semantics<parallel>, #tpu.dimension_semantics<arbitrary>], iteration_bounds = array<i64: 1, 1, 2>, scalar_prefetch = 0 : i64, scratch_operands = 1 : i64, tpu.core_type = #tpu.core_type<tc>, window_params = [{transform_indices = @transform_0, window_bounds = array<i64: 16, 512>}, {transform_indices = @transform_1, window_bounds = array<i64: 512, 256>}, {transform_indices = @transform_2, window_bounds = array<i64: 1, 256>}, {transform_indices = @transform_3, window_bounds = array<i64: 16, 256>}, {transform_indices = @transform_4, window_bounds = array<i64: 16, 256>}]} {
    %c0_i32 = arith.constant 0 : i32
    %0 = arith.cmpi eq, %arg2, %c0_i32 : i32
    %1 = arith.extui %0 : i1 to i32
    %c0_i32_0 = arith.constant 0 : i32
    %2 = arith.cmpi ne, %1, %c0_i32_0 : i32
    scf.if %2 {
      %cst_9 = arith.constant 0.000000e+00 : f32
      %12 = vector.broadcast %cst_9 : f32 to vector<16x256xf32>
      %c0_10 = arith.constant 0 : index
      %c0_11 = arith.constant 0 : index
      %13 = vector.load %arg8[%c0_10, %c0_11] : memref<16x256xf32, #tpu.memory_space<vmem>>, vector<16x256xf32>
      tpu.vector_store %arg8[%c0_10, %c0_11], %12 {strides = array<i32>} : memref<16x256xf32, #tpu.memory_space<vmem>>, vector<16x256xf32>,
    } else {
    }
    %c0 = arith.constant 0 : index
    %c0_1 = arith.constant 0 : index
    %3 = vector.load %arg8[%c0, %c0_1] : memref<16x256xf32, #tpu.memory_space<vmem>>, vector<16x256xf32>
    %c0_2 = arith.constant 0 : index
    %c0_3 = arith.constant 0 : index
    %4 = vector.load %arg3[%c0_2, %c0_3] : memref<16x512xbf16, #tpu.memory_space<vmem>>, vector<16x512xbf16>
    %c0_4 = arith.constant 0 : index
    %c0_5 = arith.constant 0 : index
    %5 = vector.load %arg4[%c0_4, %c0_5] : memref<512x256xbf16, #tpu.memory_space<vmem>>, vector<512x256xbf16>
    %cst = arith.constant dense<0.000000e+00> : vector<16x256xf32>
    %6 = tpu.matmul %4, %5, %cst {dimension_numbers = #tpu.dot_dimension_numbers<[1], [0], [0], [1], [0, 0, 1, 1], [], []>} : vector<16x512xbf16>, vector<512x256xbf16>, vector<16x256xf32> -> vector<16x256xf32>
    %7 = arith.addf %3, %6 : vector<16x256xf32>
    %c0_6 = arith.constant 0 : index
    %c0_7 = arith.constant 0 : index
    %8 = vector.load %arg8[%c0_6, %c0_7] : memref<16x256xf32, #tpu.memory_space<vmem>>, vector<16x256xf32>
    tpu.vector_store %arg8[%c0_6, %c0_7], %7 {strides = array<i32>} : memref<16x256xf32, #tpu.memory_space<vmem>>, vector<16x256xf32>,
    %c1_i32 = arith.constant 1 : i32
    %9 = arith.cmpi eq, %arg2, %c1_i32 : i32
    %10 = arith.extui %9 : i1 to i32
    %c0_i32_8 = arith.constant 0 : i32
    %11 = arith.cmpi ne, %10, %c0_i32_8 : i32
    scf.if %11 {
      %c0_9 = arith.constant 0 : index
      %c0_10 = arith.constant 0 : index
      %12 = vector.load %arg8[%c0_9, %c0_10] : memref<16x256xf32, #tpu.memory_space<vmem>>, vector<16x256xf32>
      %c0_11 = arith.constant 0 : index
      %c0_12 = arith.constant 0 : index
      %13 = vector.load %arg5[%c0_11, %c0_12] : memref<1x256xf32, #tpu.memory_space<vmem>>, vector<1x256xf32>
      %14 = vector.broadcast %13 : vector<1x256xf32> to vector<16x256xf32>
      %15 = arith.addf %12, %14 : vector<16x256xf32>
      %c0_13 = arith.constant 0 : index
      %c0_14 = arith.constant 0 : index
      %16 = vector.load %arg6[%c0_13, %c0_14] : memref<16x256xf32, #tpu.memory_space<vmem>>, vector<16x256xf32>
      %17 = arith.addf %15, %16 : vector<16x256xf32>
      %c0_15 = arith.constant 0 : index
      %c0_16 = arith.constant 0 : index
      %18 = vector.load %arg7[%c0_15, %c0_16] : memref<16x256xf32, #tpu.memory_space<vmem>>, vector<16x256xf32>
      tpu.vector_store %arg7[%c0_15, %c0_16], %17 {strides = array<i32>} : memref<16x256xf32, #tpu.memory_space<vmem>>, vector<16x256xf32>,
    } else {
    }
    return
  }
  func.func @transform_0(%arg0: i32, %arg1: i32, %arg2: i32) -> (i32, i32) {
    %c0_i32 = arith.constant 0 : i32
    return %arg0, %arg2 : i32, i32
  }
  func.func @transform_1(%arg0: i32, %arg1: i32, %arg2: i32) -> (i32, i32) {
    %c0_i32 = arith.constant 0 : i32
    return %arg2, %arg1 : i32, i32
  }
  func.func @transform_2(%arg0: i32, %arg1: i32, %arg2: i32) -> (i32, i32) {
    %c0_i32 = arith.constant 0 : i32
    %c0_i32_0 = arith.constant 0 : i32
    return %c0_i32, %arg1 : i32, i32
  }
  func.func @transform_3(%arg0: i32, %arg1: i32, %arg2: i32) -> (i32, i32) {
    %c0_i32 = arith.constant 0 : i32
    return %arg0, %arg1 : i32, i32
  }
  func.func @transform_4(%arg0: i32, %arg1: i32, %arg2: i32) -> (i32, i32) {
    %c0_i32 = arith.constant 0 : i32
    return %arg0, %arg1 : i32, i32
  }
}

module attributes {stable_mosaic.version = 11 : i64} {
  func.func @_lnf_head_ce_kernel(%arg0: i32, %arg1: i32, %arg2: memref<16x256xf32, #tpu.memory_space<vmem>>, %arg3: memref<1x256xf32, #tpu.memory_space<vmem>>, %arg4: memref<1x256xf32, #tpu.memory_space<vmem>>, %arg5: memref<256x512xbf16, #tpu.memory_space<vmem>>, %arg6: memref<16x1xi32, #tpu.memory_space<vmem>>, %arg7: memref<16x1xf32, #tpu.memory_space<vmem>>, %arg8: memref<16x512xbf16, #tpu.memory_space<vmem>>, %arg9: memref<16x1xf32, #tpu.memory_space<vmem>>, %arg10: memref<16x256xbf16, #tpu.memory_space<vmem>>, %arg11: memref<16x1xf32, #tpu.memory_space<vmem>>, %arg12: memref<16x1xf32, #tpu.memory_space<vmem>>, %arg13: memref<16x1xf32, #tpu.memory_space<vmem>>) attributes {dimension_semantics = [#tpu.dimension_semantics<parallel>, #tpu.dimension_semantics<arbitrary>], iteration_bounds = array<i64: 1, 1>, scalar_prefetch = 0 : i64, scratch_operands = 4 : i64, tpu.core_type = #tpu.core_type<tc>, window_params = [{transform_indices = @transform_0, window_bounds = array<i64: 16, 256>}, {pipeline_mode = #tpu.pipeline_mode<synchronous>, transform_indices = @transform_1, window_bounds = array<i64: 1, 256>}, {pipeline_mode = #tpu.pipeline_mode<synchronous>, transform_indices = @transform_2, window_bounds = array<i64: 1, 256>}, {transform_indices = @transform_3, window_bounds = array<i64: 256, 512>}, {transform_indices = @transform_4, window_bounds = array<i64: 16, 1>}, {transform_indices = @transform_5, window_bounds = array<i64: 16, 1>}, {transform_indices = @transform_6, window_bounds = array<i64: 16, 512>}, {transform_indices = @transform_7, window_bounds = array<i64: 16, 1>}]} {
    %c0_i32 = arith.constant 0 : i32
    %0 = arith.cmpi eq, %arg1, %c0_i32 : i32
    %1 = arith.extui %0 : i1 to i32
    %c0_i32_0 = arith.constant 0 : i32
    %2 = arith.cmpi ne, %1, %c0_i32_0 : i32
    scf.if %2 {
      %c0_27 = arith.constant 0 : index
      %c0_28 = arith.constant 0 : index
      %45 = vector.load %arg2[%c0_27, %c0_28] : memref<16x256xf32, #tpu.memory_space<vmem>>, vector<16x256xf32>
      %cst_29 = arith.constant dense<0.000000e+00> : vector<16xf32>
      %46 = vector.multi_reduction <add>, %45, %cst_29 [1] : vector<16x256xf32> to vector<16xf32>
      %47 = vector.shape_cast %46 : vector<16xf32> to vector<16x1xf32>
      %cst_30 = arith.constant 2.560000e+02 : f32
      %48 = vector.broadcast %cst_30 : f32 to vector<16x1xf32>
      %49 = arith.divf %47, %48 : vector<16x1xf32>
      %50 = vector.broadcast %49 : vector<16x1xf32> to vector<16x256xf32>
      %51 = arith.subf %45, %50 : vector<16x256xf32>
      %52 = arith.mulf %51, %51 : vector<16x256xf32>
      %cst_31 = arith.constant dense<0.000000e+00> : vector<16xf32>
      %53 = vector.multi_reduction <add>, %52, %cst_31 [1] : vector<16x256xf32> to vector<16xf32>
      %54 = vector.shape_cast %53 : vector<16xf32> to vector<16x1xf32>
      %cst_32 = arith.constant 2.560000e+02 : f32
      %55 = vector.broadcast %cst_32 : f32 to vector<16x1xf32>
      %56 = arith.divf %54, %55 : vector<16x1xf32>
      %cst_33 = arith.constant 9.99999974E-6 : f32
      %57 = vector.broadcast %cst_33 : f32 to vector<16x1xf32>
      %58 = arith.addf %56, %57 : vector<16x1xf32>
      %59 = math.rsqrt %58 : vector<16x1xf32>
      %60 = vector.broadcast %59 : vector<16x1xf32> to vector<16x256xf32>
      %61 = arith.mulf %51, %60 : vector<16x256xf32>
      %c0_34 = arith.constant 0 : index
      %c0_35 = arith.constant 0 : index
      %62 = vector.load %arg3[%c0_34, %c0_35] : memref<1x256xf32, #tpu.memory_space<vmem>>, vector<1x256xf32>
      %63 = vector.broadcast %62 : vector<1x256xf32> to vector<16x256xf32>
      %64 = arith.mulf %61, %63 : vector<16x256xf32>
      %c0_36 = arith.constant 0 : index
      %c0_37 = arith.constant 0 : index
      %65 = vector.load %arg4[%c0_36, %c0_37] : memref<1x256xf32, #tpu.memory_space<vmem>>, vector<1x256xf32>
      %66 = vector.broadcast %65 : vector<1x256xf32> to vector<16x256xf32>
      %67 = arith.addf %64, %66 : vector<16x256xf32>
      %68 = arith.truncf %67 : vector<16x256xf32> to vector<16x256xbf16>
      %c0_38 = arith.constant 0 : index
      %c0_39 = arith.constant 0 : index
      %69 = vector.load %arg10[%c0_38, %c0_39] : memref<16x256xbf16, #tpu.memory_space<vmem>>, vector<16x256xbf16>
      tpu.vector_store %arg10[%c0_38, %c0_39], %68 {strides = array<i32>} : memref<16x256xbf16, #tpu.memory_space<vmem>>, vector<16x256xbf16>,
      %cst_40 = arith.constant -1.000000e+30 : f32
      %70 = vector.broadcast %cst_40 : f32 to vector<16x1xf32>
      %c0_41 = arith.constant 0 : index
      %c0_42 = arith.constant 0 : index
      %71 = vector.load %arg11[%c0_41, %c0_42] : memref<16x1xf32, #tpu.memory_space<vmem>>, vector<16x1xf32>
      tpu.vector_store %arg11[%c0_41, %c0_42], %70 {strides = array<i32>} : memref<16x1xf32, #tpu.memory_space<vmem>>, vector<16x1xf32>,
      %cst_43 = arith.constant 0.000000e+00 : f32
      %72 = vector.broadcast %cst_43 : f32 to vector<16x1xf32>
      %c0_44 = arith.constant 0 : index
      %c0_45 = arith.constant 0 : index
      %73 = vector.load %arg12[%c0_44, %c0_45] : memref<16x1xf32, #tpu.memory_space<vmem>>, vector<16x1xf32>
      tpu.vector_store %arg12[%c0_44, %c0_45], %72 {strides = array<i32>} : memref<16x1xf32, #tpu.memory_space<vmem>>, vector<16x1xf32>,
      %cst_46 = arith.constant 0.000000e+00 : f32
      %74 = vector.broadcast %cst_46 : f32 to vector<16x1xf32>
      %c0_47 = arith.constant 0 : index
      %c0_48 = arith.constant 0 : index
      %75 = vector.load %arg13[%c0_47, %c0_48] : memref<16x1xf32, #tpu.memory_space<vmem>>, vector<16x1xf32>
      tpu.vector_store %arg13[%c0_47, %c0_48], %74 {strides = array<i32>} : memref<16x1xf32, #tpu.memory_space<vmem>>, vector<16x1xf32>,
    } else {
    }
    %c0 = arith.constant 0 : index
    %c0_1 = arith.constant 0 : index
    %3 = vector.load %arg10[%c0, %c0_1] : memref<16x256xbf16, #tpu.memory_space<vmem>>, vector<16x256xbf16>
    %c0_2 = arith.constant 0 : index
    %c0_3 = arith.constant 0 : index
    %4 = vector.load %arg5[%c0_2, %c0_3] : memref<256x512xbf16, #tpu.memory_space<vmem>>, vector<256x512xbf16>
    %cst = arith.constant dense<0.000000e+00> : vector<16x512xf32>
    %5 = tpu.matmul %3, %4, %cst {dimension_numbers = #tpu.dot_dimension_numbers<[1], [0], [0], [1], [0, 0, 1, 1], [], []>} : vector<16x256xbf16>, vector<256x512xbf16>, vector<16x512xf32> -> vector<16x512xf32>
    %c512_i32 = arith.constant 512 : i32
    %6 = arith.muli %arg1, %c512_i32 : i32
    %7 = tpu.iota {dimensions = array<i32: 1>} : vector<16x512xi32>
    %8 = vector.broadcast %6 : i32 to vector<16x512xi32>
    %9 = arith.addi %8, %7 : vector<16x512xi32>
    %c256_i32 = arith.constant 256 : i32
    %10 = vector.broadcast %c256_i32 : i32 to vector<16x512xi32>
    %11 = arith.cmpi slt, %9, %10 : vector<16x512xi32>
    %cst_4 = arith.constant -1.000000e+30 : f32
    %12 = vector.broadcast %cst_4 : f32 to vector<16x512xf32>
    %13 = arith.select %11, %5, %12 : vector<16x512xi1>, vector<16x512xf32>
    %14 = arith.truncf %13 : vector<16x512xf32> to vector<16x512xbf16>
    %c0_5 = arith.constant 0 : index
    %c0_6 = arith.constant 0 : index
    %15 = vector.load %arg8[%c0_5, %c0_6] : memref<16x512xbf16, #tpu.memory_space<vmem>>, vector<16x512xbf16>
    tpu.vector_store %arg8[%c0_5, %c0_6], %14 {strides = array<i32>} : memref<16x512xbf16, #tpu.memory_space<vmem>>, vector<16x512xbf16>,
    %c0_7 = arith.constant 0 : index
    %c0_8 = arith.constant 0 : index
    %16 = vector.load %arg11[%c0_7, %c0_8] : memref<16x1xf32, #tpu.memory_space<vmem>>, vector<16x1xf32>
    %cst_9 = arith.constant dense<0xFF800000> : vector<16xf32>
    %17 = vector.multi_reduction <maximumf>, %13, %cst_9 [1] : vector<16x512xf32> to vector<16xf32>
    %18 = vector.shape_cast %17 : vector<16xf32> to vector<16x1xf32>
    %19 = arith.maximumf %16, %18 : vector<16x1xf32>
    %c0_10 = arith.constant 0 : index
    %c0_11 = arith.constant 0 : index
    %20 = vector.load %arg12[%c0_10, %c0_11] : memref<16x1xf32, #tpu.memory_space<vmem>>, vector<16x1xf32>
    %21 = arith.subf %16, %19 : vector<16x1xf32>
    %22 = math.exp %21 : vector<16x1xf32>
    %23 = arith.mulf %20, %22 : vector<16x1xf32>
    %24 = vector.broadcast %19 : vector<16x1xf32> to vector<16x512xf32>
    %25 = arith.subf %13, %24 : vector<16x512xf32>
    %26 = math.exp %25 : vector<16x512xf32>
    %cst_12 = arith.constant dense<0.000000e+00> : vector<16xf32>
    %27 = vector.multi_reduction <add>, %26, %cst_12 [1] : vector<16x512xf32> to vector<16xf32>
    %28 = vector.shape_cast %27 : vector<16xf32> to vector<16x1xf32>
    %29 = arith.addf %23, %28 : vector<16x1xf32>
    %c0_13 = arith.constant 0 : index
    %c0_14 = arith.constant 0 : index
    %30 = vector.load %arg12[%c0_13, %c0_14] : memref<16x1xf32, #tpu.memory_space<vmem>>, vector<16x1xf32>
    tpu.vector_store %arg12[%c0_13, %c0_14], %29 {strides = array<i32>} : memref<16x1xf32, #tpu.memory_space<vmem>>, vector<16x1xf32>,
    %c0_15 = arith.constant 0 : index
    %c0_16 = arith.constant 0 : index
    %31 = vector.load %arg11[%c0_15, %c0_16] : memref<16x1xf32, #tpu.memory_space<vmem>>, vector<16x1xf32>
    tpu.vector_store %arg11[%c0_15, %c0_16], %19 {strides = array<i32>} : memref<16x1xf32, #tpu.memory_space<vmem>>, vector<16x1xf32>,
    %c0_17 = arith.constant 0 : index
    %c0_18 = arith.constant 0 : index
    %32 = vector.load %arg6[%c0_17, %c0_18] : memref<16x1xi32, #tpu.memory_space<vmem>>, vector<16x1xi32>
    %33 = vector.broadcast %32 : vector<16x1xi32> to vector<16x512xi32>
    %34 = arith.cmpi eq, %9, %33 : vector<16x512xi32>
    %c0_19 = arith.constant 0 : index
    %c0_20 = arith.constant 0 : index
    %35 = vector.load %arg13[%c0_19, %c0_20] : memref<16x1xf32, #tpu.memory_space<vmem>>, vector<16x1xf32>
    %cst_21 = arith.constant 0.000000e+00 : f32
    %36 = vector.broadcast %cst_21 : f32 to vector<16x512xf32>
    %37 = arith.select %34, %13, %36 : vector<16x512xi1>, vector<16x512xf32>
    %cst_22 = arith.constant dense<0.000000e+00> : vector<16xf32>
    %38 = vector.multi_reduction <add>, %37, %cst_22 [1] : vector<16x512xf32> to vector<16xf32>
    %39 = vector.shape_cast %38 : vector<16xf32> to vector<16x1xf32>
    %40 = arith.addf %35, %39 : vector<16x1xf32>
    %c0_23 = arith.constant 0 : index
    %c0_24 = arith.constant 0 : index
    %41 = vector.load %arg13[%c0_23, %c0_24] : memref<16x1xf32, #tpu.memory_space<vmem>>, vector<16x1xf32>
    tpu.vector_store %arg13[%c0_23, %c0_24], %40 {strides = array<i32>} : memref<16x1xf32, #tpu.memory_space<vmem>>, vector<16x1xf32>,
    %c0_i32_25 = arith.constant 0 : i32
    %42 = arith.cmpi eq, %arg1, %c0_i32_25 : i32
    %43 = arith.extui %42 : i1 to i32
    %c0_i32_26 = arith.constant 0 : i32
    %44 = arith.cmpi ne, %43, %c0_i32_26 : i32
    scf.if %44 {
      %c0_27 = arith.constant 0 : index
      %c0_28 = arith.constant 0 : index
      %45 = vector.load %arg11[%c0_27, %c0_28] : memref<16x1xf32, #tpu.memory_space<vmem>>, vector<16x1xf32>
      %c0_29 = arith.constant 0 : index
      %c0_30 = arith.constant 0 : index
      %46 = vector.load %arg12[%c0_29, %c0_30] : memref<16x1xf32, #tpu.memory_space<vmem>>, vector<16x1xf32>
      %47 = math.log %46 : vector<16x1xf32>
      %48 = arith.addf %45, %47 : vector<16x1xf32>
      %c0_31 = arith.constant 0 : index
      %c0_32 = arith.constant 0 : index
      %49 = vector.load %arg13[%c0_31, %c0_32] : memref<16x1xf32, #tpu.memory_space<vmem>>, vector<16x1xf32>
      %50 = arith.subf %48, %49 : vector<16x1xf32>
      %c0_33 = arith.constant 0 : index
      %c0_34 = arith.constant 0 : index
      %51 = vector.load %arg7[%c0_33, %c0_34] : memref<16x1xf32, #tpu.memory_space<vmem>>, vector<16x1xf32>
      %52 = arith.mulf %50, %51 : vector<16x1xf32>
      %c0_35 = arith.constant 0 : index
      %c0_36 = arith.constant 0 : index
      %53 = vector.load %arg9[%c0_35, %c0_36] : memref<16x1xf32, #tpu.memory_space<vmem>>, vector<16x1xf32>
      tpu.vector_store %arg9[%c0_35, %c0_36], %52 {strides = array<i32>} : memref<16x1xf32, #tpu.memory_space<vmem>>, vector<16x1xf32>,
    } else {
    }
    return
  }
  func.func @transform_0(%arg0: i32, %arg1: i32) -> (i32, i32) {
    %c0_i32 = arith.constant 0 : i32
    %c0_i32_0 = arith.constant 0 : i32
    return %arg0, %c0_i32 : i32, i32
  }
  func.func @transform_1(%arg0: i32, %arg1: i32) -> (i32, i32) {
    %c0_i32 = arith.constant 0 : i32
    %c0_i32_0 = arith.constant 0 : i32
    %c0_i32_1 = arith.constant 0 : i32
    return %c0_i32, %c0_i32_0 : i32, i32
  }
  func.func @transform_2(%arg0: i32, %arg1: i32) -> (i32, i32) {
    %c0_i32 = arith.constant 0 : i32
    %c0_i32_0 = arith.constant 0 : i32
    %c0_i32_1 = arith.constant 0 : i32
    return %c0_i32, %c0_i32_0 : i32, i32
  }
  func.func @transform_3(%arg0: i32, %arg1: i32) -> (i32, i32) {
    %c0_i32 = arith.constant 0 : i32
    %c0_i32_0 = arith.constant 0 : i32
    return %c0_i32, %arg1 : i32, i32
  }
  func.func @transform_4(%arg0: i32, %arg1: i32) -> (i32, i32) {
    %c0_i32 = arith.constant 0 : i32
    %c0_i32_0 = arith.constant 0 : i32
    return %arg0, %c0_i32 : i32, i32
  }
  func.func @transform_5(%arg0: i32, %arg1: i32) -> (i32, i32) {
    %c0_i32 = arith.constant 0 : i32
    %c0_i32_0 = arith.constant 0 : i32
    return %arg0, %c0_i32 : i32, i32
  }
  func.func @transform_6(%arg0: i32, %arg1: i32) -> (i32, i32) {
    %c0_i32 = arith.constant 0 : i32
    return %arg0, %arg1 : i32, i32
  }
  func.func @transform_7(%arg0: i32, %arg1: i32) -> (i32, i32) {
    %c0_i32 = arith.constant 0 : i32
    %c0_i32_0 = arith.constant 0 : i32
    return %arg0, %c0_i32 : i32, i32
  }
}

</mosaic_0001>

<bundles_post_ra>
// kernel: lora_gpt_neo_forward.12
= control target key start
LH: loop header
LB: loop body
LE: loop exit
PB: predicated region body
PF: predicated region fallthrough
CT: control target
= control target key end

     0   :  { %s1802_s0 = inlined_call_operand.hbm [shape: bf16[2,8,768], index: 0, kind: input, shape index: {}, may-alias: {0,1,2}]   ;;  %s1803_s1 = inlined_call_operand.hbm [shape: bf16[2,8,768], index: 1, kind: input, shape index: {}, may-alias: {0,1,2}]   ;;  %s1804_s2 = inlined_call_operand.hbm [shape: bf16[2,8,768], index: 2, kind: input, shape index: {}, may-alias: {0,1,2}]   ;;  %s1805_s3 = inlined_call_operand.hbm [shape: f32[2,1,8], index: 3, kind: input, shape index: {}]   ;;  %s1806_s4 = inlined_call_operand.hbm [shape: bf16[2,8,256], index: 4, kind: output, shape index: {}]  }
   0x1   :  { %1827 = sst [smem:[#allocation32_spill]] %s1802_s0 }
   0x2   :  { %1828 = sst [smem:[#allocation33_spill]] %s1803_s1 }
   0x3   :  { %1829 = sst [smem:[#allocation34_spill]] %s1804_s2 }
   0x4   :  { %1830 = sst [smem:[#allocation35_spill]] %s1805_s3 }
   0x5   :  { %1831 = sst [smem:[#allocation36_spill]] %s1806_s4 }
   0x6   :  { %9 = vsyncpa [#allocation6], 0 }
   0x7   :  { %11 = vsyncpa [#allocation6 + $0x1], 0 }
   0x8   :  { %12 = vsyncpa [#allocation9], 0 }
   0x9   :  { %14 = vsyncpa [#allocation9 + $0x1], 0 }
   0xa   :  { %15 = vsyncpa [#allocation12], 0 }
   0xb   :  { %17 = vsyncpa [#allocation12 + $0x1], 0 }
   0xc   :  { %18 = vsyncpa [#allocation7], 0 }
   0xd   :  { %20 = vsyncpa [#allocation7 + $0x1], 0  ;;  %s1301_s15 = smov 0   ;;  %s1303_s16 = smov 0  }
   0xe   :  { %s1305_s17 = smov 0   ;;  %s1307_s18 = smov 0  }
   0xf   :  { %s1309_s19 = smov 0   ;;  %s1311_s20 = smov 0  }
  0x10   :  { %s1313_s21 = smov 0   ;;  %s1315_s22 = smov 0  }
  0x11   :  { %s1317_s23 = smov 0   ;;  %s1319_s24 = smov 0  }
  0x12   :  { %s1321_s25 = smov 0   ;;  %s1323_s26 = smov 0  }
  0x13   :  { %s1325_s27 = smov 0   ;;  %s1327_s28 = smov 0  }
  0x14   :  { %s1329_s29 = smov 0   ;;  %s1331_s30 = smov 0  }
  0x15   :  { %s1333_s5 = smov 0  }
  0x16 LB: > { %1832 = sst [smem:[#allocation19_spill]] %s1201_s15  ;;  %s1387_s6 = sadd.s32 4294967295, %s1265_s5   ;;  %s1265_s5 = sphi %s1333_s5, %s26_s5   ;;  %s1261_s30 = sphi %s1331_s30, %s1909_s30   ;;  %s1257_s29 = sphi %s1329_s29, %s1897_s29   ;;  %s1253_s28 = sphi %s1327_s28, %s1908_s28   ;;  %s1249_s27 = sphi %s1325_s27, %s1896_s27   ;;  %s1245_s26 = sphi %s1323_s26, %s1895_s26   ;;  %s1241_s25 = sphi %s1321_s25, %s1907_s25   ;;  %s1237_s24 = sphi %s1319_s24, %s1906_s24   ;;  %s1233_s23 = sphi %s1317_s23, %s1905_s23   ;;  %s1229_s22 = sphi %s1315_s22, %s1904_s22   ;;  %s1225_s21 = sphi %s1313_s21, %s1903_s21   ;;  %s1221_s20 = sphi %s1311_s20, %s1902_s20   ;;  %s1217_s19 = sphi %s1309_s19, %s1901_s19   ;;  %s1213_s18 = sphi %s1307_s18, %s1900_s18   ;;  %s1209_s17 = sphi %s1305_s17, %s1899_s17   ;;  %s1205_s16 = sphi %s1303_s16, %s1891_s16   ;;  %s1201_s15 = sphi %s1301_s15, %s1890_s15  }
  0x17   : > { %1833 = sst [smem:[#allocation20_spill]] %s1205_s16  ;;  %s48_s7 = sadd.s32 1, %s1257_s29 }
  0x18   : > { %1834 = sst [smem:[#allocation21_spill]] %s1209_s17  ;;  %p50_p0 = scmp.ge.s32.totalorder %s48_s7, 2 }
  0x19   : > { %1835 = sst [smem:[#allocation22_spill]] %s1229_s22  ;;  %s52_s8 = sadd.s32 1, %s1261_s30 }
  0x1a   : > { %1836 = sst [smem:[#allocation23_spill]] %s1245_s26  ;;  %p1818_p1 = scmp.eq.s32.totalorder %s1265_s5, 0 }
  0x1b   : > { %1837 = sst [smem:[#allocation24_spill]] %s1249_s27  ;;  %p1817_p2 = scmp.eq.s32.totalorder %s1387_s6, 0 }
  0x1c   : > { %1838 = sst [smem:[#allocation25_spill]] %s1253_s28  ;;  %s1911_s7 = smov (%p50_p0, %s48_s7), 0 }
  0x1d   : > { %1839 = sst [smem:[#allocation26_spill]] %s1257_s29  ;;  %s1913_s8 = smov (!%p50_p0, %s52_s8), %s1261_s30 }
  0x1e   : > { %1840 = sst [smem:[#allocation27_spill]] %s1911_s7  ;;  %s86_s9 = sadd.s32 2, %s1257_s29 }
  0x1f   : > { %s87_s10 = sadd.s32 2, %s1911_s7  ;;  %p54_p3 = scmp.ge.s32.totalorder %s1913_s8, 2 }
  0x20   : > { %s91_s11 = ssub.s32 %s86_s9, %s87_s10  ;;  %s95_s12 = sadd.s32 1, %s1233_s23 }
  0x21   : > { %p102_p4 = scmp.ne.s32.totalorder %s1233_s23, %s1229_s22  ;;  %s1915_s8 = smov (%p54_p3, %s1913_s8), 0 }
  0x22   : > { %1841 = sst [smem:[#allocation28_spill]] %s1915_s8  ;;  %p108_p6 = scmp.ne.s32.totalorder %s1229_s22, %s1225_s21 }
  0x23   : > { %p1405_p5 = por %p102_p4, %p1818_p1  ;;  %s1413_s14 = ssub.s32 %s1261_s30, %s1915_s8 }
  0x24   : > { %s118_s4 = sadd.s32 4, %s1257_s29  ;;  %s92_s27 = sor.u32 %s91_s11, %s1413_s14 }
  0x25   : > { %p1419_p7 = por %p108_p6, %p1817_p2  ;;  %p93_p8 = scmp.eq.s32.totalorder %s92_s27, 0 }
  0x26   : > { %s119_s10 = sadd.s32 4, %s1911_s7  ;;  %p1816_p9 = scmp.lt.s32.totalorder %s1265_s5, 4 }
  0x27   : > { %s1843_s9 = scalar_select %p1419_p7, 1, 0 }
  0x28   : > { %s1424_s28 = ssub.s32 %s118_s4, %s119_s10  ;;  %s783_s21 = smul.u32 6, %s1261_s30 }
  0x29   : > { %1844 = sst [smem:[#allocation29_spill]] %s1843_s9  ;;  %s244_s8 = sand.u32 1, %s1265_s5  }
  0x2a   : > { %s1427_s3 = scalar_select %p93_p8, %s1233_s23, %s95_s12  }
  0x2b   : > { %s246_s22 = sand.u32 1, %s1233_s23   ;;  %s233_s11 = sadd.s32 %s1257_s29, %s783_s21 }
  0x2c   : > { %1845 = sst [smem:[#allocation30_spill]] %s1427_s3  ;;  %s1434_s15 = sshll.u32 %s233_s11, 6 }
  0x2d   : > { %s751_s16 = sshll.u32 %s246_s22, 2  ;;  %s1846_s1 = sld [smem:[#allocation33_spill]] }
  0x2e   : > { %s248_s4 = scalar_lea.vmem [#allocation8], %s751_s16  ;;  %p1448_p10 = pnand %p1816_p9, %p1405_p5 }
  0x2f   : > { %s260_s12 = sshll.u32 %s248_s4, 4  ;;  %s1454_s22 = scalar_lea.sflag [#allocation9], %s244_s8  ;;  %s1442_s12 = int_to_ptr.vmem [resolvable:$true] %s260_s12 }
  0x30   : > { %p963_p0 = pneg %p1448_p10 }
  0x33   : > { %s623_s17 = scalar_lea.hbm %s1846_s1, %s1434_s15  ;;  %s966_s21 = scalar_lea.hbm %s1846_s1, 768 }
  0x34   : > { %s1440_s2 = scalar_lea.hbm %s623_s17, 128  ;;  %s991_s9 = scalar_lea.hbm %s623_s17, 192 }
  0x35   : > { %p962_p13 = scmp.ne.s32.totalorder %s1440_s2, %s991_s9  ;;  %p967_p5 = scmp.lt.u32.totalorder %s1440_s2, %s1846_s1 }
  0x36   : > { %p968_p6 = scmp.lt.u32.totalorder %s966_s21, %s991_s9  ;;  %p970_p9 = scmp.lt.u32.totalorder %s991_s9, %s1440_s2 }
  0x37   : > { %p964_p3 = pnand %p963_p0, %p962_p13 }
  0x38   : > { %p969_p8 = por %p968_p6, %p967_p5 }
  0x39   : > { %p965_p4 = pneg %p964_p3 }
  0x3a   : > { %p971_p2 = por %p970_p9, %p969_p8 }
  0x3c   : > { %p972_p1 = pnand %p971_p2, %p965_p4 }
  0x3e   : > { %975 = shalt.err (!%p972_p1)
}
  0x3f   : > { %s976_s17 = scalar_lea.vmem %s1442_s12, 64  ;;  %s1267_s8 = smov [#allocation8]  }
  0x40   : > { %p977_p13 = scmp.ne.s32.totalorder %s1442_s12, %s976_s17  ;;  %s981_s4 = sshll.u32 %s1267_s8, 4  ;;  %s982_s4 = int_to_ptr.vmem [resolvable:$false] %s981_s4 }
  0x41   : > { %s983_s16 = scalar_lea.vmem %s982_s4, 128  ;;  %p984_p12 = scmp.lt.s32.totalorder %s1442_s12, %s982_s4 }
  0x42   : > { %p979_p3 = pnand %p977_p13, %p963_p0  ;;  %p985_p5 = scmp.lt.s32.totalorder %s983_s16, %s976_s17 }
  0x44   : > { %p980_p11 = pneg %p979_p3  ;;  %p986_p6 = por %p985_p5, %p984_p12 }
  0x46   : > { %p987_p9 = pnand %p986_p6, %p980_p11 }
  0x48   : > { %990 = shalt.err (!%p987_p9)
}
  0x49   : > { %800 = dma.hbm_to_vmem [thread:$0]  (!%p1448_p10), %s1440_s2, 64, %s1442_s12, %s1454_s22  }
  0x4a   : > { %p1848_p1 = scmp.lt.s32.totalorder %s1265_s5, 5  ;;  %p1849_p2 = scmp.ge.s32.totalorder %s1265_s5, 1 }
  0x4b   : > { %s746_s9 = sadd.s32 4294967294, %s1265_s5   ;;  %s59_s13 = ssub.s32 %s1257_s29, %s1911_s7 }
  0x4c   : > { %p1485_p11 = pnand %p1849_p2, %p1848_p1  ;;  %s60_s21 = sor.u32 %s59_s13, %s1413_s14 }
  0x4d   : > { %s63_s11 = sadd.s32 1, %s1245_s26  ;;  %p61_p12 = scmp.eq.s32.totalorder %s60_s21, 0 }
  0x4e   : > { %s1850_s10 = scalar_select %p1485_p11, 1, 0 }
  0x4f   : > { %p70_p0 = scmp.ne.s32.totalorder %s1245_s26, %s1241_s25  ;;  %p76_p4 = scmp.ne.s32.totalorder %s1241_s25, %s1237_s24 }
  0x50   : > { %p196_p8 = scmp.eq.s32.totalorder %s1387_s6, 3  ;;  %p1852_p13 = scmp.eq.s32.totalorder %s1265_s5, 0 }
  0x51   : > { %s1500_s27 = scalar_select %p61_p12, %s1245_s26, %s63_s11  }
  0x52   : > { %p72_p10 = por %p1852_p13, %p70_p0  ;;  %p1853_p3 = scmp.eq.s32.totalorder %s1387_s6, 0 }
  0x53   : > { %1851 = sst [smem:[#allocation31_spill]] %s1500_s27  ;;  %p1510_p6 = por %p196_p8, %p70_p0 }
  0x54   : > { %p1506_p5 = por %p1853_p3, %p76_p4  ;;  %p202_p9 = scmp.eq.s32.totalorder %s746_s9, 3 }
  0x55   : > { %s1855_s12 = scalar_select %p1510_p6, 1, 0 }
  0x56   : > { %s1854_s2 = scalar_select %p1506_p5, 1, 0 }
  0x57   : > { %s222_s17 = sand.u32 1, %s1245_s26   ;;  %s1856_s0 = sld [smem:[#allocation32_spill]] }
  0x58   : > { %p1521_p1 = por %p202_p9, %p76_p4  ;;  %s749_s21 = sshll.u32 %s222_s17, 2 }
  0x59   : > { %p1858_p2 = scmp.lt.s32.totalorder %s1265_s5, 4  ;;  %s226_s9 = scalar_lea.vmem [#allocation5], %s749_s21 }
  0x5a   : > { %s1857_s13 = scalar_select %p1521_p1, 1, 0 }
  0x5b   : > { %p1527_p12 = pnand %p1858_p2, %p72_p10  ;;  %s237_s8 = sshll.u32 %s226_s9, 4  ;;  %s1531_s8 = int_to_ptr.vmem [resolvable:$true] %s237_s8 }
  0x5c   : > { %s223_s4 = scalar_lea.sflag [#allocation6], %s222_s17 }
  0x5d   : > { %s1519_s16 = scalar_lea.hbm %s1856_s0, %s1434_s15  ;;  %p994_p4 = pneg %p1527_p12 }
  0x5e   : > { %s992_s1 = scalar_lea.hbm %s1519_s16, 64  ;;  %s997_s27 = scalar_lea.hbm %s1856_s0, 768 }
  0x5f   : > { %p993_p0 = scmp.ne.s32.totalorder %s1519_s16, %s992_s1  ;;  %p998_p10 = scmp.lt.u32.totalorder %s1519_s16, %s1856_s0 }
  0x60   : > { %p999_p3 = scmp.lt.u32.totalorder %s997_s27, %s992_s1  ;;  %p1001_p2 = scmp.lt.u32.totalorder %s992_s1, %s1519_s16 }
  0x61   : > { %p995_p8 = pnand %p994_p4, %p993_p0 }
  0x62   : > { %p1000_p9 = por %p999_p3, %p998_p10 }
  0x63   : > { %p996_p13 = pneg %p995_p8 }
  0x64   : > { %p1002_p1 = por %p1001_p2, %p1000_p9 }
  0x66   : > { %p1003_p6 = pnand %p1002_p1, %p996_p13 }
  0x68   : > { %1006 = shalt.err (!%p1003_p6)
}
  0x69   : > { %s1007_s17 = scalar_lea.vmem %s1531_s8, 64  ;;  %s1268_s29 = smov [#allocation5]  }
  0x6a   : > { %p1008_p0 = scmp.ne.s32.totalorder %s1531_s8, %s1007_s17  ;;  %s1012_s7 = sshll.u32 %s1268_s29, 4  ;;  %s1013_s7 = int_to_ptr.vmem [resolvable:$false] %s1012_s7 }
  0x6b   : > { %s1014_s3 = scalar_lea.vmem %s1013_s7, 128  ;;  %p1015_p5 = scmp.lt.s32.totalorder %s1531_s8, %s1013_s7 }
  0x6c   : > { %p1010_p8 = pnand %p1008_p0, %p994_p4  ;;  %p1016_p10 = scmp.lt.s32.totalorder %s1014_s3, %s1007_s17 }
  0x6e   : > { %p1011_p7 = pneg %p1010_p8  ;;  %p1017_p3 = por %p1016_p10, %p1015_p5 }
  0x70   : > { %p1018_p9 = pnand %p1017_p3, %p1011_p7 }
  0x72   : > { %1021 = shalt.err (!%p1018_p9)
}
  0x73   : > { %797 = dma.hbm_to_vmem [thread:$0]  (!%p1527_p12), %s1519_s16, 64, %s1531_s8, %s223_s4  }
  0x74   : > { %s124_s1 = sor.u32 %s1424_s28, %s1413_s14  ;;  %s127_s26 = sadd.s32 1, %s1221_s20 }
  0x75   : > { %p125_p7 = scmp.eq.s32.totalorder %s124_s1, 0  ;;  %p134_p5 = scmp.ne.s32.totalorder %s1221_s20, %s1217_s19 }
  0x76   : > { %p140_p6 = scmp.ne.s32.totalorder %s1217_s19, %s1213_s18  ;;  %s269_s27 = sand.u32 1, %s1221_s20  }
  0x77   : > { %s1567_s21 = scalar_select %p125_p7, %s1221_s20, %s127_s26  }
  0x78   : > { %p1860_p1 = scmp.eq.s32.totalorder %s1265_s5, 0  ;;  %p1861_p13 = scmp.eq.s32.totalorder %s1387_s6, 0 }
  0x79   : > { %s753_s9 = sshll.u32 %s269_s27, 2  ;;  %s1863_s7 = sld [smem:[#allocation34_spill]] }
  0x7a   : > { %p136_p4 = por %p134_p5, %p1860_p1  ;;  %p1573_p2 = por %p140_p6, %p1861_p13 }
  0x7b   : > { %s271_s18 = scalar_lea.vmem [#allocation10], %s753_s9  ;;  %p1864_p12 = scmp.lt.s32.totalorder %s1265_s5, 4 }
  0x7c   : > { %s1862_s11 = scalar_select %p1573_p2, 1, 0 }
  0x7d   : > { %s283_s8 = sshll.u32 %s271_s18, 4  ;;  %p1585_p0 = pnand %p1864_p12, %p136_p4  ;;  %s284_s8 = int_to_ptr.vmem [resolvable:$true] %s283_s8 }
  0x7f   : > { %s633_s16 = scalar_lea.hbm %s1863_s7, %s1434_s15  ;;  %p1024_p10 = pneg %p1585_p0 }
  0x80   : > { %s1581_s28 = scalar_lea.hbm %s633_s16, 256  ;;  %s1052_s3 = scalar_lea.hbm %s633_s16, 320 }
  0x81   : > { %p1023_p8 = scmp.ne.s32.totalorder %s1581_s28, %s1052_s3  ;;  %s1027_s26 = scalar_lea.hbm %s1863_s7, 768 }
  0x82   : > { %p1028_p7 = scmp.lt.u32.totalorder %s1581_s28, %s1863_s7  ;;  %p1029_p5 = scmp.lt.u32.totalorder %s1027_s26, %s1052_s3 }
  0x83   : > { %p1025_p3 = pnand %p1024_p10, %p1023_p8  ;;  %p1031_p1 = scmp.lt.u32.totalorder %s1052_s3, %s1581_s28 }
  0x84   : > { %p1030_p6 = por %p1029_p5, %p1028_p7 }
  0x85   : > { %p1026_p9 = pneg %p1025_p3 }
  0x86   : > { %p1032_p4 = por %p1031_p1, %p1030_p6 }
  0x88   : > { %p1033_p13 = pnand %p1032_p4, %p1026_p9 }
  0x8a   : > { %1036 = shalt.err (!%p1033_p13)
}
  0x8b   : > { %s1037_s17 = scalar_lea.vmem %s284_s8, 64  ;;  %s1269_s29 = smov [#allocation10]  }
  0x8c   : > { %p1038_p12 = scmp.ne.s32.totalorder %s284_s8, %s1037_s17  ;;  %s1042_s16 = sshll.u32 %s1269_s29, 4  ;;  %s1043_s16 = int_to_ptr.vmem [resolvable:$false] %s1042_s16 }
  0x8d   : > { %s1044_s18 = scalar_lea.vmem %s1043_s16, 128  ;;  %p1045_p2 = scmp.lt.s32.totalorder %s284_s8, %s1043_s16 }
  0x8e   : > { %p1040_p8 = pnand %p1038_p12, %p1024_p10  ;;  %p1046_p11 = scmp.lt.s32.totalorder %s1044_s18, %s1037_s17 }
  0x90   : > { %p1041_p3 = pneg %p1040_p8  ;;  %p1047_p5 = por %p1046_p11, %p1045_p2 }
  0x92   : > { %p1048_p7 = pnand %p1047_p5, %p1041_p3 }
  0x94   : > { %1051 = shalt.err (!%p1048_p7)
}
  0x95   : > { %s1866_s3 = sld [smem:[#allocation21_spill]]  ;;  %s1867_s15 = sld [smem:[#allocation20_spill]] }
  0x96   : > { %s1868_s1 = sld [smem:[#allocation19_spill]]  ;;  %p153_p11 = scmp.eq.s32.totalorder %s1413_s14, 0 }
  0x97   : > { %803 = dma.hbm_to_vmem [thread:$0]  (!%p1585_p0), %s1581_s28, 64, %s284_s8, %s1454_s22  }
  0x98   : > { %p1869_p9 = scmp.eq.s32.totalorder %s1265_s5, 0  ;;  %p1870_p1 = scmp.eq.s32.totalorder %s1387_s6, 0 }
  0x99   : > { %s755_s17 = sshll.u32 %s1261_s30, 4  ;;  %s1872_s18 = sld [smem:[#allocation35_spill]] }
  0x9a   : > { %p1874_p0 = scmp.lt.s32.totalorder %s1265_s5, 4 }
  0x9b   : > { %s155_s26 = sadd.s32 1, %s1866_s3  ;;  %p162_p2 = scmp.ne.s32.totalorder %s1866_s3, %s1867_s15 }
  0x9c   : > { %p168_p10 = scmp.ne.s32.totalorder %s1867_s15, %s1868_s1  ;;  %s290_s9 = sand.u32 1, %s1866_s3  }
  0x9d   : > { %s1617_s4 = scalar_select %p153_p11, %s1866_s3, %s155_s26  }
  0x9e   : > { %p164_p6 = por %p162_p2, %p1869_p9  ;;  %p1623_p4 = por %p168_p10, %p1870_p1 }
  0x9f   : > { %s1873_s0 = smov %s1872_s18  ;;  %s1632_s7 = scalar_lea.hbm %s1872_s18, %s755_s17 }
  0xa0   : > { %s293_s14 = scalar_lea.vmem [#allocation11], %s290_s9  ;;  %p1638_p13 = pnand %p1874_p0, %p164_p6 }
  0xa1   : > { %s301_s22 = sshll.u32 %s293_s14, 4  ;;  %s291_s8 = scalar_lea.sflag [#allocation12], %s290_s9  ;;  %s1634_s22 = int_to_ptr.vmem [resolvable:$true] %s301_s22 }
  0xa2   : > { %s1053_s3 = scalar_lea.hbm %s1632_s7, 16  ;;  %p1055_p8 = pneg %p1638_p13 }
  0xa3   : > { %p1054_p12 = scmp.ne.s32.totalorder %s1632_s7, %s1053_s3  ;;  %s1058_s26 = scalar_lea.hbm %s1873_s0, 32 }
  0xa4   : > { %p1059_p7 = scmp.lt.u32.totalorder %s1632_s7, %s1873_s0  ;;  %p1060_p11 = scmp.lt.u32.totalorder %s1058_s26, %s1053_s3 }
  0xa5   : > { %p1056_p3 = pnand %p1055_p8, %p1054_p12  ;;  %p1062_p10 = scmp.lt.u32.totalorder %s1053_s3, %s1632_s7 }
  0xa6   : > { %p1061_p2 = por %p1060_p11, %p1059_p7 }
  0xa7   : > { %p1057_p5 = pneg %p1056_p3 }
  0xa8   : > { %p1063_p9 = por %p1062_p10, %p1061_p2 }
  0xaa   : > { %p1064_p6 = pnand %p1063_p9, %p1057_p5 }
  0xac   : > { %1067 = shalt.err (!%p1064_p6)
}
  0xad   : > { %s1068_s9 = scalar_lea.vmem %s1634_s22, 16  ;;  %s1270_s16 = smov [#allocation11]  }
  0xae   : > { %p1069_p1 = scmp.ne.s32.totalorder %s1634_s22, %s1068_s9  ;;  %s1073_s18 = sshll.u32 %s1270_s16, 4  ;;  %s1074_s18 = int_to_ptr.vmem [resolvable:$false] %s1073_s18 }
  0xaf   : > { %s1075_s14 = scalar_lea.vmem %s1074_s18, 32  ;;  %p1076_p3 = scmp.lt.s32.totalorder %s1634_s22, %s1074_s18 }
  0xb0   : > { %p1071_p0 = pnand %p1069_p1, %p1055_p8  ;;  %p1077_p7 = scmp.lt.s32.totalorder %s1075_s14, %s1068_s9 }
  0xb2   : > { %p1072_p12 = pneg %p1071_p0  ;;  %p1078_p11 = por %p1077_p7, %p1076_p3 }
  0xb4   : > { %p1079_p2 = pnand %p1078_p11, %p1072_p12 }
  0xb6   : > { %1082 = shalt.err (!%p1079_p2)
}
  0xb7   : > { %806 = dma.hbm_to_vmem [thread:$0]  (!%p1638_p13), %s1632_s7, 16, %s1634_s22, %s291_s8  }
  0xb8   : > { %p1876_p5 = scmp.ne.s32.totalorder %s1850_s10, 0 }
  0xb9   : > { %s1670_s3 = sand.u32 (!%p1876_p5), 1, %s1241_s25   ;;  %p1877_p8 = scmp.ne.s32.totalorder (!%p1876_p5), %s1854_s2, 0 }
  0xba   : > { %310 = sbr.rel (%p1876_p5) target bundleno = 1038 (0x40e), region = 36  ;;  %s757_s15 = sshll.u32 (!%p1876_p5), %s1670_s3, 2 }
  0xbb   : > { %s313_s1 = scalar_lea.sflag (!%p1876_p5), [#allocation6], %s1670_s3  ;;  %s316_s26 = scalar_lea.vmem (!%p1876_p5), [#allocation5], %s757_s15 }
  0xc1   : > { %1180 = dma.done.wait (%p1877_p8), %s313_s1, 64  }
  0xc2   : > { %1182 = vsyncadd (%p1877_p8), %s313_s1, 4294967232  ;;  %s1878_s7 = sld [smem:[#allocation22_spill]]  ;;  %s1879_s10 = sld [smem:[#allocation29_spill]] }
  0xc3   : > { %s321_s22 = sand.u32 1, %s1387_s6  }
  0xc4   : > { %s322_s17 = scalar_lea.sflag [#allocation9], %s321_s22 }
  0xc8   : > { %s323_s28 = sand.u32 1, %s1878_s7   ;;  %p1880_p13 = scmp.ne.s32.totalorder %s1879_s10, 0 }
  0xc9   : > { %s758_s8 = sshll.u32 %s323_s28, 2 }
  0xca   : > { %s325_s29 = scalar_lea.vmem [#allocation8], %s758_s8 }
  0xcb   : > { %1184 = dma.done.wait (%p1880_p13), %s322_s17, 64  }
  0xcc   : > { %1186 = vsyncadd (%p1880_p13), %s322_s17, 4294967232  ;;  %s332_s9 = sand.u32 1, %s1217_s19   ;;  %p1881_p10 = scmp.ne.s32.totalorder %s1862_s11, 0 }
  0xcd   : > { %s1687_s16 = sshll.u32 %s332_s9, 2 }
  0xce   : > { %s334_s2 = scalar_lea.vmem [#allocation10], %s1687_s16 }
  0xcf   : > { %1188 = dma.done.wait (%p1881_p10), %s322_s17, 64  }
  0xd0   : > { %1190 = vsyncadd (%p1881_p10), %s322_s17, 4294967232  ;;  %s1882_s6 = sld [smem:[#allocation20_spill]] }
  0xd6   : > { %s339_s18 = sand.u32 1, %s1882_s6  }
  0xd7   : > { %s340_s14 = scalar_lea.sflag [#allocation12], %s339_s18  ;;  %s342_s1 = scalar_lea.vmem [#allocation11], %s339_s18 }
  0xd8   : > { %1192 = dma.done.wait (%p1623_p4), %s340_s14, 16  }
  0xd9   : > { %1194 = vsyncadd (%p1623_p4), %s340_s14, 4294967280  ;;  %vm388_vm0 = vcmask 7168   ;;  %v1271_v0 = vmov 0.0   ;;  %vm1272_vm1 = vmmov 0   ;;  %v400_v1 = vld [vmem:[%s325_s29] sm:$0xf]  ;;  %v442_v5 = vlaneseq }
  0xda   : > { %390 = vst.msk [vmem:[#allocation3] sm:$0xff] %vm388_vm0, %v1271_v0  ;;  %771 = vmatprep.subr.bf16.mxu0 %v1271_v0  ;;  %773 = vmatprep.mubr.msk.bf16.mxu0 %vm1272_vm1, %v1271_v0  ;;  %v399_v2 = vld [vmem:[%s316_s26] sm:$0xf]  ;;  %v1273_v3 = vmov 0   ;;  %v1274_v4 = vmov -1e+30  }
  0xdb   : > { %777 = vmatprep.subr.bf16.mxu1 %v1271_v0  ;;  %779 = vmatprep.mubr.msk.bf16.mxu1 %vm1272_vm1, %v1271_v0  ;;  %389 = vst.msk [vmem:[#allocation2] sm:$0xff] %vm388_vm0, %v1274_v4  ;;  %v450_v6 = vld [vmem:[%s342_s1] sm:$0x1]  ;;  %v443_v7 = vshrl.u32 %v442_v5, 7  ;;  %v447_v10 = vand.u32 127, %v442_v5  ;;  %vm462_vm6 = vcmask 64512  }
  0xdc   : > { %772 = vmatpush3.bf16.xpose.msra.mxu0 %v400_v1  ;;  %953 = vset.pattern.permute.xlu0 %v1273_v3  ;;  %vm451_vm2 = vcmp.gt.f32.partialorder %v450_v6, 0.5  ;;  %v401_v22 = vld [vmem:[%s334_s2] sm:$0xf]  ;;  %vm497_vm7 = vcmask 1043456   ;;  %s1883_s11 = sld [smem:[#allocation25_spill]]  ;;  %s1884_s27 = sld [smem:[#allocation24_spill]] }
  0xdd   : > { %954 = vset.pattern.permute.xlu1 %v1273_v3  ;;  %v456_v8 = vsub.s32 0, %v443_v7  ;;  %v453_v9 = vsel %vm451_vm2, 1, %v1273_v3  ;;  %vm452_vm3 = vcmp.le.s32.totalorder %v447_v10, %v443_v7  ;;  %v499_v23 = vsel %vm497_vm7, %v401_v22, 0  ;;  %s380_s22 = scalar_lea.vmem [#allocation13], %s757_s15  ;;  %s1885_s29 = sld [smem:[#allocation36_spill]] }
  0xde   : > { %778 = vmatpush3.bf16.msra.mxu1 %v499_v23  ;;  %s576_s28 = sshll.u32 %s380_s22, 4  ;;  %s559_s2 = scalar_lea.sflag [#allocation7], %s1670_s3  ;;  %s1717_s28 = int_to_ptr.vmem [resolvable:$true] %s576_s28 }
  0xdf   : > { %v457_v11 = vrot.slane %v453_v9, %v456_v8  ;;  %s1083_s6 = scalar_lea.vmem %s1717_s28, 64  ;;  %p1887_p9 = scmp.ne.s32.totalorder %s1855_s12, 0 }
  0xe0   : > { %p1084_p4 = scmp.ne.s32.totalorder %s1717_s28, %s1083_s6  ;;  %s1275_s15 = smov [#allocation13]  }
  0xe1   : > { %vm458_vm4 = vcmp.eq.s32.totalorder %v457_v11, 1  ;;  %v478_v32 = vld [vmem:[#allocation3] sm:$0xff]  ;;  %s1087_s18 = sshll.u32 %s1275_s15, 4  ;;  %s1088_s18 = int_to_ptr.vmem [resolvable:$false] %s1087_s18 }
  0xe2   : > { %vm459_vm5 = vmand %vm452_vm3, %vm458_vm4  ;;  %v461_v18 = vld [vmem:[#allocation2] sm:$0xff]  ;;  %s763_s26 = sshll.u32 %s1883_s11, 1  ;;  %p1085_p6 = pnand %p1084_p4, %p1887_p9 }
  0xe3   : > { %774 = vmatmul.mubr.bf16.vlgmr.msra.gmra.mrb[0].mxu0 %v399_v2  ;;  %s572_s7 = sadd.s32 %s1884_s27, %s763_s26  ;;  %s1886_s9 = smov %s1885_s29 }
  0xe4   : > { %s764_s10 = sshll.u32 %s572_s7, 6  ;;  %p1086_p1 = pneg %p1085_p6 }
  0xe5   : > { %s1715_s16 = scalar_lea.hbm %s1885_s29, %s764_s10  ;;  %s1089_s14 = scalar_lea.vmem %s1088_s18, 128 }
  0xe6   : > { %p1090_p0 = scmp.lt.s32.totalorder %s1717_s28, %s1088_s18  ;;  %p1091_p12 = scmp.lt.s32.totalorder %s1089_s14, %s1083_s6 }
  0xe8   : > { %p1092_p3 = por %p1091_p12, %p1090_p0 }
  0xea   : > { %p1093_p7 = pnand %p1092_p3, %p1086_p1 }
 0x1b6   : > { %v436_v12 = vpop.f32.mrb[0].mxu0 }
 0x1b7   : > { %v460_v13 = vsel %vm459_vm5, %v436_v12, -1e+30  ;;  %v775_v14 = vpop.f32.mrb[1].mxu0 }
 0x1b8   : > { %v439_v15 = vpop.f32.mrb[2].mxu0  ;;  %v463_v16 = vsel %vm462_vm6, %v460_v13, -inf }
 0x1b9   : > { %464 = vmax.xlane.f32.xlu0 %v463_v16  ;;  %v776_v17 = vpop.f32.mrb[3].mxu0 }
 0x246   : > { %v465_v19 = vpop.xlane.xlu0 %464 }
 0x247   : > { %v466_v20 = vmax.f32 %v461_v18, %v465_v19 }
 0x249   : > { %v467_v21 = vsub.f32 %v461_v18, %v466_v20  ;;  %543 = vst.msk [vmem:[#allocation2] sm:$0xff] %vm388_vm0, %v466_v20  ;;  %472 = vperm.xlu0 %953, %v466_v20  }
 0x24b   : > { %v468_v30 = vmul.f32 1.442695, %v467_v21 }
 0x2c8   : > { %v473_v24 = vpop.permute.xlu0 %472 }
 0x2c9   : > { %v475_v25 = vsub.f32 %v460_v13, %v473_v24 }
 0x2cb   : > { %v476_v26 = vmul.f32 1.442695, %v475_v25 }
 0x2cd   : > { %955 = vpow2.f32 %v476_v26 }
 0x2ce   : > { %957 = vpow2.f32 %v468_v30 }
 0x2d7   : > { %v956_v27 = vpop.eup %955 }
 0x2d8   : > { %v480_v28 = vsel %vm462_vm6, %v956_v27, 0.0  ;;  %v493_v29 = vpack.c.bf16 %v956_v27, %v956_v27  ;;  %v958_v31 = vpop.eup %957 }
 0x2d9   : > { %481 = vadd.xlane.f32.xlu1 %v480_v28  ;;  %v479_v33 = vmul.f32 %v958_v31, %v478_v32 }
 0x2da   : > { %780 = vmatmul.mubr.msk.bf16.vlgmr.msra.gmra.mrb[0].mxu1 %vm462_vm6, %v493_v29 }
 0x366   : > { %v482_v34 = vpop.xlane.xlu1 %481 }
 0x367   : > { %v483_v35 = vadd.f32 %v482_v34, %v479_v33 }
 0x369   : > { %485 = vst.msk [vmem:[#allocation3] sm:$0xff] %vm388_vm0, %v483_v35 }
 0x370   : > { %v548_v36 = vld [vmem:[#allocation3] sm:$0xff] }
 0x371   : > { %551 = vperm.xlu1 %954, %v548_v36  }
 0x375   : > { %489 = vperm.xlu1 %954, %v958_v31  }
 0x3ad   : > { %v535_v37 = vpop.f32.mrb[0].mxu1 }
 0x3ae   : > { %v781_v38 = vpop.f32.mrb[1].mxu1 }
 0x3af   : > { %v538_v39 = vpop.f32.mrb[2].mxu1 }
 0x3b0   : > { %v782_v40 = vpop.f32.mrb[3].mxu1 }
 0x3f0   : > { %v552_v41 = vpop.permute.xlu1 %551 }
 0x3f1   : > { %959 = vrcp.f32 %v552_v41 }
 0x3f4   : > { %v490_v42 = vpop.permute.xlu1 %489 }
 0x3f5   : > { %v492_v43 = vmul.f32 0.0, %v490_v42 }
 0x3f7   : > { %v541_v44 = vadd.f32 %v535_v37, %v492_v43 }
 0x3fb   : > { %v960_v45 = vpop.eup %959 }
 0x3fc   : > { %v555_v46 = vmul.f32 %v960_v45, %v541_v44 }
 0x3fe   : > { %v556_v47 = vpack.c.bf16 %v555_v46, %v555_v46 }
 0x400   : > { %557 = vst [vmem:[%s380_s22] sm:$0xf] %v556_v47 }
 0x401   : > { %1096 = shalt.err (!%p1093_p7)
}
 0x402   : > { %s1097_s3 = scalar_lea.hbm %s1715_s16, 64  ;;  %s1101_s27 = scalar_lea.hbm %s1886_s9, 256 }
 0x403   : > { %p1098_p11 = scmp.ne.s32.totalorder %s1715_s16, %s1097_s3  ;;  %p1102_p8 = scmp.lt.u32.totalorder %s1715_s16, %s1886_s9 }
 0x404   : > { %p1103_p13 = scmp.lt.u32.totalorder %s1101_s27, %s1097_s3  ;;  %p1105_p4 = scmp.lt.u32.totalorder %s1097_s3, %s1715_s16 }
 0x405   : > { %p1099_p2 = pnand %p1098_p11, %p1887_p9 }
 0x406   : > { %p1104_p10 = por %p1103_p13, %p1102_p8 }
 0x407   : > { %p1100_p5 = pneg %p1099_p2 }
 0x408   : > { %p1106_p6 = por %p1105_p4, %p1104_p10 }
 0x40a   : > { %p1107_p1 = pnand %p1106_p6, %p1100_p5 }
 0x40c   : > { %1110 = shalt.err (!%p1107_p1)
}
 0x40d   : > { %792 = dma.vmem_to_hbm [thread:$0]  (%p1887_p9), %s1717_s28, 64, %s1715_s16, %s559_s2  }
 0x40e PF: > { %p812_p0 = scmp.ge.s32.totalorder %s1265_s5, 2  ;;  %s588_s10 = sand.u32 1, %s1237_s24  }
 0x40f   : > { %p1888_p12 = scmp.ne.s32.totalorder %s1857_s13, 0  ;;  %s589_s22 = scalar_lea.sflag [#allocation7], %s588_s10 }
 0x411   : > { %p808_p3 = pnand %p812_p0, %p1888_p12 }
 0x413   : > { %1196 = dma.done.wait (!%p808_p3), %s589_s22, 64  }
 0x414   : > { %1198 = vsyncadd (!%p808_p3), %s589_s22, 4294967232  ;;  %s26_s5 = sadd.s32 1, %s1265_s5   ;;  %s1890_s15 = sld [smem:[#allocation20_spill]] }
 0x415   : > { %p1746_p7 = scmp.ge.s32.totalorder %s26_s5, 6   ;;  %s1891_s16 = sld [smem:[#allocation21_spill]] }
 0x416   : > { %s1892_s12 = sld [smem:[#allocation22_spill]]  ;;  %s1893_s24 = sld [smem:[#allocation30_spill]] }
 0x417   : > { %s1894_s13 = sld [smem:[#allocation23_spill]]  ;;  %s1895_s26 = sld [smem:[#allocation31_spill]] }
 0x418   : > { %s1896_s27 = sld [smem:[#allocation26_spill]]  ;;  %s1897_s29 = sld [smem:[#allocation27_spill]] }
 0x419   : > { %s1898_s2 = sld [smem:[#allocation28_spill]]  ;;  %s1899_s17 = smov %s1617_s4 }
 0x41a   : > { %s1900_s18 = smov %s1217_s19  ;;  %s1901_s19 = smov %s1221_s20 }
 0x41b   : > { %s1902_s20 = smov %s1567_s21  ;;  %s1904_s22 = smov %s1233_s23 }
 0x41c   : > { %s1903_s21 = smov %s1892_s12  ;;  %s1905_s23 = smov %s1893_s24 }
 0x41d   : > { %s1906_s24 = smov %s1241_s25  ;;  %s1907_s25 = smov %s1894_s13 }
 0x41e   : > { %s1908_s28 = smov %s1261_s30  ;;  %25 = sbr.rel (!%p1746_p7) target bundleno = 22 (0x16), region = 130 }
 0x41f   : > { %s1909_s30 = smov %s1898_s2 }
 0x425   :  { %594 = vsyncpa [#allocation6], 1 }
 0x426   :  { %596 = vsyncpa [#allocation6 + $0x1], 1 }
 0x427   :  { %597 = vsyncpa [#allocation9], 1 }
 0x428   :  { %599 = vsyncpa [#allocation9 + $0x1], 1 }
 0x429   :  { %600 = vsyncpa [#allocation12], 1 }
 0x42a   :  { %602 = vsyncpa [#allocation12 + $0x1], 1 }
 0x42b   :  { %603 = vsyncpa [#allocation7], 1 }
 0x42c   :  { %605 = vsyncpa [#allocation7 + $0x1], 1 }

// kernel: lora_gpt_neo_forward.11
= control target key start
LH: loop header
LB: loop body
LE: loop exit
PB: predicated region body
PF: predicated region fallthrough
CT: control target
= control target key end

     0   :  { %s1688_s0 = inlined_call_operand.hbm [shape: f32[16,256], index: 0, kind: input, shape index: {}]   ;;  %s1689_s1 = inlined_call_operand.hbm [shape: f32[1,256], index: 1, kind: input, shape index: {}]   ;;  %s1690_s2 = inlined_call_operand.hbm [shape: f32[1,256], index: 2, kind: input, shape index: {}]   ;;  %s1691_s3 = inlined_call_operand.hbm [shape: bf16[256,768], index: 3, kind: input, shape index: {}]   ;;  %s1692_s4 = inlined_call_operand.hbm [shape: f32[1,768], index: 4, kind: input, shape index: {}]   ;;  %s1693_s5 = inlined_call_operand.hbm [shape: bf16[16,768], index: 5, kind: output, shape index: {}]  }
   0x1   :  { %1710 = sst [smem:[#allocation22_spill]] %s1689_s1 }
   0x2   :  { %1711 = sst [smem:[#allocation23_spill]] %s1691_s3 }
   0x3   :  { %1712 = sst [smem:[#allocation24_spill]] %s1693_s5 }
   0x4   :  { %10 = vsyncpa [#allocation4], 0 }
   0x5   :  { %11 = vsyncpa [#allocation7], 0 }
   0x6   :  { %12 = vsyncpa [#allocation10], 0 }
   0x7   :  { %14 = vsyncpa [#allocation10 + $0x1], 0 }
   0x8   :  { %15 = vsyncpa [#allocation5], 0 }
   0x9   :  { %17 = vsyncpa [#allocation5 + $0x1], 0  ;;  %s1343_s18 = smov 0   ;;  %s1345_s19 = smov 0  }
   0xa   :  { %s1347_s20 = smov 0   ;;  %s1349_s21 = smov 0  }
   0xb   :  { %s1351_s22 = smov 0   ;;  %s1353_s23 = smov 0  }
   0xc LB: > { %1713 = sst [smem:[#allocation17_spill]] %s1277_s18  ;;  %s1374_s24 = sadd.s32 4294967295, %s1297_s23   ;;  %s1297_s23 = sphi %s1353_s23, %s23_s23   ;;  %s1293_s22 = sphi %s1351_s22, %s1756_s22   ;;  %s1289_s21 = sphi %s1349_s21, %s1755_s21   ;;  %s1285_s20 = sphi %s1347_s20, %s1754_s20   ;;  %s1281_s19 = sphi %s1345_s19, %s1753_s19   ;;  %s1277_s18 = sphi %s1343_s18, %s1752_s18  }
   0xd   : > { %1714 = sst [smem:[#allocation18_spill]] %s1297_s23  ;;  %s841_s25 = sadd.s32 4294967294, %s1297_s23  }
   0xe   : > { %p117_p0 = scmp.ne.s32.totalorder %s1285_s20, %s1281_s19  ;;  %p118_p1 = scmp.eq.s32.totalorder %s1297_s23, 0 }
   0xf   : > { %p123_p2 = scmp.ne.s32.totalorder %s1281_s19, %s1277_s18  ;;  %p1694_p3 = scmp.eq.s32.totalorder %s1374_s24, 0 }
  0x10   : > { %p175_p4 = scmp.eq.s32.totalorder %s1374_s24, 2  ;;  %p1385_p5 = por %p118_p1, %p117_p0 }
  0x11   : > { %p181_p6 = scmp.eq.s32.totalorder %s841_s25, 2  ;;  %p1391_p7 = por %p1694_p3, %p123_p2 }
  0x12   : > { %p1395_p8 = por %p175_p4, %p117_p0  ;;  %p842_p10 = scmp.ge.s32.totalorder %s1297_s23, 1 }
  0x13   : > { %s1716_s28 = scalar_select %p1391_p7, 1, 0 }
  0x14   : > { %s1717_s29 = scalar_select %p1395_p8, 1, 0 }
  0x15   : > { %p1399_p9 = por %p181_p6, %p123_p2  ;;  %p188_p11 = scmp.lt.s32.totalorder %s1297_s23, 4 }
  0x16   : > { %s1299_s7 = smov [#allocation6]   ;;  %p947_p13 = scmp.lt.s32.totalorder %s1297_s23, 3 }
  0x17   : > { %s1718_s30 = scalar_select %p1399_p9, 1, 0 }
  0x18   : > { %p1405_p12 = pnand %p842_p10, %p188_p11  ;;  %s218_s8 = sshll.u32 %s1299_s7, 4  ;;  %s219_s8 = int_to_ptr.vmem [resolvable:$true] %s218_s8 }
  0x19   : > { %1719 = sst [smem:[#allocation19_spill]] %s1718_s30  ;;  %p1414_p1 = pnand %p947_p13, %p1385_p5 }
  0x1a   : > { %s1720_s6 = scalar_select %p1405_p12, 1, 0 }
  0x1b   : > { %p923_p0 = pneg %p1405_p12  ;;  %s32_s11 = sadd.s32 1, %s1293_s22 }
  0x1c   : > { %s1721_s9 = scalar_select %p1414_p1, 1, 0 }
  0x1d   : > { %p1420_p2 = pnand %p923_p0, %p1694_p3  ;;  %p1425_p4 = scmp.ge.s32.totalorder %s32_s11, 3 }
  0x1e   : > { %s1724_s1 = sld [smem:[#allocation22_spill]] }
  0x1f   : > { %s1722_s10 = scalar_select %p1420_p2, 1, 0 }
  0x20   : > { %s1723_s12 = scalar_select %p1425_p4, 1, 0 }
  0x21   : > { %p1438_p6 = pneg %p1420_p2 }
  0x24   : > { %s1063_s16 = scalar_lea.hbm %s1724_s1, 32 }
  0x25   : > { %p1064_p5 = scmp.ne.s32.totalorder %s1724_s1, %s1063_s16  ;;  %p1070_p13 = scmp.lt.u32.totalorder %s1063_s16, %s1724_s1 }
  0x27   : > { %p1066_p10 = pnand %p1438_p6, %p1064_p5 }
  0x29   : > { %p1067_p11 = pneg %p1066_p10 }
  0x2b   : > { %p1072_p0 = pnand %p1070_p13, %p1067_p11 }
  0x2d   : > { %1075 = shalt.err (!%p1072_p0)
}
  0x2e   : > { %s1076_s14 = scalar_lea.vmem %s219_s8, 32  ;;  %p1084_p7 = scmp.lt.s32.totalorder %s219_s8, %s219_s8 }
  0x2f   : > { %p1077_p3 = scmp.ne.s32.totalorder %s219_s8, %s1076_s14  ;;  %p1085_p12 = scmp.lt.s32.totalorder %s1076_s14, %s1076_s14 }
  0x31   : > { %p1079_p9 = pnand %p1077_p3, %p1438_p6  ;;  %p1086_p1 = por %p1085_p12, %p1084_p7 }
  0x33   : > { %p1080_p8 = pneg %p1079_p9 }
  0x35   : > { %p1087_p4 = pnand %p1086_p1, %p1080_p8 }
  0x37   : > { %1090 = shalt.err (!%p1087_p4)
}
  0x38   : > { %929 = dma.hbm_to_vmem [thread:$0]  (!%p1420_p2), %s1724_s1, 32, %s219_s8, [#allocation7]  }
  0x39   : > { %p1726_p3 = scmp.ne.s32.totalorder %s1723_s12, 0  ;;  %s1701_s26 = sand.u32 1, %s1285_s20  }
  0x3a   : > { %s847_s25 = sshll.u32 %s1701_s26, 8  ;;  %s900_s7 = sshll.u32 %s1293_s22, 7 }
  0x3b   : > { %s1758_s11 = smov (%p1726_p3, %s32_s11), 0  ;;  %s244_s14 = scalar_lea.vmem [#allocation9], %s847_s25 }
  0x3c   : > { %1727 = sst [smem:[#allocation20_spill]] %s1758_s11  ;;  %s107_s16 = ssub.s32 %s1293_s22, %s1758_s11 }
  0x3d   : > { %p108_p7 = scmp.eq.s32.totalorder %s107_s16, 0  ;;  %s251_s15 = sshll.u32 %s244_s14, 4  ;;  %s1474_s15 = int_to_ptr.vmem [resolvable:$true] %s251_s15 }
  0x3e   : > { %s1728_s17 = sadd.s32 1, %s1285_s20  ;;  %s1730_s3 = sld [smem:[#allocation23_spill]] }
  0x3f   : > { %s1467_s13 = scalar_select %p108_p7, %s1285_s20, %s1728_s17  }
  0x40   : > { %s1731_s12 = sand.u32 1, %s1297_s23   ;;  %p1732_p9 = scmp.ne.s32.totalorder %s1721_s9, 0 }
  0x41   : > { %1729 = sst [smem:[#allocation21_spill]] %s1467_s13  ;;  %s1478_s26 = scalar_lea.sflag [#allocation10], %s1731_s12 }
  0x42   : > { %p1705_p12 = pneg %p1732_p9 }
  0x44   : > { %s1472_s8 = scalar_lea.hbm %s1730_s3, %s900_s7  ;;  %s1096_s25 = scalar_lea.hbm %s1730_s3, 12288 }
  0x45   : > { %s1091_s16 = scalar_lea.hbm %s1472_s8, 4096  ;;  %p1097_p5 = scmp.lt.u32.totalorder %s1472_s8, %s1730_s3 }
  0x46   : > { %p1092_p8 = scmp.ne.s32.totalorder %s1472_s8, %s1091_s16  ;;  %p1098_p10 = scmp.lt.u32.totalorder %s1096_s25, %s1091_s16 }
  0x47   : > { %p1100_p13 = scmp.lt.u32.totalorder %s1091_s16, %s1472_s8 }
  0x48   : > { %p1094_p1 = pnand %p1705_p12, %p1092_p8  ;;  %p1099_p11 = por %p1098_p10, %p1097_p5 }
  0x4a   : > { %p1095_p4 = pneg %p1094_p1  ;;  %p1101_p0 = por %p1100_p13, %p1099_p11 }
  0x4c   : > { %p1102_p3 = pnand %p1101_p0, %p1095_p4 }
  0x4e   : > { %1105 = shalt.err (!%p1102_p3)
}
  0x4f   : > { %s1106_s17 = scalar_lea.vmem %s1474_s15, 4096  ;;  %s1300_s12 = smov [#allocation9]  }
  0x50   : > { %p1107_p7 = scmp.ne.s32.totalorder %s1474_s15, %s1106_s17  ;;  %s1111_s18 = sshll.u32 %s1300_s12, 4  ;;  %s1112_s18 = int_to_ptr.vmem [resolvable:$false] %s1111_s18 }
  0x51   : > { %s1113_s30 = scalar_lea.vmem %s1112_s18, 8192  ;;  %p1114_p2 = scmp.lt.s32.totalorder %s1474_s15, %s1112_s18 }
  0x52   : > { %p1109_p8 = pnand %p1107_p7, %p1705_p12  ;;  %p1115_p5 = scmp.lt.s32.totalorder %s1113_s30, %s1106_s17 }
  0x54   : > { %p1110_p1 = pneg %p1109_p8  ;;  %p1116_p10 = por %p1115_p5, %p1114_p2 }
  0x56   : > { %p1117_p11 = pnand %p1116_p10, %p1110_p1 }
  0x58   : > { %1120 = shalt.err (!%p1117_p11)
}
  0x59   : > { %s1301_s16 = smov 384   ;;  %s1302_s25 = smov 128  }
  0x5a   : > { %s1303_s7 = smov 8   ;;  %s1304_s14 = smov [#allocation3]  }
  0x5b   : > { %936 = dma.hbm_to_vmem [thread:$0]  (!%p1732_p9), %s1472_s8, 4096, %s1474_s15, %s1478_s26, %s1301_s16, %s1302_s25, %s1303_s7  }
  0x5c   : > { %s204_s1 = sshll.u32 %s1304_s14, 4  ;;  %s1121_s17 = scalar_lea.hbm %s1688_s0, 512  ;;  %s205_s1 = int_to_ptr.vmem [resolvable:$true] %s204_s1 }
  0x5d   : > { %p1122_p2 = scmp.ne.s32.totalorder %s1688_s0, %s1121_s17  ;;  %p1128_p0 = scmp.lt.u32.totalorder %s1121_s17, %s1688_s0 }
  0x5f   : > { %p1124_p4 = pnand %p1122_p2, %p1438_p6 }
  0x61   : > { %p1125_p13 = pneg %p1124_p4 }
  0x63   : > { %p1130_p3 = pnand %p1128_p0, %p1125_p13 }
  0x65   : > { %1133 = shalt.err (!%p1130_p3)
}
  0x66   : > { %s1134_s15 = scalar_lea.vmem %s205_s1, 512  ;;  %p1142_p5 = scmp.lt.s32.totalorder %s205_s1, %s205_s1 }
  0x67   : > { %p1135_p7 = scmp.ne.s32.totalorder %s205_s1, %s1134_s15  ;;  %p1143_p10 = scmp.lt.s32.totalorder %s1134_s15, %s1134_s15 }
  0x69   : > { %p1137_p8 = pnand %p1135_p7, %p1438_p6  ;;  %p1144_p11 = por %p1143_p10, %p1142_p5 }
  0x6b   : > { %p1138_p1 = pneg %p1137_p8 }
  0x6d   : > { %p1145_p12 = pnand %p1144_p11, %p1138_p1 }
  0x6f   : > { %1148 = shalt.err (!%p1145_p12)
}
  0x70   : > { %s1305_s3 = smov 256   ;;  %s1306_s11 = smov 16  }
  0x71   : > { %p1733_p2 = scmp.ne.s32.totalorder %s1722_s10, 0  ;;  %s1734_s16 = sand.u32 1, %s1285_s20  }
  0x72   : > { %s850_s25 = sshll.u32 %s1734_s16, 1  ;;  %s1307_s7 = smov [#allocation8]  }
  0x73   : > { %926 = dma.hbm_to_vmem [thread:$0]  (!%p1733_p2), %s1688_s0, 512, %s205_s1, [#allocation4], %s1305_s3, %s1305_s3, %s1306_s11  }
  0x74   : > { %s229_s14 = sshll.u32 %s1307_s7, 4  ;;  %s901_s12 = sshll.u32 %s1293_s22, 5  ;;  %s230_s14 = int_to_ptr.vmem [resolvable:$true] %s229_s14 }
  0x75   : > { %s1149_s30 = scalar_lea.hbm %s1690_s2, 32 }
  0x76   : > { %p1150_p12 = scmp.ne.s32.totalorder %s1690_s2, %s1149_s30  ;;  %p1156_p0 = scmp.lt.u32.totalorder %s1149_s30, %s1690_s2 }
  0x78   : > { %p1152_p4 = pnand %p1150_p12, %p1438_p6 }
  0x7a   : > { %p1153_p13 = pneg %p1152_p4 }
  0x7c   : > { %p1158_p3 = pnand %p1156_p0, %p1153_p13 }
  0x7e   : > { %1161 = shalt.err (!%p1158_p3)
}
  0x7f   : > { %s1162_s1 = scalar_lea.vmem %s230_s14, 32  ;;  %p1170_p5 = scmp.lt.s32.totalorder %s230_s14, %s230_s14 }
  0x80   : > { %p1163_p7 = scmp.ne.s32.totalorder %s230_s14, %s1162_s1  ;;  %p1171_p10 = scmp.lt.s32.totalorder %s1162_s1, %s1162_s1 }
  0x82   : > { %p1165_p8 = pnand %p1163_p7, %p1438_p6  ;;  %p1172_p11 = por %p1171_p10, %p1170_p5 }
  0x84   : > { %p1166_p1 = pneg %p1165_p8 }
  0x86   : > { %p1173_p9 = pnand %p1172_p11, %p1166_p1 }
  0x88   : > { %1176 = shalt.err (!%p1173_p9)
}
  0x89   : > { %932 = dma.hbm_to_vmem [thread:$0]  (!%p1733_p2), %s1690_s2, 32, %s230_s14, [#allocation7]  }
  0x8a   : > { %s1548_s8 = scalar_lea.hbm %s1692_s4, %s901_s12  ;;  %s265_s27 = scalar_lea.vmem [#allocation11], %s850_s25 }
  0x8b   : > { %s273_s16 = sshll.u32 %s265_s27, 4  ;;  %s1177_s7 = scalar_lea.hbm %s1548_s8, 32  ;;  %s274_s16 = int_to_ptr.vmem [resolvable:$true] %s273_s16 }
  0x8c   : > { %p1178_p6 = scmp.ne.s32.totalorder %s1548_s8, %s1177_s7  ;;  %p1735_p9 = scmp.ne.s32.totalorder %s1721_s9, 0 }
  0x8d   : > { %s1182_s17 = scalar_lea.hbm %s1692_s4, 96  ;;  %p1183_p2 = scmp.lt.u32.totalorder %s1548_s8, %s1692_s4 }
  0x8e   : > { %p1736_p12 = pneg %p1735_p9  ;;  %p1184_p0 = scmp.lt.u32.totalorder %s1182_s17, %s1177_s7 }
  0x8f   : > { %p1186_p7 = scmp.lt.u32.totalorder %s1177_s7, %s1548_s8 }
  0x90   : > { %p1180_p4 = pnand %p1178_p6, %p1736_p12  ;;  %p1185_p3 = por %p1184_p0, %p1183_p2 }
  0x92   : > { %p1181_p13 = pneg %p1180_p4  ;;  %p1187_p8 = por %p1186_p7, %p1185_p3 }
  0x94   : > { %p1188_p1 = pnand %p1187_p8, %p1181_p13 }
  0x96   : > { %1191 = shalt.err (!%p1188_p1)
}
  0x97   : > { %s1192_s25 = scalar_lea.vmem %s274_s16, 32  ;;  %p1737_p10 = pmov %p1736_p12 }
  0x98   : > { %p1193_p5 = scmp.ne.s32.totalorder %s274_s16, %s1192_s25  ;;  %s1308_s30 = smov [#allocation11]  }
  0x99   : > { %s1197_s15 = sshll.u32 %s1308_s30, 4  ;;  %s1198_s15 = int_to_ptr.vmem [resolvable:$false] %s1197_s15 }
  0x9a   : > { %p1195_p11 = pnand %p1193_p5, %p1737_p10  ;;  %s1199_s13 = scalar_lea.vmem %s1198_s15, 64 }
  0x9b   : > { %p1200_p12 = scmp.lt.s32.totalorder %s274_s16, %s1198_s15  ;;  %p1201_p4 = scmp.lt.s32.totalorder %s1199_s13, %s1192_s25 }
  0x9c   : > { %p1196_p6 = pneg %p1195_p11 }
  0x9d   : > { %p1202_p0 = por %p1201_p4, %p1200_p12 }
  0x9f   : > { %p1203_p2 = pnand %p1202_p0, %p1196_p6 }
  0xa1   : > { %1206 = shalt.err (!%p1203_p2)
}
  0xa2   : > { %939 = dma.hbm_to_vmem [thread:$0]  (!%p1735_p9), %s1548_s8, 32, %s274_s16, %s1478_s26  }
  0xa3   : > { %p1738_p13 = scmp.ne.s32.totalorder %s1720_s6, 0 }
  0xa4   : > { %p1739_p3 = scmp.eq.s32.totalorder (!%p1738_p13), %s1374_s24, 0 }
  0xa5   : > { %282 = sbr.rel (%p1738_p13) target bundleno = 807 (0x327), region = 40 }
  0xac   : > { %1260 = dma.done.wait (%p1739_p3), [#allocation4], 512   ;;  %p1740_p7 = pmov %p1739_p3 }
  0xad   : > { %p1741_p8 = pmov %p1739_p3 }
  0xae   : > { %1262 = vsyncadd (%p1740_p7), [#allocation4], 4294966784 }
  0xaf   : > { %1264 = dma.done.wait (%p1741_p8), [#allocation7], 64   ;;  %p1742_p1 = pmov %p1739_p3 }
  0xb0   : > { %s296_s9 = sand.u32 1, %s1374_s24   ;;  %s1582_s26 = sand.u32 1, %s1281_s19  }
  0xb1   : > { %1266 = vsyncadd (%p1742_p1), [#allocation7], 4294967232  ;;  %s857_s6 = sshll.u32 %s1582_s26, 8  ;;  %s297_s1 = scalar_lea.sflag [#allocation10], %s296_s9 }
  0xb2   : > { %s1585_s23 = scalar_lea.vmem [#allocation9], %s857_s6  ;;  %p1743_p9 = scmp.ne.s32.totalorder %s1716_s28, 0 }
  0xb4   : > { %1268 = dma.done.wait (%p1743_p9), %s297_s1, 4128  }
  0xb5   : > { %1270 = vsyncadd (%p1743_p9), %s297_s1, 4294963168  ;;  %s858_s3 = sshll.u32 %s1582_s26, 1  ;;  %s859_s5 = sshll.u32 %s1582_s26, 4 }
  0xb6   : > { %s1593_s11 = scalar_lea.vmem [#allocation11], %s858_s3  ;;  %s1595_s8 = scalar_lea.vmem [#allocation12], %s859_s5 }
  0xb7   : > { %p860_p5 = scmp.ne.s32.totalorder %s1289_s21, 0 }
  0xb8   : > { %v350_v0 = vld [vmem:[#allocation3] sm:$0xff] (!%p860_p5)  ;;  %v351_v1 = vld [vmem:[#allocation3 + $0x8] sm:$0xff] (!%p860_p5)  ;;  %v352_v2 = vld [vmem:[#allocation3 + $0x10] sm:$0xff] (!%p860_p5)  ;;  %v389_v23 = vlaneseq (!%p860_p5) }
  0xb9   : > { %349 = sbr.rel (%p860_p5) target bundleno = 507 (0x1fb), region = 64  ;;  %v354_v3 = vadd.f32 (!%p860_p5), %v351_v1, %v350_v0  ;;  %v353_v4 = vld [vmem:[#allocation3 + $0x18] sm:$0xff] (!%p860_p5)  ;;  %v387_v30 = vld [vmem:[#allocation6] sm:$0x3] (!%p860_p5)  ;;  %v403_v34 = vld [vmem:[#allocation8] sm:$0x3] (!%p860_p5) }
  0xba   : > { %v357_v5 = vadd.f32 (!%p860_p5), %v353_v4, %v352_v2  ;;  %v390_v27 = vshrl.u32 (!%p860_p5), %v389_v23, 7 }
  0xbb   : > { %355 = vadd.xlane.f32.xlu0 (!%p860_p5), %v354_v3 }
  0xbc   : > { %v391_v28 = vsub.s32 (!%p860_p5), 0, %v390_v27  ;;  %v395_v29 = vsub.s32 (!%p860_p5), 1, %v390_v27 }
  0xbe   : > { %v392_v32 = vrot.slane (!%p860_p5), %v387_v30, %v391_v28  ;;  %v396_v33 = vrot.slane (!%p860_p5), %v387_v30, %v395_v29  ;;  %v408_v38 = vrot.slane (!%p860_p5), %v403_v34, %v391_v28  ;;  %v412_v39 = vrot.slane (!%p860_p5), %v403_v34, %v395_v29 }
  0xbf   : > { %358 = vadd.xlane.f32.xlu0 (!%p860_p5), %v357_v5 }
 0x148   : > { %v356_v6 = vpop.xlane.xlu0 %355 }
 0x149   : > { %v361_v7 = vmul.f32 0.00390625, %v356_v6 }
 0x14b   : > { %v363_v8 = vsub.f32 %v350_v0, %v361_v7  ;;  %v364_v9 = vsub.f32 %v351_v1, %v361_v7 }
 0x14c   : > { %v359_v10 = vpop.xlane.xlu0 %358 }
 0x14d   : > { %v362_v11 = vmul.f32 0.00390625, %v359_v10  ;;  %v367_v12 = vmul.f32 %v363_v8, %v363_v8  ;;  %v368_v13 = vmul.f32 %v364_v9, %v364_v9 }
 0x14f   : > { %v365_v14 = vsub.f32 %v352_v2, %v362_v11  ;;  %v366_v15 = vsub.f32 %v353_v4, %v362_v11  ;;  %v371_v16 = vadd.f32 %v368_v13, %v367_v12 }
 0x151   : > { %372 = vadd.xlane.f32.xlu1 %v371_v16  ;;  %v369_v17 = vmul.f32 %v365_v14, %v365_v14  ;;  %v370_v18 = vmul.f32 %v366_v15, %v366_v15 }
 0x153   : > { %v374_v19 = vadd.f32 %v370_v18, %v369_v17 }
 0x155   : > { %375 = vadd.xlane.f32.xlu1 %v374_v19 }
 0x1de   : > { %v373_v20 = vpop.xlane.xlu1 %372 }
 0x1df   : > { %v377_v21 = vmul.f32 0.00390625, %v373_v20 }
 0x1e1   : > { %v379_v22 = vadd.f32 1e-05, %v377_v21 }
 0x1e2   : > { %v376_v24 = vpop.xlane.xlu1 %375 }
 0x1e3   : > { %1011 = vrsqrt.f32 %v379_v22  ;;  %v378_v25 = vmul.f32 0.00390625, %v376_v24 }
 0x1e5   : > { %v380_v26 = vadd.f32 1e-05, %v378_v25 }
 0x1e7   : > { %1013 = vrsqrt.f32 %v380_v26 }
 0x1ed   : > { %v1012_v31 = vpop.eup %1011 }
 0x1ee   : > { %v383_v35 = vmul.f32 %v1012_v31, %v363_v8  ;;  %v384_v36 = vmul.f32 %v1012_v31, %v364_v9 }
 0x1f0   : > { %v399_v40 = vmul.f32 %v392_v32, %v383_v35  ;;  %v400_v41 = vmul.f32 %v396_v33, %v384_v36 }
 0x1f1   : > { %v1014_v37 = vpop.eup %1013 }
 0x1f2   : > { %v385_v42 = vmul.f32 %v1014_v37, %v365_v14  ;;  %v386_v43 = vmul.f32 %v1014_v37, %v366_v15  ;;  %v415_v46 = vadd.f32 %v408_v38, %v399_v40  ;;  %v416_v47 = vadd.f32 %v412_v39, %v400_v41 }
 0x1f4   : > { %v401_v44 = vmul.f32 %v392_v32, %v385_v42  ;;  %v402_v45 = vmul.f32 %v396_v33, %v386_v43 }
 0x1f6   : > { %v417_v48 = vadd.f32 %v408_v38, %v401_v44  ;;  %v418_v49 = vadd.f32 %v412_v39, %v402_v45 }
 0x1f8   : > { %v419_v50 = vpack.c.bf16 %v417_v48, %v415_v46  ;;  %v420_v51 = vpack.c.bf16 %v418_v49, %v416_v47 }
 0x1fa   : > { %421 = vst [vmem:[#allocation2] sm:$0xff] %v419_v50  ;;  %422 = vst [vmem:[#allocation2 + $0x8] sm:$0xff] %v420_v51 }
 0x1fb PF: > { %v1015_v52 = vld [vmem:[%s1585_s23 + $0x4] ss:$8 sps:$4 sm:$0xff]   ;;  %v1017_v53 = vld [vmem:[%s1585_s23] ss:$8 sps:$4 sm:$0xff]   ;;  %v1018_v54 = vld [vmem:[%s1585_s23 + $0x14] ss:$8 sps:$4 sm:$0xff]   ;;  %v459_v22 = vlaneseq }
 0x1fc   : > { %629 = vmatprep.subr.bf16.mxu0 %v1015_v52  ;;  %v1020_v55 = vld [vmem:[%s1585_s23 + $0x10] ss:$8 sps:$4 sm:$0xff]   ;;  %v1021_v56 = vld [vmem:[%s1585_s23 + $0x24] ss:$8 sps:$4 sm:$0xff]   ;;  %v1023_v57 = vld [vmem:[%s1585_s23 + $0x20] ss:$8 sps:$4 sm:$0xff]  }
 0x1fd   : > { %630 = vmatpush1.bf16.msra.mxu0 %v1017_v53  ;;  %v1024_v58 = vld [vmem:[%s1585_s23 + $0x34] ss:$8 sps:$4 sm:$0xff]   ;;  %v1026_v59 = vld [vmem:[%s1585_s23 + $0x30] ss:$8 sps:$4 sm:$0xff]   ;;  %v1027_v60 = vld [vmem:[%s1585_s23 + $0x44] ss:$8 sps:$4 sm:$0xff]  }
 0x1fe   : > { %631 = vmatprep.subr.bf16.mxu0 %v1018_v54  ;;  %v1029_v61 = vld [vmem:[%s1585_s23 + $0x40] ss:$8 sps:$4 sm:$0xff]   ;;  %v1030_v62 = vld [vmem:[%s1585_s23 + $0x54] ss:$8 sps:$4 sm:$0xff]   ;;  %v1032_v63 = vld [vmem:[%s1585_s23 + $0x50] ss:$8 sps:$4 sm:$0xff]  }
 0x1ff   : > { %v1033_v0 = vld [vmem:[%s1585_s23 + $0x64] ss:$8 sps:$4 sm:$0xff]   ;;  %v1035_v2 = vld [vmem:[%s1585_s23 + $0x60] ss:$8 sps:$4 sm:$0xff]   ;;  %v1036_v3 = vld [vmem:[%s1585_s23 + $0x74] ss:$8 sps:$4 sm:$0xff]  }
 0x200   : > { %v1038_v4 = vld [vmem:[%s1585_s23 + $0x70] ss:$8 sps:$4 sm:$0xff]   ;;  %v1039_v5 = vld [vmem:[%s1585_s23 + $0x84] ss:$8 sps:$4 sm:$0xff]   ;;  %v1041_v6 = vld [vmem:[%s1585_s23 + $0x80] ss:$8 sps:$4 sm:$0xff]  }
 0x201   : > { %632 = vmatpush1.bf16.msra.mxu0 %v1020_v55  ;;  %v424_v1 = vld [vmem:[#allocation2 + $0x8] sm:$0xff]  ;;  %v1045_v9 = vld [vmem:[%s1585_s23 + $0xa4] ss:$8 sps:$4 sm:$0xff]   ;;  %v1047_v10 = vld [vmem:[%s1585_s23 + $0xa0] ss:$8 sps:$4 sm:$0xff]   ;;  %v460_v23 = vshrl.u32 %v459_v22, 7 }
 0x202   : > { %633 = vmatprep.subr.bf16.mxu0 %v1021_v56  ;;  %661 = vmatprep.mubr.bf16.mxu0 %v424_v1  ;;  %v1042_v7 = vld [vmem:[%s1585_s23 + $0x94] ss:$8 sps:$4 sm:$0xff]   ;;  %v1044_v8 = vld [vmem:[%s1585_s23 + $0x90] ss:$8 sps:$4 sm:$0xff]   ;;  %v1051_v13 = vld [vmem:[%s1585_s23 + $0xc4] ss:$8 sps:$4 sm:$0xff]  }
 0x203   : > { %v1048_v11 = vld [vmem:[%s1585_s23 + $0xb4] ss:$8 sps:$4 sm:$0xff]   ;;  %v1050_v12 = vld [vmem:[%s1585_s23 + $0xb0] ss:$8 sps:$4 sm:$0xff]   ;;  %v1053_v14 = vld [vmem:[%s1585_s23 + $0xc0] ss:$8 sps:$4 sm:$0xff]  }
 0x204   : > { %v1054_v15 = vld [vmem:[%s1585_s23 + $0xd4] ss:$8 sps:$4 sm:$0xff]   ;;  %v1056_v16 = vld [vmem:[%s1585_s23 + $0xd0] ss:$8 sps:$4 sm:$0xff]   ;;  %v1057_v17 = vld [vmem:[%s1585_s23 + $0xe4] ss:$8 sps:$4 sm:$0xff]  }
 0x205   : > { %634 = vmatpush1.bf16.msra.mxu0 %v1023_v57  ;;  %v1059_v18 = vld [vmem:[%s1585_s23 + $0xe0] ss:$8 sps:$4 sm:$0xff]   ;;  %v1060_v19 = vld [vmem:[%s1585_s23 + $0xf4] ss:$8 sps:$4 sm:$0xff]   ;;  %v1062_v20 = vld [vmem:[%s1585_s23 + $0xf0] ss:$8 sps:$4 sm:$0xff]  }
 0x206   : > { %635 = vmatprep.subr.bf16.mxu0 %v1024_v58  ;;  %v423_v21 = vld [vmem:[#allocation2] sm:$0xff]  ;;  %v461_v24 = vsub.s32 0, %v460_v23  ;;  %v457_v25 = vld [vmem:[%s1593_s11] sm:$0x3]  ;;  %v465_v26 = vsub.s32 1, %v460_v23  ;;  %s904_s24 = sshll.u32 %s1289_s21, 7 }
 0x207   : > { %s703_s28 = sshll.u32 %s1595_s8, 4  ;;  %s1744_s7 = sld [smem:[#allocation24_spill]]  ;;  %s1638_s28 = int_to_ptr.vmem [resolvable:$true] %s703_s28 }
 0x208   : > { %v462_v27 = vrot.slane %v457_v25, %v461_v24  ;;  %v466_v28 = vrot.slane %v457_v25, %v465_v26  ;;  %s687_s21 = scalar_lea.sflag [#allocation5], %s1582_s26  ;;  %s1207_s14 = scalar_lea.vmem %s1638_s28, 256 }
 0x209   : > { %636 = vmatpush1.bf16.msra.mxu0 %v1026_v59  ;;  %p1208_p10 = scmp.ne.s32.totalorder %s1638_s28, %s1207_s14  ;;  %p1745_p11 = scmp.ne.s32.totalorder %s1717_s29, 0 }
 0x20a   : > { %637 = vmatprep.subr.bf16.mxu0 %v1027_v60  ;;  %s1309_s17 = smov [#allocation12]  }
 0x20b   : > { %p1209_p6 = pnand %p1208_p10, %p1745_p11  ;;  %s1211_s18 = sshll.u32 %s1309_s17, 4  ;;  %s1212_s18 = int_to_ptr.vmem [resolvable:$false] %s1211_s18 }
 0x20c   : > { %s1213_s12 = scalar_lea.vmem %s1212_s18, 512  ;;  %p1214_p4 = scmp.lt.s32.totalorder %s1638_s28, %s1212_s18 }
 0x20d   : > { %638 = vmatpush1.bf16.msra.mxu0 %v1029_v61  ;;  %s1636_s10 = scalar_lea.hbm %s1744_s7, %s904_s24  ;;  %p1210_p12 = pneg %p1209_p6 }
 0x20e   : > { %639 = vmatprep.subr.bf16.mxu0 %v1030_v62  ;;  %p1215_p0 = scmp.lt.s32.totalorder %s1213_s12, %s1207_s14 }
 0x210   : > { %p1216_p2 = por %p1215_p0, %p1214_p4 }
 0x211   : > { %640 = vmatpush1.bf16.msra.mxu0 %v1032_v63 }
 0x212   : > { %641 = vmatprep.subr.bf16.mxu0 %v1033_v0  ;;  %p1217_p13 = pnand %p1216_p2, %p1210_p12 }
 0x215   : > { %642 = vmatpush1.bf16.msra.mxu0 %v1035_v2 }
 0x216   : > { %643 = vmatprep.subr.bf16.mxu0 %v1036_v3 }
 0x219   : > { %644 = vmatpush1.bf16.msra.mxu0 %v1038_v4 }
 0x21a   : > { %645 = vmatprep.subr.bf16.mxu0 %v1039_v5 }
 0x21d   : > { %646 = vmatpush1.bf16.msra.mxu0 %v1041_v6 }
 0x21e   : > { %647 = vmatprep.subr.bf16.mxu0 %v1042_v7 }
 0x221   : > { %648 = vmatpush1.bf16.msra.mxu0 %v1044_v8 }
 0x222   : > { %649 = vmatprep.subr.bf16.mxu0 %v1045_v9 }
 0x225   : > { %650 = vmatpush1.bf16.msra.mxu0 %v1047_v10 }
 0x226   : > { %651 = vmatprep.subr.bf16.mxu0 %v1048_v11 }
 0x229   : > { %652 = vmatpush1.bf16.msra.mxu0 %v1050_v12 }
 0x22a   : > { %653 = vmatprep.subr.bf16.mxu0 %v1051_v13 }
 0x22d   : > { %654 = vmatpush1.bf16.msra.mxu0 %v1053_v14 }
 0x22e   : > { %655 = vmatprep.subr.bf16.mxu0 %v1054_v15 }
 0x231   : > { %656 = vmatpush1.bf16.msra.mxu0 %v1056_v16 }
 0x232   : > { %657 = vmatprep.subr.bf16.mxu0 %v1057_v17 }
 0x235   : > { %658 = vmatpush1.bf16.msra.mxu0 %v1059_v18 }
 0x236   : > { %659 = vmatprep.subr.bf16.mxu0 %v1060_v19 }
 0x239   : > { %660 = vmatpush1.bf16.msra.mxu0 %v1062_v20 }
 0x23c   : > { %662 = vmatmul.mubr.bf16.vlgmr.msra.gmra.mrb[0].mxu0 %v423_v21 }
 0x30f   : > { %v663_v29 = vpop.f32.mrb[0].mxu0 }
 0x310   : > { %v664_v30 = vadd.f32 %v663_v29, %v462_v27  ;;  %v665_v31 = vpop.f32.mrb[1].mxu0 }
 0x311   : > { %v666_v32 = vadd.f32 %v665_v31, %v466_v28  ;;  %v667_v33 = vpop.f32.mrb[2].mxu0 }
 0x312   : > { %v668_v34 = vadd.f32 %v667_v33, %v462_v27  ;;  %v669_v35 = vpop.f32.mrb[3].mxu0 }
 0x313   : > { %v902_v36 = vpack.c.bf16 %v666_v32, %v664_v30  ;;  %v670_v37 = vadd.f32 %v669_v35, %v466_v28 }
 0x315   : > { %684 = vst [vmem:[%s1595_s8] sm:$0xff] %v902_v36  ;;  %v903_v38 = vpack.c.bf16 %v670_v37, %v668_v34 }
 0x317   : > { %685 = vst [vmem:[%s1595_s8 + $0x8] sm:$0xff] %v903_v38 }
 0x318   : > { %1220 = shalt.err (!%p1217_p13)
}
 0x319   : > { %s1221_s25 = scalar_lea.hbm %s1636_s10, 256  ;;  %s1225_s13 = scalar_lea.hbm %s1744_s7, 768 }
 0x31a   : > { %p1222_p3 = scmp.ne.s32.totalorder %s1636_s10, %s1221_s25  ;;  %p1226_p1 = scmp.lt.u32.totalorder %s1636_s10, %s1744_s7 }
 0x31b   : > { %p1227_p9 = scmp.lt.u32.totalorder %s1225_s13, %s1221_s25  ;;  %p1229_p10 = scmp.lt.u32.totalorder %s1221_s25, %s1636_s10 }
 0x31c   : > { %p1223_p7 = pnand %p1222_p3, %p1745_p11 }
 0x31d   : > { %p1228_p5 = por %p1227_p9, %p1226_p1 }
 0x31e   : > { %p1224_p8 = pneg %p1223_p7 }
 0x31f   : > { %p1230_p6 = por %p1229_p10, %p1228_p5 }
 0x321   : > { %p1231_p12 = pnand %p1230_p6, %p1224_p8 }
 0x323   : > { %1234 = shalt.err (!%p1231_p12)
}
 0x324   : > { %s1310_s1 = smov 128   ;;  %s1311_s23 = smov 384  }
 0x325   : > { %s1312_s3 = smov 8  }
 0x326   : > { %921 = dma.vmem_to_hbm [thread:$0]  (%p1745_p11), %s1638_s28, 256, %s1636_s10, %s687_s21, %s1310_s1, %s1311_s23, %s1312_s3  }
 0x327 PF: > { %s1746_s5 = sld [smem:[#allocation18_spill]]  ;;  %s1747_s11 = sld [smem:[#allocation17_spill]] }
 0x328   : > { %s1748_s8 = sld [smem:[#allocation19_spill]] }
 0x32d   : > { %p951_p4 = scmp.ge.s32.totalorder %s1746_s5, 2  ;;  %s718_s24 = sand.u32 1, %s1747_s11  }
 0x32e   : > { %p1749_p0 = scmp.ne.s32.totalorder %s1748_s8, 0  ;;  %s719_s27 = scalar_lea.sflag [#allocation5], %s718_s24 }
 0x330   : > { %p941_p2 = pnand %p951_p4, %p1749_p0 }
 0x332   : > { %1272 = dma.done.wait (!%p941_p2), %s719_s27, 256  }
 0x333   : > { %1274 = vsyncadd (!%p941_p2), %s719_s27, 4294967040  ;;  %s23_s23 = sadd.s32 1, %s1746_s5   ;;  %s1750_s16 = sld [smem:[#allocation21_spill]] }
 0x334   : > { %p20_p13 = scmp.ge.s32.totalorder %s23_s23, 5   ;;  %s1751_s29 = sld [smem:[#allocation20_spill]] }
 0x335   : > { %s1752_s18 = smov %s1281_s19  ;;  %s1753_s19 = smov %s1285_s20 }
 0x336   : > { %s1755_s21 = smov %s1293_s22  ;;  %22 = sbr.rel (!%p20_p13) target bundleno = 12 (0xc), region = 114 }
 0x339   : > { %s1754_s20 = smov %s1750_s16 }
 0x33a   : > { %s1756_s22 = smov %s1751_s29 }
 0x33d   :  { %724 = vsyncpa [#allocation4], 1 }
 0x33e   :  { %726 = vsyncpa [#allocation4 + $0x1], 1 }
 0x33f   :  { %727 = vsyncpa [#allocation7], 1 }
 0x340   :  { %728 = vsyncpa [#allocation10], 1 }
 0x341   :  { %730 = vsyncpa [#allocation10 + $0x1], 1 }
 0x342   :  { %731 = vsyncpa [#allocation5], 1 }
 0x343   :  { %733 = vsyncpa [#allocation5 + $0x1], 1 }

// kernel: lora_gpt_neo_forward.14
= control target key start
LH: loop header
LB: loop body
LE: loop exit
PB: predicated region body
PF: predicated region fallthrough
CT: control target
= control target key end

     0   :  { %s1732_s0 = inlined_call_operand.hbm [shape: f32[16,256], index: 0, kind: input, shape index: {}]   ;;  %s1733_s1 = inlined_call_operand.hbm [shape: f32[1,256], index: 1, kind: input, shape index: {}]   ;;  %s1734_s2 = inlined_call_operand.hbm [shape: f32[1,256], index: 2, kind: input, shape index: {}]   ;;  %s1735_s3 = inlined_call_operand.hbm [shape: bf16[256,1024], index: 3, kind: input, shape index: {}]   ;;  %s1736_s4 = inlined_call_operand.hbm [shape: f32[1,1024], index: 4, kind: input, shape index: {}]   ;;  %s1737_s5 = inlined_call_operand.hbm [shape: bf16[16,1024], index: 5, kind: output, shape index: {}]  }
   0x1   :  { %1754 = sst [smem:[#allocation22_spill]] %s1733_s1 }
   0x2   :  { %1755 = sst [smem:[#allocation23_spill]] %s1735_s3 }
   0x3   :  { %1756 = sst [smem:[#allocation24_spill]] %s1737_s5 }
   0x4   :  { %10 = vsyncpa [#allocation4], 0 }
   0x5   :  { %11 = vsyncpa [#allocation7], 0 }
   0x6   :  { %12 = vsyncpa [#allocation10], 0 }
   0x7   :  { %14 = vsyncpa [#allocation10 + $0x1], 0 }
   0x8   :  { %15 = vsyncpa [#allocation5], 0 }
   0x9   :  { %17 = vsyncpa [#allocation5 + $0x1], 0  ;;  %s1387_s18 = smov 0   ;;  %s1389_s19 = smov 0  }
   0xa   :  { %s1391_s20 = smov 0   ;;  %s1393_s21 = smov 0  }
   0xb   :  { %s1395_s22 = smov 0   ;;  %s1397_s23 = smov 0  }
   0xc LB: > { %1757 = sst [smem:[#allocation17_spill]] %s1321_s18  ;;  %s1418_s24 = sadd.s32 4294967295, %s1341_s23   ;;  %s1341_s23 = sphi %s1397_s23, %s23_s23   ;;  %s1337_s22 = sphi %s1395_s22, %s1800_s22   ;;  %s1333_s21 = sphi %s1393_s21, %s1799_s21   ;;  %s1329_s20 = sphi %s1391_s20, %s1798_s20   ;;  %s1325_s19 = sphi %s1389_s19, %s1797_s19   ;;  %s1321_s18 = sphi %s1387_s18, %s1796_s18  }
   0xd   : > { %1758 = sst [smem:[#allocation18_spill]] %s1341_s23  ;;  %s877_s25 = sadd.s32 4294967294, %s1341_s23  }
   0xe   : > { %p117_p0 = scmp.ne.s32.totalorder %s1329_s20, %s1325_s19  ;;  %p118_p1 = scmp.eq.s32.totalorder %s1341_s23, 0 }
   0xf   : > { %p123_p2 = scmp.ne.s32.totalorder %s1325_s19, %s1321_s18  ;;  %p1738_p3 = scmp.eq.s32.totalorder %s1418_s24, 0 }
  0x10   : > { %p175_p4 = scmp.eq.s32.totalorder %s1418_s24, 3  ;;  %p1429_p5 = por %p118_p1, %p117_p0 }
  0x11   : > { %p181_p6 = scmp.eq.s32.totalorder %s877_s25, 3  ;;  %p1435_p7 = por %p1738_p3, %p123_p2 }
  0x12   : > { %p1439_p8 = por %p175_p4, %p117_p0  ;;  %p878_p10 = scmp.ge.s32.totalorder %s1341_s23, 1 }
  0x13   : > { %s1760_s28 = scalar_select %p1435_p7, 1, 0 }
  0x14   : > { %s1761_s29 = scalar_select %p1439_p8, 1, 0 }
  0x15   : > { %p1443_p9 = por %p181_p6, %p123_p2  ;;  %p188_p11 = scmp.lt.s32.totalorder %s1341_s23, 5 }
  0x16   : > { %s1343_s7 = smov [#allocation6]   ;;  %p983_p13 = scmp.lt.s32.totalorder %s1341_s23, 4 }
  0x17   : > { %s1762_s30 = scalar_select %p1443_p9, 1, 0 }
  0x18   : > { %p1449_p12 = pnand %p878_p10, %p188_p11  ;;  %s218_s8 = sshll.u32 %s1343_s7, 4  ;;  %s219_s8 = int_to_ptr.vmem [resolvable:$true] %s218_s8 }
  0x19   : > { %1763 = sst [smem:[#allocation19_spill]] %s1762_s30  ;;  %p1458_p1 = pnand %p983_p13, %p1429_p5 }
  0x1a   : > { %s1764_s6 = scalar_select %p1449_p12, 1, 0 }
  0x1b   : > { %p959_p0 = pneg %p1449_p12  ;;  %s32_s11 = sadd.s32 1, %s1337_s22 }
  0x1c   : > { %s1765_s9 = scalar_select %p1458_p1, 1, 0 }
  0x1d   : > { %p1464_p2 = pnand %p959_p0, %p1738_p3  ;;  %p1469_p4 = scmp.ge.s32.totalorder %s32_s11, 4 }
  0x1e   : > { %s1768_s1 = sld [smem:[#allocation22_spill]] }
  0x1f   : > { %s1766_s10 = scalar_select %p1464_p2, 1, 0 }
  0x20   : > { %s1767_s12 = scalar_select %p1469_p4, 1, 0 }
  0x21   : > { %p1482_p6 = pneg %p1464_p2 }
  0x24   : > { %s1107_s16 = scalar_lea.hbm %s1768_s1, 32 }
  0x25   : > { %p1108_p5 = scmp.ne.s32.totalorder %s1768_s1, %s1107_s16  ;;  %p1114_p13 = scmp.lt.u32.totalorder %s1107_s16, %s1768_s1 }
  0x27   : > { %p1110_p10 = pnand %p1482_p6, %p1108_p5 }
  0x29   : > { %p1111_p11 = pneg %p1110_p10 }
  0x2b   : > { %p1116_p0 = pnand %p1114_p13, %p1111_p11 }
  0x2d   : > { %1119 = shalt.err (!%p1116_p0)
}
  0x2e   : > { %s1120_s14 = scalar_lea.vmem %s219_s8, 32  ;;  %p1128_p7 = scmp.lt.s32.totalorder %s219_s8, %s219_s8 }
  0x2f   : > { %p1121_p3 = scmp.ne.s32.totalorder %s219_s8, %s1120_s14  ;;  %p1129_p12 = scmp.lt.s32.totalorder %s1120_s14, %s1120_s14 }
  0x31   : > { %p1123_p9 = pnand %p1121_p3, %p1482_p6  ;;  %p1130_p1 = por %p1129_p12, %p1128_p7 }
  0x33   : > { %p1124_p8 = pneg %p1123_p9 }
  0x35   : > { %p1131_p4 = pnand %p1130_p1, %p1124_p8 }
  0x37   : > { %1134 = shalt.err (!%p1131_p4)
}
  0x38   : > { %965 = dma.hbm_to_vmem [thread:$0]  (!%p1464_p2), %s1768_s1, 32, %s219_s8, [#allocation7]  }
  0x39   : > { %p1770_p3 = scmp.ne.s32.totalorder %s1767_s12, 0  ;;  %s1745_s26 = sand.u32 1, %s1329_s20  }
  0x3a   : > { %s883_s25 = sshll.u32 %s1745_s26, 8  ;;  %s936_s7 = sshll.u32 %s1337_s22, 7 }
  0x3b   : > { %s1802_s11 = smov (%p1770_p3, %s32_s11), 0  ;;  %s244_s14 = scalar_lea.vmem [#allocation9], %s883_s25 }
  0x3c   : > { %1771 = sst [smem:[#allocation20_spill]] %s1802_s11  ;;  %s107_s16 = ssub.s32 %s1337_s22, %s1802_s11 }
  0x3d   : > { %p108_p7 = scmp.eq.s32.totalorder %s107_s16, 0  ;;  %s251_s15 = sshll.u32 %s244_s14, 4  ;;  %s1518_s15 = int_to_ptr.vmem [resolvable:$true] %s251_s15 }
  0x3e   : > { %s1772_s17 = sadd.s32 1, %s1329_s20  ;;  %s1774_s3 = sld [smem:[#allocation23_spill]] }
  0x3f   : > { %s1511_s13 = scalar_select %p108_p7, %s1329_s20, %s1772_s17  }
  0x40   : > { %s1775_s12 = sand.u32 1, %s1341_s23   ;;  %p1776_p9 = scmp.ne.s32.totalorder %s1765_s9, 0 }
  0x41   : > { %1773 = sst [smem:[#allocation21_spill]] %s1511_s13  ;;  %s1522_s26 = scalar_lea.sflag [#allocation10], %s1775_s12 }
  0x42   : > { %p1749_p12 = pneg %p1776_p9 }
  0x44   : > { %s1516_s8 = scalar_lea.hbm %s1774_s3, %s936_s7  ;;  %s1140_s25 = scalar_lea.hbm %s1774_s3, 16384 }
  0x45   : > { %s1135_s16 = scalar_lea.hbm %s1516_s8, 4096  ;;  %p1141_p5 = scmp.lt.u32.totalorder %s1516_s8, %s1774_s3 }
  0x46   : > { %p1136_p8 = scmp.ne.s32.totalorder %s1516_s8, %s1135_s16  ;;  %p1142_p10 = scmp.lt.u32.totalorder %s1140_s25, %s1135_s16 }
  0x47   : > { %p1144_p13 = scmp.lt.u32.totalorder %s1135_s16, %s1516_s8 }
  0x48   : > { %p1138_p1 = pnand %p1749_p12, %p1136_p8  ;;  %p1143_p11 = por %p1142_p10, %p1141_p5 }
  0x4a   : > { %p1139_p4 = pneg %p1138_p1  ;;  %p1145_p0 = por %p1144_p13, %p1143_p11 }
  0x4c   : > { %p1146_p3 = pnand %p1145_p0, %p1139_p4 }
  0x4e   : > { %1149 = shalt.err (!%p1146_p3)
}
  0x4f   : > { %s1150_s17 = scalar_lea.vmem %s1518_s15, 4096  ;;  %s1344_s12 = smov [#allocation9]  }
  0x50   : > { %p1151_p7 = scmp.ne.s32.totalorder %s1518_s15, %s1150_s17  ;;  %s1155_s18 = sshll.u32 %s1344_s12, 4  ;;  %s1156_s18 = int_to_ptr.vmem [resolvable:$false] %s1155_s18 }
  0x51   : > { %s1157_s30 = scalar_lea.vmem %s1156_s18, 8192  ;;  %p1158_p2 = scmp.lt.s32.totalorder %s1518_s15, %s1156_s18 }
  0x52   : > { %p1153_p8 = pnand %p1151_p7, %p1749_p12  ;;  %p1159_p5 = scmp.lt.s32.totalorder %s1157_s30, %s1150_s17 }
  0x54   : > { %p1154_p1 = pneg %p1153_p8  ;;  %p1160_p10 = por %p1159_p5, %p1158_p2 }
  0x56   : > { %p1161_p11 = pnand %p1160_p10, %p1154_p1 }
  0x58   : > { %1164 = shalt.err (!%p1161_p11)
}
  0x59   : > { %s1345_s16 = smov 512   ;;  %s1346_s25 = smov 128  }
  0x5a   : > { %s1347_s7 = smov 8   ;;  %s1348_s14 = smov [#allocation3]  }
  0x5b   : > { %972 = dma.hbm_to_vmem [thread:$0]  (!%p1776_p9), %s1516_s8, 4096, %s1518_s15, %s1522_s26, %s1345_s16, %s1346_s25, %s1347_s7  }
  0x5c   : > { %s204_s1 = sshll.u32 %s1348_s14, 4  ;;  %s1165_s17 = scalar_lea.hbm %s1732_s0, 512  ;;  %s205_s1 = int_to_ptr.vmem [resolvable:$true] %s204_s1 }
  0x5d   : > { %p1166_p2 = scmp.ne.s32.totalorder %s1732_s0, %s1165_s17  ;;  %p1172_p0 = scmp.lt.u32.totalorder %s1165_s17, %s1732_s0 }
  0x5f   : > { %p1168_p4 = pnand %p1166_p2, %p1482_p6 }
  0x61   : > { %p1169_p13 = pneg %p1168_p4 }
  0x63   : > { %p1174_p3 = pnand %p1172_p0, %p1169_p13 }
  0x65   : > { %1177 = shalt.err (!%p1174_p3)
}
  0x66   : > { %s1178_s15 = scalar_lea.vmem %s205_s1, 512  ;;  %p1186_p5 = scmp.lt.s32.totalorder %s205_s1, %s205_s1 }
  0x67   : > { %p1179_p7 = scmp.ne.s32.totalorder %s205_s1, %s1178_s15  ;;  %p1187_p10 = scmp.lt.s32.totalorder %s1178_s15, %s1178_s15 }
  0x69   : > { %p1181_p8 = pnand %p1179_p7, %p1482_p6  ;;  %p1188_p11 = por %p1187_p10, %p1186_p5 }
  0x6b   : > { %p1182_p1 = pneg %p1181_p8 }
  0x6d   : > { %p1189_p12 = pnand %p1188_p11, %p1182_p1 }
  0x6f   : > { %1192 = shalt.err (!%p1189_p12)
}
  0x70   : > { %s1349_s3 = smov 256   ;;  %s1350_s11 = smov 16  }
  0x71   : > { %p1777_p2 = scmp.ne.s32.totalorder %s1766_s10, 0  ;;  %s1778_s16 = sand.u32 1, %s1329_s20  }
  0x72   : > { %s886_s25 = sshll.u32 %s1778_s16, 1  ;;  %s1351_s7 = smov [#allocation8]  }
  0x73   : > { %962 = dma.hbm_to_vmem [thread:$0]  (!%p1777_p2), %s1732_s0, 512, %s205_s1, [#allocation4], %s1349_s3, %s1349_s3, %s1350_s11  }
  0x74   : > { %s229_s14 = sshll.u32 %s1351_s7, 4  ;;  %s937_s12 = sshll.u32 %s1337_s22, 5  ;;  %s230_s14 = int_to_ptr.vmem [resolvable:$true] %s229_s14 }
  0x75   : > { %s1193_s30 = scalar_lea.hbm %s1734_s2, 32 }
  0x76   : > { %p1194_p12 = scmp.ne.s32.totalorder %s1734_s2, %s1193_s30  ;;  %p1200_p0 = scmp.lt.u32.totalorder %s1193_s30, %s1734_s2 }
  0x78   : > { %p1196_p4 = pnand %p1194_p12, %p1482_p6 }
  0x7a   : > { %p1197_p13 = pneg %p1196_p4 }
  0x7c   : > { %p1202_p3 = pnand %p1200_p0, %p1197_p13 }
  0x7e   : > { %1205 = shalt.err (!%p1202_p3)
}
  0x7f   : > { %s1206_s1 = scalar_lea.vmem %s230_s14, 32  ;;  %p1214_p5 = scmp.lt.s32.totalorder %s230_s14, %s230_s14 }
  0x80   : > { %p1207_p7 = scmp.ne.s32.totalorder %s230_s14, %s1206_s1  ;;  %p1215_p10 = scmp.lt.s32.totalorder %s1206_s1, %s1206_s1 }
  0x82   : > { %p1209_p8 = pnand %p1207_p7, %p1482_p6  ;;  %p1216_p11 = por %p1215_p10, %p1214_p5 }
  0x84   : > { %p1210_p1 = pneg %p1209_p8 }
  0x86   : > { %p1217_p9 = pnand %p1216_p11, %p1210_p1 }
  0x88   : > { %1220 = shalt.err (!%p1217_p9)
}
  0x89   : > { %968 = dma.hbm_to_vmem [thread:$0]  (!%p1777_p2), %s1734_s2, 32, %s230_s14, [#allocation7]  }
  0x8a   : > { %s1592_s8 = scalar_lea.hbm %s1736_s4, %s937_s12  ;;  %s265_s27 = scalar_lea.vmem [#allocation11], %s886_s25 }
  0x8b   : > { %s273_s16 = sshll.u32 %s265_s27, 4  ;;  %s1221_s7 = scalar_lea.hbm %s1592_s8, 32  ;;  %s274_s16 = int_to_ptr.vmem [resolvable:$true] %s273_s16 }
  0x8c   : > { %p1222_p6 = scmp.ne.s32.totalorder %s1592_s8, %s1221_s7  ;;  %p1779_p9 = scmp.ne.s32.totalorder %s1765_s9, 0 }
  0x8d   : > { %s1226_s17 = scalar_lea.hbm %s1736_s4, 128  ;;  %p1227_p2 = scmp.lt.u32.totalorder %s1592_s8, %s1736_s4 }
  0x8e   : > { %p1780_p12 = pneg %p1779_p9  ;;  %p1228_p0 = scmp.lt.u32.totalorder %s1226_s17, %s1221_s7 }
  0x8f   : > { %p1230_p7 = scmp.lt.u32.totalorder %s1221_s7, %s1592_s8 }
  0x90   : > { %p1224_p4 = pnand %p1222_p6, %p1780_p12  ;;  %p1229_p3 = por %p1228_p0, %p1227_p2 }
  0x92   : > { %p1225_p13 = pneg %p1224_p4  ;;  %p1231_p8 = por %p1230_p7, %p1229_p3 }
  0x94   : > { %p1232_p1 = pnand %p1231_p8, %p1225_p13 }
  0x96   : > { %1235 = shalt.err (!%p1232_p1)
}
  0x97   : > { %s1236_s25 = scalar_lea.vmem %s274_s16, 32  ;;  %p1781_p10 = pmov %p1780_p12 }
  0x98   : > { %p1237_p5 = scmp.ne.s32.totalorder %s274_s16, %s1236_s25  ;;  %s1352_s30 = smov [#allocation11]  }
  0x99   : > { %s1241_s15 = sshll.u32 %s1352_s30, 4  ;;  %s1242_s15 = int_to_ptr.vmem [resolvable:$false] %s1241_s15 }
  0x9a   : > { %p1239_p11 = pnand %p1237_p5, %p1781_p10  ;;  %s1243_s13 = scalar_lea.vmem %s1242_s15, 64 }
  0x9b   : > { %p1244_p12 = scmp.lt.s32.totalorder %s274_s16, %s1242_s15  ;;  %p1245_p4 = scmp.lt.s32.totalorder %s1243_s13, %s1236_s25 }
  0x9c   : > { %p1240_p6 = pneg %p1239_p11 }
  0x9d   : > { %p1246_p0 = por %p1245_p4, %p1244_p12 }
  0x9f   : > { %p1247_p2 = pnand %p1246_p0, %p1240_p6 }
  0xa1   : > { %1250 = shalt.err (!%p1247_p2)
}
  0xa2   : > { %975 = dma.hbm_to_vmem [thread:$0]  (!%p1779_p9), %s1592_s8, 32, %s274_s16, %s1522_s26  }
  0xa3   : > { %p1782_p13 = scmp.ne.s32.totalorder %s1764_s6, 0 }
  0xa4   : > { %p1783_p3 = scmp.eq.s32.totalorder (!%p1782_p13), %s1418_s24, 0 }
  0xa5   : > { %282 = sbr.rel (%p1782_p13) target bundleno = 832 (0x340), region = 40 }
  0xac   : > { %1304 = dma.done.wait (%p1783_p3), [#allocation4], 512   ;;  %p1784_p7 = pmov %p1783_p3 }
  0xad   : > { %p1785_p8 = pmov %p1783_p3 }
  0xae   : > { %1306 = vsyncadd (%p1784_p7), [#allocation4], 4294966784 }
  0xaf   : > { %1308 = dma.done.wait (%p1785_p8), [#allocation7], 64   ;;  %p1786_p1 = pmov %p1783_p3 }
  0xb0   : > { %s296_s9 = sand.u32 1, %s1418_s24   ;;  %s1626_s26 = sand.u32 1, %s1325_s19  }
  0xb1   : > { %1310 = vsyncadd (%p1786_p1), [#allocation7], 4294967232  ;;  %s893_s6 = sshll.u32 %s1626_s26, 8  ;;  %s297_s1 = scalar_lea.sflag [#allocation10], %s296_s9 }
  0xb2   : > { %s1629_s23 = scalar_lea.vmem [#allocation9], %s893_s6  ;;  %p1787_p9 = scmp.ne.s32.totalorder %s1760_s28, 0 }
  0xb4   : > { %1312 = dma.done.wait (%p1787_p9), %s297_s1, 4128  }
  0xb5   : > { %1314 = vsyncadd (%p1787_p9), %s297_s1, 4294963168  ;;  %s894_s3 = sshll.u32 %s1626_s26, 1  ;;  %s895_s5 = sshll.u32 %s1626_s26, 4 }
  0xb6   : > { %s1637_s11 = scalar_lea.vmem [#allocation11], %s894_s3  ;;  %s1639_s8 = scalar_lea.vmem [#allocation12], %s895_s5 }
  0xb7   : > { %p896_p5 = scmp.ne.s32.totalorder %s1333_s21, 0 }
  0xb8   : > { %v350_v0 = vld [vmem:[#allocation3] sm:$0xff] (!%p896_p5)  ;;  %v351_v1 = vld [vmem:[#allocation3 + $0x8] sm:$0xff] (!%p896_p5)  ;;  %v352_v2 = vld [vmem:[#allocation3 + $0x10] sm:$0xff] (!%p896_p5)  ;;  %v389_v23 = vlaneseq (!%p896_p5) }
  0xb9   : > { %349 = sbr.rel (%p896_p5) target bundleno = 507 (0x1fb), region = 64  ;;  %v354_v3 = vadd.f32 (!%p896_p5), %v351_v1, %v350_v0  ;;  %v353_v4 = vld [vmem:[#allocation3 + $0x18] sm:$0xff] (!%p896_p5)  ;;  %v387_v30 = vld [vmem:[#allocation6] sm:$0x3] (!%p896_p5)  ;;  %v403_v34 = vld [vmem:[#allocation8] sm:$0x3] (!%p896_p5) }
  0xba   : > { %v357_v5 = vadd.f32 (!%p896_p5), %v353_v4, %v352_v2  ;;  %v390_v27 = vshrl.u32 (!%p896_p5), %v389_v23, 7 }
  0xbb   : > { %355 = vadd.xlane.f32.xlu0 (!%p896_p5), %v354_v3 }
  0xbc   : > { %v391_v28 = vsub.s32 (!%p896_p5), 0, %v390_v27  ;;  %v395_v29 = vsub.s32 (!%p896_p5), 1, %v390_v27 }
  0xbe   : > { %v392_v32 = vrot.slane (!%p896_p5), %v387_v30, %v391_v28  ;;  %v396_v33 = vrot.slane (!%p896_p5), %v387_v30, %v395_v29  ;;  %v408_v38 = vrot.slane (!%p896_p5), %v403_v34, %v391_v28  ;;  %v412_v39 = vrot.slane (!%p896_p5), %v403_v34, %v395_v29 }
  0xbf   : > { %358 = vadd.xlane.f32.xlu0 (!%p896_p5), %v357_v5 }
 0x148   : > { %v356_v6 = vpop.xlane.xlu0 %355 }
 0x149   : > { %v361_v7 = vmul.f32 0.00390625, %v356_v6 }
 0x14b   : > { %v363_v8 = vsub.f32 %v350_v0, %v361_v7  ;;  %v364_v9 = vsub.f32 %v351_v1, %v361_v7 }
 0x14c   : > { %v359_v10 = vpop.xlane.xlu0 %358 }
 0x14d   : > { %v362_v11 = vmul.f32 0.00390625, %v359_v10  ;;  %v367_v12 = vmul.f32 %v363_v8, %v363_v8  ;;  %v368_v13 = vmul.f32 %v364_v9, %v364_v9 }
 0x14f   : > { %v365_v14 = vsub.f32 %v352_v2, %v362_v11  ;;  %v366_v15 = vsub.f32 %v353_v4, %v362_v11  ;;  %v371_v16 = vadd.f32 %v368_v13, %v367_v12 }
 0x151   : > { %372 = vadd.xlane.f32.xlu1 %v371_v16  ;;  %v369_v17 = vmul.f32 %v365_v14, %v365_v14  ;;  %v370_v18 = vmul.f32 %v366_v15, %v366_v15 }
 0x153   : > { %v374_v19 = vadd.f32 %v370_v18, %v369_v17 }
 0x155   : > { %375 = vadd.xlane.f32.xlu1 %v374_v19 }
 0x1de   : > { %v373_v20 = vpop.xlane.xlu1 %372 }
 0x1df   : > { %v377_v21 = vmul.f32 0.00390625, %v373_v20 }
 0x1e1   : > { %v379_v22 = vadd.f32 1e-05, %v377_v21 }
 0x1e2   : > { %v376_v24 = vpop.xlane.xlu1 %375 }
 0x1e3   : > { %1047 = vrsqrt.f32 %v379_v22  ;;  %v378_v25 = vmul.f32 0.00390625, %v376_v24 }
 0x1e5   : > { %v380_v26 = vadd.f32 1e-05, %v378_v25 }
 0x1e7   : > { %1049 = vrsqrt.f32 %v380_v26 }
 0x1ed   : > { %v1048_v31 = vpop.eup %1047 }
 0x1ee   : > { %v383_v35 = vmul.f32 %v1048_v31, %v363_v8  ;;  %v384_v36 = vmul.f32 %v1048_v31, %v364_v9 }
 0x1f0   : > { %v399_v40 = vmul.f32 %v392_v32, %v383_v35  ;;  %v400_v41 = vmul.f32 %v396_v33, %v384_v36 }
 0x1f1   : > { %v1050_v37 = vpop.eup %1049 }
 0x1f2   : > { %v385_v42 = vmul.f32 %v1050_v37, %v365_v14  ;;  %v386_v43 = vmul.f32 %v1050_v37, %v366_v15  ;;  %v415_v46 = vadd.f32 %v408_v38, %v399_v40  ;;  %v416_v47 = vadd.f32 %v412_v39, %v400_v41 }
 0x1f4   : > { %v401_v44 = vmul.f32 %v392_v32, %v385_v42  ;;  %v402_v45 = vmul.f32 %v396_v33, %v386_v43 }
 0x1f6   : > { %v417_v48 = vadd.f32 %v408_v38, %v401_v44  ;;  %v418_v49 = vadd.f32 %v412_v39, %v402_v45 }
 0x1f8   : > { %v419_v50 = vpack.c.bf16 %v417_v48, %v415_v46  ;;  %v420_v51 = vpack.c.bf16 %v418_v49, %v416_v47 }
 0x1fa   : > { %421 = vst [vmem:[#allocation2] sm:$0xff] %v419_v50  ;;  %422 = vst [vmem:[#allocation2 + $0x8] sm:$0xff] %v420_v51 }
 0x1fb PF: > { %v1051_v52 = vld [vmem:[%s1629_s23 + $0x4] ss:$8 sps:$4 sm:$0xff]   ;;  %v1053_v53 = vld [vmem:[%s1629_s23] ss:$8 sps:$4 sm:$0xff]   ;;  %v1054_v54 = vld [vmem:[%s1629_s23 + $0x14] ss:$8 sps:$4 sm:$0xff]   ;;  %v459_v22 = vlaneseq }
 0x1fc   : > { %629 = vmatprep.subr.bf16.mxu0 %v1051_v52  ;;  %v1056_v55 = vld [vmem:[%s1629_s23 + $0x10] ss:$8 sps:$4 sm:$0xff]   ;;  %v1057_v56 = vld [vmem:[%s1629_s23 + $0x24] ss:$8 sps:$4 sm:$0xff]   ;;  %v1059_v57 = vld [vmem:[%s1629_s23 + $0x20] ss:$8 sps:$4 sm:$0xff]  }
 0x1fd   : > { %630 = vmatpush1.bf16.msra.mxu0 %v1053_v53  ;;  %v1060_v58 = vld [vmem:[%s1629_s23 + $0x34] ss:$8 sps:$4 sm:$0xff]   ;;  %v1062_v59 = vld [vmem:[%s1629_s23 + $0x30] ss:$8 sps:$4 sm:$0xff]   ;;  %v1063_v60 = vld [vmem:[%s1629_s23 + $0x44] ss:$8 sps:$4 sm:$0xff]  }
 0x1fe   : > { %631 = vmatprep.subr.bf16.mxu0 %v1054_v54  ;;  %v1065_v61 = vld [vmem:[%s1629_s23 + $0x40] ss:$8 sps:$4 sm:$0xff]   ;;  %v1066_v62 = vld [vmem:[%s1629_s23 + $0x54] ss:$8 sps:$4 sm:$0xff]   ;;  %v1068_v63 = vld [vmem:[%s1629_s23 + $0x50] ss:$8 sps:$4 sm:$0xff]  }
 0x1ff   : > { %v1069_v0 = vld [vmem:[%s1629_s23 + $0x64] ss:$8 sps:$4 sm:$0xff]   ;;  %v1071_v2 = vld [vmem:[%s1629_s23 + $0x60] ss:$8 sps:$4 sm:$0xff]   ;;  %v1072_v3 = vld [vmem:[%s1629_s23 + $0x74] ss:$8 sps:$4 sm:$0xff]  }
 0x200   : > { %v1074_v4 = vld [vmem:[%s1629_s23 + $0x70] ss:$8 sps:$4 sm:$0xff]   ;;  %v1075_v5 = vld [vmem:[%s1629_s23 + $0x84] ss:$8 sps:$4 sm:$0xff]   ;;  %v1077_v6 = vld [vmem:[%s1629_s23 + $0x80] ss:$8 sps:$4 sm:$0xff]  }
 0x201   : > { %632 = vmatpush1.bf16.msra.mxu0 %v1056_v55  ;;  %v424_v1 = vld [vmem:[#allocation2 + $0x8] sm:$0xff]  ;;  %v1081_v9 = vld [vmem:[%s1629_s23 + $0xa4] ss:$8 sps:$4 sm:$0xff]   ;;  %v1083_v10 = vld [vmem:[%s1629_s23 + $0xa0] ss:$8 sps:$4 sm:$0xff]   ;;  %v460_v23 = vshrl.u32 %v459_v22, 7 }
 0x202   : > { %633 = vmatprep.subr.bf16.mxu0 %v1057_v56  ;;  %661 = vmatprep.mubr.bf16.mxu0 %v424_v1  ;;  %v1078_v7 = vld [vmem:[%s1629_s23 + $0x94] ss:$8 sps:$4 sm:$0xff]   ;;  %v1080_v8 = vld [vmem:[%s1629_s23 + $0x90] ss:$8 sps:$4 sm:$0xff]   ;;  %v1087_v13 = vld [vmem:[%s1629_s23 + $0xc4] ss:$8 sps:$4 sm:$0xff]  }
 0x203   : > { %v1084_v11 = vld [vmem:[%s1629_s23 + $0xb4] ss:$8 sps:$4 sm:$0xff]   ;;  %v1086_v12 = vld [vmem:[%s1629_s23 + $0xb0] ss:$8 sps:$4 sm:$0xff]   ;;  %v1089_v14 = vld [vmem:[%s1629_s23 + $0xc0] ss:$8 sps:$4 sm:$0xff]  }
 0x204   : > { %v1090_v15 = vld [vmem:[%s1629_s23 + $0xd4] ss:$8 sps:$4 sm:$0xff]   ;;  %v1092_v16 = vld [vmem:[%s1629_s23 + $0xd0] ss:$8 sps:$4 sm:$0xff]   ;;  %v1093_v17 = vld [vmem:[%s1629_s23 + $0xe4] ss:$8 sps:$4 sm:$0xff]  }
 0x205   : > { %634 = vmatpush1.bf16.msra.mxu0 %v1059_v57  ;;  %v1095_v18 = vld [vmem:[%s1629_s23 + $0xe0] ss:$8 sps:$4 sm:$0xff]   ;;  %v1096_v19 = vld [vmem:[%s1629_s23 + $0xf4] ss:$8 sps:$4 sm:$0xff]   ;;  %v1098_v20 = vld [vmem:[%s1629_s23 + $0xf0] ss:$8 sps:$4 sm:$0xff]  }
 0x206   : > { %635 = vmatprep.subr.bf16.mxu0 %v1060_v58  ;;  %v423_v21 = vld [vmem:[#allocation2] sm:$0xff]  ;;  %v461_v24 = vsub.s32 0, %v460_v23  ;;  %v457_v25 = vld [vmem:[%s1637_s11] sm:$0x3]  ;;  %v465_v26 = vsub.s32 1, %v460_v23  ;;  %s940_s24 = sshll.u32 %s1333_s21, 7 }
 0x207   : > { %s739_s28 = sshll.u32 %s1639_s8, 4  ;;  %s1788_s7 = sld [smem:[#allocation24_spill]]  ;;  %s1682_s28 = int_to_ptr.vmem [resolvable:$true] %s739_s28 }
 0x208   : > { %v462_v27 = vrot.slane %v457_v25, %v461_v24  ;;  %v466_v28 = vrot.slane %v457_v25, %v465_v26  ;;  %s723_s21 = scalar_lea.sflag [#allocation5], %s1626_s26  ;;  %s1251_s14 = scalar_lea.vmem %s1682_s28, 256 }
 0x209   : > { %636 = vmatpush1.bf16.msra.mxu0 %v1062_v59  ;;  %p1252_p10 = scmp.ne.s32.totalorder %s1682_s28, %s1251_s14  ;;  %p1789_p11 = scmp.ne.s32.totalorder %s1761_s29, 0 }
 0x20a   : > { %637 = vmatprep.subr.bf16.mxu0 %v1063_v60  ;;  %s1353_s17 = smov [#allocation12]  }
 0x20b   : > { %p1253_p6 = pnand %p1252_p10, %p1789_p11  ;;  %s1255_s18 = sshll.u32 %s1353_s17, 4  ;;  %s1256_s18 = int_to_ptr.vmem [resolvable:$false] %s1255_s18 }
 0x20c   : > { %s1257_s12 = scalar_lea.vmem %s1256_s18, 512  ;;  %p1258_p4 = scmp.lt.s32.totalorder %s1682_s28, %s1256_s18 }
 0x20d   : > { %638 = vmatpush1.bf16.msra.mxu0 %v1065_v61  ;;  %s1680_s10 = scalar_lea.hbm %s1788_s7, %s940_s24  ;;  %p1254_p12 = pneg %p1253_p6 }
 0x20e   : > { %639 = vmatprep.subr.bf16.mxu0 %v1066_v62  ;;  %p1259_p0 = scmp.lt.s32.totalorder %s1257_s12, %s1251_s14 }
 0x210   : > { %p1260_p2 = por %p1259_p0, %p1258_p4 }
 0x211   : > { %640 = vmatpush1.bf16.msra.mxu0 %v1068_v63 }
 0x212   : > { %641 = vmatprep.subr.bf16.mxu0 %v1069_v0  ;;  %p1261_p13 = pnand %p1260_p2, %p1254_p12 }
 0x215   : > { %642 = vmatpush1.bf16.msra.mxu0 %v1071_v2 }
 0x216   : > { %643 = vmatprep.subr.bf16.mxu0 %v1072_v3 }
 0x219   : > { %644 = vmatpush1.bf16.msra.mxu0 %v1074_v4 }
 0x21a   : > { %645 = vmatprep.subr.bf16.mxu0 %v1075_v5 }
 0x21d   : > { %646 = vmatpush1.bf16.msra.mxu0 %v1077_v6 }
 0x21e   : > { %647 = vmatprep.subr.bf16.mxu0 %v1078_v7 }
 0x221   : > { %648 = vmatpush1.bf16.msra.mxu0 %v1080_v8 }
 0x222   : > { %649 = vmatprep.subr.bf16.mxu0 %v1081_v9 }
 0x225   : > { %650 = vmatpush1.bf16.msra.mxu0 %v1083_v10 }
 0x226   : > { %651 = vmatprep.subr.bf16.mxu0 %v1084_v11 }
 0x229   : > { %652 = vmatpush1.bf16.msra.mxu0 %v1086_v12 }
 0x22a   : > { %653 = vmatprep.subr.bf16.mxu0 %v1087_v13 }
 0x22d   : > { %654 = vmatpush1.bf16.msra.mxu0 %v1089_v14 }
 0x22e   : > { %655 = vmatprep.subr.bf16.mxu0 %v1090_v15 }
 0x231   : > { %656 = vmatpush1.bf16.msra.mxu0 %v1092_v16 }
 0x232   : > { %657 = vmatprep.subr.bf16.mxu0 %v1093_v17 }
 0x235   : > { %658 = vmatpush1.bf16.msra.mxu0 %v1095_v18 }
 0x236   : > { %659 = vmatprep.subr.bf16.mxu0 %v1096_v19 }
 0x239   : > { %660 = vmatpush1.bf16.msra.mxu0 %v1098_v20 }
 0x23c   : > { %662 = vmatmul.mubr.bf16.vlgmr.msra.gmra.mrb[0].mxu0 %v423_v21 }
 0x30f   : > { %v663_v29 = vpop.f32.mrb[0].mxu0 }
 0x310   : > { %v664_v30 = vadd.f32 %v663_v29, %v462_v27  ;;  %v665_v31 = vpop.f32.mrb[1].mxu0 }
 0x311   : > { %v666_v32 = vadd.f32 %v665_v31, %v466_v28  ;;  %v667_v33 = vpop.f32.mrb[2].mxu0 }
 0x312   : > { %v676_v34 = vmul.f32 0.044715, %v664_v30  ;;  %v668_v35 = vadd.f32 %v667_v33, %v462_v27  ;;  %v669_v36 = vpop.f32.mrb[3].mxu0  ;;  %v672_v59 = vmul.f32 0.5, %v664_v30 }
 0x313   : > { %v677_v37 = vmul.f32 0.044715, %v666_v32  ;;  %v670_v38 = vadd.f32 %v669_v36, %v466_v28  ;;  %v673_v62 = vmul.f32 0.5, %v666_v32 }
 0x314   : > { %v680_v39 = vmul.f32 %v676_v34, %v664_v30  ;;  %v678_v40 = vmul.f32 0.044715, %v668_v35  ;;  %v674_v2 = vmul.f32 0.5, %v668_v35 }
 0x315   : > { %v681_v41 = vmul.f32 %v677_v37, %v666_v32  ;;  %v679_v42 = vmul.f32 0.044715, %v670_v38  ;;  %v675_v5 = vmul.f32 0.5, %v670_v38 }
 0x316   : > { %v684_v43 = vmul.f32 %v680_v39, %v664_v30  ;;  %v682_v44 = vmul.f32 %v678_v40, %v668_v35 }
 0x317   : > { %v685_v45 = vmul.f32 %v681_v41, %v666_v32  ;;  %v683_v46 = vmul.f32 %v679_v42, %v670_v38 }
 0x318   : > { %v688_v47 = vadd.f32 %v684_v43, %v664_v30  ;;  %v686_v48 = vmul.f32 %v682_v44, %v668_v35 }
 0x319   : > { %v689_v49 = vadd.f32 %v685_v45, %v666_v32  ;;  %v687_v50 = vmul.f32 %v683_v46, %v670_v38 }
 0x31a   : > { %v692_v51 = vmul.f32 0.7978846, %v688_v47  ;;  %v690_v52 = vadd.f32 %v686_v48, %v668_v35 }
 0x31b   : > { %v693_v53 = vmul.f32 0.7978846, %v689_v49  ;;  %v691_v54 = vadd.f32 %v687_v50, %v670_v38 }
 0x31c   : > { %1099 = vtanh.f32 %v692_v51  ;;  %v694_v55 = vmul.f32 0.7978846, %v690_v52 }
 0x31d   : > { %1101 = vtanh.f32 %v693_v53  ;;  %v695_v56 = vmul.f32 0.7978846, %v691_v54 }
 0x31e   : > { %1103 = vtanh.f32 %v694_v55 }
 0x31f   : > { %1105 = vtanh.f32 %v695_v56 }
 0x326   : > { %v1100_v57 = vpop.eup %1099 }
 0x327   : > { %v1102_v58 = vpop.eup %1101  ;;  %v700_v60 = vadd.f32 1.0, %v1100_v57 }
 0x328   : > { %v1104_v61 = vpop.eup %1103  ;;  %v701_v63 = vadd.f32 1.0, %v1102_v58 }
 0x329   : > { %v1106_v0 = vpop.eup %1105  ;;  %v704_v1 = vmul.f32 %v700_v60, %v672_v59  ;;  %v702_v3 = vadd.f32 1.0, %v1104_v61 }
 0x32a   : > { %v705_v4 = vmul.f32 %v701_v63, %v673_v62  ;;  %v703_v6 = vadd.f32 1.0, %v1106_v0 }
 0x32b   : > { %v706_v7 = vmul.f32 %v702_v3, %v674_v2 }
 0x32c   : > { %v707_v8 = vmul.f32 %v703_v6, %v675_v5  ;;  %v938_v9 = vpack.c.bf16 %v705_v4, %v704_v1 }
 0x32e   : > { %v939_v10 = vpack.c.bf16 %v707_v8, %v706_v7  ;;  %720 = vst [vmem:[%s1639_s8] sm:$0xff] %v938_v9 }
 0x330   : > { %721 = vst [vmem:[%s1639_s8 + $0x8] sm:$0xff] %v939_v10 }
 0x331   : > { %1264 = shalt.err (!%p1261_p13)
}
 0x332   : > { %s1265_s25 = scalar_lea.hbm %s1680_s10, 256  ;;  %s1269_s13 = scalar_lea.hbm %s1788_s7, 1024 }
 0x333   : > { %p1266_p3 = scmp.ne.s32.totalorder %s1680_s10, %s1265_s25  ;;  %p1270_p1 = scmp.lt.u32.totalorder %s1680_s10, %s1788_s7 }
 0x334   : > { %p1271_p9 = scmp.lt.u32.totalorder %s1269_s13, %s1265_s25  ;;  %p1273_p10 = scmp.lt.u32.totalorder %s1265_s25, %s1680_s10 }
 0x335   : > { %p1267_p7 = pnand %p1266_p3, %p1789_p11 }
 0x336   : > { %p1272_p5 = por %p1271_p9, %p1270_p1 }
 0x337   : > { %p1268_p8 = pneg %p1267_p7 }
 0x338   : > { %p1274_p6 = por %p1273_p10, %p1272_p5 }
 0x33a   : > { %p1275_p12 = pnand %p1274_p6, %p1268_p8 }
 0x33c   : > { %1278 = shalt.err (!%p1275_p12)
}
 0x33d   : > { %s1354_s1 = smov 128   ;;  %s1355_s23 = smov 512  }
 0x33e   : > { %s1356_s3 = smov 8  }
 0x33f   : > { %957 = dma.vmem_to_hbm [thread:$0]  (%p1789_p11), %s1682_s28, 256, %s1680_s10, %s723_s21, %s1354_s1, %s1355_s23, %s1356_s3  }
 0x340 PF: > { %s1790_s5 = sld [smem:[#allocation18_spill]]  ;;  %s1791_s11 = sld [smem:[#allocation17_spill]] }
 0x341   : > { %s1792_s8 = sld [smem:[#allocation19_spill]] }
 0x346   : > { %p987_p4 = scmp.ge.s32.totalorder %s1790_s5, 2  ;;  %s754_s24 = sand.u32 1, %s1791_s11  }
 0x347   : > { %p1793_p0 = scmp.ne.s32.totalorder %s1792_s8, 0  ;;  %s755_s27 = scalar_lea.sflag [#allocation5], %s754_s24 }
 0x349   : > { %p977_p2 = pnand %p987_p4, %p1793_p0 }
 0x34b   : > { %1316 = dma.done.wait (!%p977_p2), %s755_s27, 256  }
 0x34c   : > { %1318 = vsyncadd (!%p977_p2), %s755_s27, 4294967040  ;;  %s23_s23 = sadd.s32 1, %s1790_s5   ;;  %s1794_s16 = sld [smem:[#allocation21_spill]] }
 0x34d   : > { %p20_p13 = scmp.ge.s32.totalorder %s23_s23, 6   ;;  %s1795_s29 = sld [smem:[#allocation20_spill]] }
 0x34e   : > { %s1796_s18 = smov %s1325_s19  ;;  %s1797_s19 = smov %s1329_s20 }
 0x34f   : > { %s1799_s21 = smov %s1337_s22  ;;  %22 = sbr.rel (!%p20_p13) target bundleno = 12 (0xc), region = 114 }
 0x352   : > { %s1798_s20 = smov %s1794_s16 }
 0x353   : > { %s1800_s22 = smov %s1795_s29 }
 0x356   :  { %760 = vsyncpa [#allocation4], 1 }
 0x357   :  { %762 = vsyncpa [#allocation4 + $0x1], 1 }
 0x358   :  { %763 = vsyncpa [#allocation7], 1 }
 0x359   :  { %764 = vsyncpa [#allocation10], 1 }
 0x35a   :  { %766 = vsyncpa [#allocation10 + $0x1], 1 }
 0x35b   :  { %767 = vsyncpa [#allocation5], 1 }
 0x35c   :  { %769 = vsyncpa [#allocation5 + $0x1], 1 }

// kernel: lora_gpt_neo_forward.13
= control target key start
LH: loop header
LB: loop body
LE: loop exit
PB: predicated region body
PF: predicated region fallthrough
CT: control target
= control target key end

     0   :  { %9 = vsyncpa [#allocation4], 0  ;;  %s718_s0 = inlined_call_operand.hbm [shape: bf16[16,256], index: 0, kind: input, shape index: {}]   ;;  %s719_s1 = inlined_call_operand.hbm [shape: bf16[256,256], index: 1, kind: input, shape index: {}]   ;;  %s720_s2 = inlined_call_operand.hbm [shape: f32[1,256], index: 2, kind: input, shape index: {}]   ;;  %s721_s3 = inlined_call_operand.hbm [shape: f32[16,256], index: 3, kind: input, shape index: {}]   ;;  %s722_s4 = inlined_call_operand.hbm [shape: f32[16,256], index: 4, kind: output, shape index: {}]  }
   0x1   :  { %10 = vsyncpa [#allocation7], 0 }
   0x2   :  { %11 = vsyncpa [#allocation10], 0 }
   0x3   :  { %12 = vsyncpa [#allocation5], 0  ;;  %s604_s15 = smov [#allocation6]   ;;  %s605_s17 = smov [#allocation3]  }
   0x4   :  { %s30_s16 = sshll.u32 %s604_s15, 4  ;;  %s18_s18 = sshll.u32 %s605_s17, 4  ;;  %s31_s16 = int_to_ptr.vmem [resolvable:$true] %s30_s16  ;;  %s638_s18 = int_to_ptr.vmem [resolvable:$true] %s18_s18 }
   0x5   :  { %s486_s21 = scalar_lea.hbm %s719_s1, 4096 }
   0x6   :  { %p487_p0 = scmp.ne.s32.totalorder %s719_s1, %s486_s21  ;;  %p490_p1 = scmp.lt.u32.totalorder %s486_s21, %s719_s1 }
   0x8   :  { %p492_p2 = pnand %p490_p1, %p487_p0 }
   0xa   :  { %495 = shalt.err (!%p492_p2)
}
   0xb   :  { %s496_s26 = scalar_lea.vmem %s31_s16, 4096  ;;  %p501_p4 = scmp.lt.s32.totalorder %s31_s16, %s31_s16 }
   0xc   :  { %p497_p3 = scmp.ne.s32.totalorder %s31_s16, %s496_s26  ;;  %p502_p5 = scmp.lt.s32.totalorder %s496_s26, %s496_s26 }
   0xe   :  { %p503_p6 = por %p502_p5, %p501_p4 }
  0x10   :  { %p504_p7 = pnand %p503_p6, %p497_p3 }
  0x12   :  { %507 = shalt.err (!%p504_p7)
}
  0x13   :  { %s606_s27 = smov 128   ;;  %s607_s28 = smov 8  }
  0x14   :  { %36 = dma.hbm_to_vmem [thread:$0]  %s719_s1, 4096, %s31_s16, [#allocation7], %s606_s27, %s606_s27, %s607_s28  }
  0x15   :  { %s508_s7 = scalar_lea.hbm %s718_s0, 256 }
  0x16   :  { %p509_p8 = scmp.ne.s32.totalorder %s718_s0, %s508_s7  ;;  %p512_p9 = scmp.lt.u32.totalorder %s508_s7, %s718_s0 }
  0x18   :  { %p514_p10 = pnand %p512_p9, %p509_p8 }
  0x1a   :  { %517 = shalt.err (!%p514_p10)
}
  0x1b   :  { %s518_s12 = scalar_lea.vmem %s638_s18, 256  ;;  %p523_p12 = scmp.lt.s32.totalorder %s638_s18, %s638_s18 }
  0x1c   :  { %p519_p11 = scmp.ne.s32.totalorder %s638_s18, %s518_s12  ;;  %p524_p13 = scmp.lt.s32.totalorder %s518_s12, %s518_s12 }
  0x1e   :  { %p525_p0 = por %p524_p13, %p523_p12 }
  0x20   :  { %p526_p1 = pnand %p525_p0, %p519_p11 }
  0x22   :  { %529 = shalt.err (!%p526_p1)
}
  0x23   :  { %24 = dma.hbm_to_vmem [thread:$0]  %s718_s0, 256, %s638_s18, [#allocation4], %s606_s27, %s606_s27, %s607_s28  }
  0x24   :  { %s608_s14 = smov [#allocation8]   ;;  %s609_s16 = smov [#allocation9]  }
  0x25   :  { %s43_s15 = sshll.u32 %s608_s14, 4  ;;  %s52_s17 = sshll.u32 %s609_s16, 4  ;;  %s44_s15 = int_to_ptr.vmem [resolvable:$true] %s43_s15  ;;  %s669_s17 = int_to_ptr.vmem [resolvable:$true] %s52_s17 }
  0x26   :  { %s530_s21 = scalar_lea.hbm %s720_s2, 32 }
  0x27   :  { %p531_p2 = scmp.ne.s32.totalorder %s720_s2, %s530_s21  ;;  %p534_p3 = scmp.lt.u32.totalorder %s530_s21, %s720_s2 }
  0x29   :  { %p536_p4 = pnand %p534_p3, %p531_p2 }
  0x2b   :  { %539 = shalt.err (!%p536_p4)
}
  0x2c   :  { %s540_s0 = scalar_lea.vmem %s44_s15, 32  ;;  %p545_p6 = scmp.lt.s32.totalorder %s44_s15, %s44_s15 }
  0x2d   :  { %p541_p5 = scmp.ne.s32.totalorder %s44_s15, %s540_s0  ;;  %p546_p7 = scmp.lt.s32.totalorder %s540_s0, %s540_s0 }
  0x2f   :  { %p547_p8 = por %p546_p7, %p545_p6 }
  0x31   :  { %p548_p9 = pnand %p547_p8, %p541_p5 }
  0x33   :  { %551 = shalt.err (!%p548_p9)
}
  0x34   :  { %46 = dma.hbm_to_vmem [thread:$0]  %s720_s2, 32, %s44_s15, [#allocation7]  }
  0x35   :  { %s552_s29 = scalar_lea.hbm %s721_s3, 512 }
  0x36   :  { %p553_p10 = scmp.ne.s32.totalorder %s721_s3, %s552_s29  ;;  %p556_p11 = scmp.lt.u32.totalorder %s552_s29, %s721_s3 }
  0x38   :  { %p558_p12 = pnand %p556_p11, %p553_p10 }
  0x3a   :  { %561 = shalt.err (!%p558_p12)
}
  0x3b   :  { %s562_s8 = scalar_lea.vmem %s669_s17, 512  ;;  %p567_p0 = scmp.lt.s32.totalorder %s669_s17, %s669_s17 }
  0x3c   :  { %p563_p13 = scmp.ne.s32.totalorder %s669_s17, %s562_s8  ;;  %p568_p1 = scmp.lt.s32.totalorder %s562_s8, %s562_s8 }
  0x3e   :  { %p569_p2 = por %p568_p1, %p567_p0 }
  0x40   :  { %p570_p3 = pnand %p569_p2, %p563_p13 }
  0x42   :  { %573 = shalt.err (!%p570_p3)
}
  0x43   :  { %s610_s2 = smov 256   ;;  %s611_s9 = smov 16  }
  0x44   :  { %58 = dma.hbm_to_vmem [thread:$0]  %s721_s3, 512, %s669_s17, [#allocation10], %s610_s2, %s610_s2, %s611_s9  }
  0x45   :  { %596 = dma.done.wait [#allocation4], 256  }
  0x46   :  { %597 = vsyncadd [#allocation4], 4294967040 }
  0x47   :  { %598 = dma.done.wait [#allocation7], 4128  }
  0x48   :  { %599 = vsyncadd [#allocation7], 4294963168 }
  0x49   :  { %600 = dma.done.wait [#allocation10], 512  }
  0x4a   :  { %601 = vsyncadd [#allocation10], 4294966784  ;;  %v435_v0 = vld [vmem:[#allocation6 + $0x4] ss:$8 sps:$4 sm:$0xff]   ;;  %v437_v1 = vld [vmem:[#allocation6] ss:$8 sps:$4 sm:$0xff]   ;;  %v347_v34 = vlaneseq }
  0x4b   :  { %287 = vmatprep.subr.bf16.mxu0 %v435_v0  ;;  %v438_v2 = vld [vmem:[#allocation6 + $0x14] ss:$8 sps:$4 sm:$0xff]   ;;  %v440_v3 = vld [vmem:[#allocation6 + $0x10] ss:$8 sps:$4 sm:$0xff]   ;;  %v441_v4 = vld [vmem:[#allocation6 + $0x24] ss:$8 sps:$4 sm:$0xff]  }
  0x4c   :  { %288 = vmatpush1.bf16.msra.mxu0 %v437_v1  ;;  %v443_v5 = vld [vmem:[#allocation6 + $0x20] ss:$8 sps:$4 sm:$0xff]   ;;  %v444_v6 = vld [vmem:[#allocation6 + $0x34] ss:$8 sps:$4 sm:$0xff]   ;;  %v446_v7 = vld [vmem:[#allocation6 + $0x30] ss:$8 sps:$4 sm:$0xff]  }
  0x4d   :  { %289 = vmatprep.subr.bf16.mxu0 %v438_v2  ;;  %v447_v8 = vld [vmem:[#allocation6 + $0x44] ss:$8 sps:$4 sm:$0xff]   ;;  %v449_v9 = vld [vmem:[#allocation6 + $0x40] ss:$8 sps:$4 sm:$0xff]   ;;  %v450_v10 = vld [vmem:[#allocation6 + $0x54] ss:$8 sps:$4 sm:$0xff]  }
  0x4e   :  { %v452_v11 = vld [vmem:[#allocation6 + $0x50] ss:$8 sps:$4 sm:$0xff]   ;;  %v453_v12 = vld [vmem:[#allocation6 + $0x64] ss:$8 sps:$4 sm:$0xff]   ;;  %v485_v13 = vld [vmem:[#allocation3 + $0x4] ss:$8 sps:$4 sm:$0xff]  }
  0x4f   :  { %v455_v14 = vld [vmem:[#allocation6 + $0x60] ss:$8 sps:$4 sm:$0xff]   ;;  %v456_v15 = vld [vmem:[#allocation6 + $0x74] ss:$8 sps:$4 sm:$0xff]   ;;  %319 = vmatprep.mubr.bf16.mxu0 %v485_v13  ;;  %v458_v16 = vld [vmem:[#allocation6 + $0x70] ss:$8 sps:$4 sm:$0xff]  }
  0x50   :  { %290 = vmatpush1.bf16.msra.mxu0 %v440_v3  ;;  %v459_v17 = vld [vmem:[#allocation6 + $0x84] ss:$8 sps:$4 sm:$0xff]   ;;  %v461_v18 = vld [vmem:[#allocation6 + $0x80] ss:$8 sps:$4 sm:$0xff]   ;;  %v462_v19 = vld [vmem:[#allocation6 + $0x94] ss:$8 sps:$4 sm:$0xff]  }
  0x51   :  { %291 = vmatprep.subr.bf16.mxu0 %v441_v4  ;;  %v464_v20 = vld [vmem:[#allocation6 + $0x90] ss:$8 sps:$4 sm:$0xff]   ;;  %v465_v21 = vld [vmem:[#allocation6 + $0xa4] ss:$8 sps:$4 sm:$0xff]   ;;  %v467_v22 = vld [vmem:[#allocation6 + $0xa0] ss:$8 sps:$4 sm:$0xff]  }
  0x52   :  { %v468_v23 = vld [vmem:[#allocation6 + $0xb4] ss:$8 sps:$4 sm:$0xff]   ;;  %v470_v24 = vld [vmem:[#allocation6 + $0xb0] ss:$8 sps:$4 sm:$0xff]   ;;  %v471_v25 = vld [vmem:[#allocation6 + $0xc4] ss:$8 sps:$4 sm:$0xff]  }
  0x53   :  { %v473_v26 = vld [vmem:[#allocation6 + $0xc0] ss:$8 sps:$4 sm:$0xff]   ;;  %v474_v27 = vld [vmem:[#allocation6 + $0xd4] ss:$8 sps:$4 sm:$0xff]   ;;  %v476_v28 = vld [vmem:[#allocation6 + $0xd0] ss:$8 sps:$4 sm:$0xff]  }
  0x54   :  { %292 = vmatpush1.bf16.msra.mxu0 %v443_v5  ;;  %v477_v29 = vld [vmem:[#allocation6 + $0xe4] ss:$8 sps:$4 sm:$0xff]   ;;  %v479_v30 = vld [vmem:[#allocation6 + $0xe0] ss:$8 sps:$4 sm:$0xff]   ;;  %v480_v31 = vld [vmem:[#allocation6 + $0xf4] ss:$8 sps:$4 sm:$0xff]  }
  0x55   :  { %293 = vmatprep.subr.bf16.mxu0 %v444_v6  ;;  %v482_v32 = vld [vmem:[#allocation6 + $0xf0] ss:$8 sps:$4 sm:$0xff]   ;;  %v348_v35 = vshrl.u32 %v347_v34, 7  ;;  %v345_v37 = vld [vmem:[#allocation8] sm:$0x3]  ;;  %v361_v42 = vld [vmem:[#allocation9] sm:$0xff] }
  0x56   :  { %v483_v33 = vld [vmem:[#allocation3] ss:$8 sps:$4 sm:$0xff]   ;;  %s612_s3 = smov [#allocation11]  }
  0x57   :  { %v349_v36 = vsub.s32 0, %v348_v35  ;;  %v353_v38 = vsub.s32 1, %v348_v35  ;;  %v362_v45 = vld [vmem:[#allocation9 + $0x8] sm:$0xff]  ;;  %v363_v48 = vld [vmem:[#allocation9 + $0x10] sm:$0xff]  ;;  %v364_v52 = vld [vmem:[#allocation9 + $0x18] sm:$0xff]  ;;  %s378_s12 = sshll.u32 %s612_s3, 4  ;;  %s379_s12 = int_to_ptr.vmem [resolvable:$true] %s378_s12 }
  0x58   :  { %294 = vmatpush1.bf16.msra.mxu0 %v446_v7  ;;  %s574_s1 = scalar_lea.vmem %s379_s12, 512  ;;  %p579_p5 = scmp.lt.s32.totalorder %s379_s12, %s379_s12 }
  0x59   :  { %295 = vmatprep.subr.bf16.mxu0 %v447_v8  ;;  %v350_v39 = vrot.slane %v345_v37, %v349_v36  ;;  %v354_v40 = vrot.slane %v345_v37, %v353_v38  ;;  %p575_p4 = scmp.ne.s32.totalorder %s379_s12, %s574_s1  ;;  %p580_p6 = scmp.lt.s32.totalorder %s574_s1, %s574_s1 }
  0x5b   :  { %p581_p7 = por %p580_p6, %p579_p5 }
  0x5c   :  { %296 = vmatpush1.bf16.msra.mxu0 %v449_v9 }
  0x5d   :  { %297 = vmatprep.subr.bf16.mxu0 %v450_v10  ;;  %p582_p8 = pnand %p581_p7, %p575_p4 }
  0x60   :  { %298 = vmatpush1.bf16.msra.mxu0 %v452_v11 }
  0x61   :  { %299 = vmatprep.subr.bf16.mxu0 %v453_v12 }
  0x64   :  { %300 = vmatpush1.bf16.msra.mxu0 %v455_v14 }
  0x65   :  { %301 = vmatprep.subr.bf16.mxu0 %v456_v15 }
  0x68   :  { %302 = vmatpush1.bf16.msra.mxu0 %v458_v16 }
  0x69   :  { %303 = vmatprep.subr.bf16.mxu0 %v459_v17 }
  0x6c   :  { %304 = vmatpush1.bf16.msra.mxu0 %v461_v18 }
  0x6d   :  { %305 = vmatprep.subr.bf16.mxu0 %v462_v19 }
  0x70   :  { %306 = vmatpush1.bf16.msra.mxu0 %v464_v20 }
  0x71   :  { %307 = vmatprep.subr.bf16.mxu0 %v465_v21 }
  0x74   :  { %308 = vmatpush1.bf16.msra.mxu0 %v467_v22 }
  0x75   :  { %309 = vmatprep.subr.bf16.mxu0 %v468_v23 }
  0x78   :  { %310 = vmatpush1.bf16.msra.mxu0 %v470_v24 }
  0x79   :  { %311 = vmatprep.subr.bf16.mxu0 %v471_v25 }
  0x7c   :  { %312 = vmatpush1.bf16.msra.mxu0 %v473_v26 }
  0x7d   :  { %313 = vmatprep.subr.bf16.mxu0 %v474_v27 }
  0x80   :  { %314 = vmatpush1.bf16.msra.mxu0 %v476_v28 }
  0x81   :  { %315 = vmatprep.subr.bf16.mxu0 %v477_v29 }
  0x84   :  { %316 = vmatpush1.bf16.msra.mxu0 %v479_v30 }
  0x85   :  { %317 = vmatprep.subr.bf16.mxu0 %v480_v31 }
  0x88   :  { %318 = vmatpush1.bf16.msra.mxu0 %v482_v32 }
  0x8b   :  { %320 = vmatmul.mubr.bf16.vlgmr.msra.gmra.mrb[0].mxu0 %v483_v33 }
 0x15e   :  { %v321_v41 = vpop.f32.mrb[0].mxu0 }
 0x15f   :  { %v357_v43 = vadd.f32 %v350_v39, %v321_v41  ;;  %v323_v44 = vpop.f32.mrb[1].mxu0 }
 0x160   :  { %v358_v46 = vadd.f32 %v354_v40, %v323_v44  ;;  %v325_v47 = vpop.f32.mrb[2].mxu0 }
 0x161   :  { %v365_v49 = vadd.f32 %v361_v42, %v357_v43  ;;  %v359_v50 = vadd.f32 %v350_v39, %v325_v47  ;;  %v327_v51 = vpop.f32.mrb[3].mxu0 }
 0x162   :  { %v366_v53 = vadd.f32 %v362_v45, %v358_v46  ;;  %v360_v54 = vadd.f32 %v354_v40, %v327_v51 }
 0x163   :  { %369 = vst [vmem:[#allocation11] sm:$0xff] %v365_v49  ;;  %v367_v55 = vadd.f32 %v363_v48, %v359_v50 }
 0x164   :  { %370 = vst [vmem:[#allocation11 + $0x8] sm:$0xff] %v366_v53  ;;  %v368_v56 = vadd.f32 %v364_v52, %v360_v54 }
 0x165   :  { %371 = vst [vmem:[#allocation11 + $0x10] sm:$0xff] %v367_v55 }
 0x166   :  { %372 = vst [vmem:[#allocation11 + $0x18] sm:$0xff] %v368_v56 }
 0x167   :  { %585 = shalt.err (!%p582_p8)
}
 0x168   :  { %s586_s15 = scalar_lea.hbm %s722_s4, 512 }
 0x169   :  { %p587_p9 = scmp.ne.s32.totalorder %s722_s4, %s586_s15  ;;  %p590_p10 = scmp.lt.u32.totalorder %s586_s15, %s722_s4 }
 0x16b   :  { %p592_p11 = pnand %p590_p10, %p587_p9 }
 0x16d   :  { %595 = shalt.err (!%p592_p11)
}
 0x16e   :  { %384 = dma.vmem_to_hbm [thread:$0]  %s379_s12, 512, %s722_s4, [#allocation5], %s610_s2, %s610_s2, %s611_s9  }
 0x16f   :  { %602 = dma.done.wait [#allocation5], 512  }
 0x170   :  { %603 = vsyncadd [#allocation5], 4294966784 }
 0x171   :  { %388 = vsyncpa [#allocation4], 1 }
 0x172   :  { %389 = vsyncpa [#allocation7], 1 }
 0x173   :  { %390 = vsyncpa [#allocation10], 1 }
 0x174   :  { %391 = vsyncpa [#allocation5], 1 }

// kernel: lora_gpt_neo_forward.15
= control target key start
LH: loop header
LB: loop body
LE: loop exit
PB: predicated region body
PF: predicated region fallthrough
CT: control target
= control target key end

     0   :  { %s1904_s0 = inlined_call_operand.hbm [shape: bf16[16,1024], index: 0, kind: input, shape index: {}]   ;;  %s1905_s1 = inlined_call_operand.hbm [shape: bf16[1024,256], index: 1, kind: input, shape index: {}]   ;;  %s1906_s2 = inlined_call_operand.hbm [shape: f32[1,256], index: 2, kind: input, shape index: {}]   ;;  %s1907_s3 = inlined_call_operand.hbm [shape: f32[16,256], index: 3, kind: input, shape index: {}]   ;;  %s1908_s4 = inlined_call_operand.hbm [shape: f32[16,256], index: 4, kind: output, shape index: {}]  }
   0x1   :  { %1913 = sst [smem:[#allocation17_spill]] %s1904_s0 }
   0x2   :  { %1914 = sst [smem:[#allocation18_spill]] %s1906_s2 }
   0x3   :  { %9 = vsyncpa [#allocation4], 0 }
   0x4   :  { %11 = vsyncpa [#allocation4 + $0x1], 0 }
   0x5   :  { %12 = vsyncpa [#allocation7], 0 }
   0x6   :  { %14 = vsyncpa [#allocation7 + $0x1], 0 }
   0x7   :  { %15 = vsyncpa [#allocation10], 0 }
   0x8   :  { %16 = vsyncpa [#allocation5], 0  ;;  %s1568_s15 = smov 0   ;;  %s1570_s16 = smov 0  }
   0x9   :  { %s1572_s17 = smov 0   ;;  %s1574_s18 = smov 0  }
   0xa   :  { %s1576_s19 = smov 0   ;;  %s1578_s20 = smov 0  }
   0xb LB: > { %s1597_s21 = sadd.s32 4294967295, %s1528_s20   ;;  %s50_s22 = sadd.s32 1, %s1516_s17  ;;  %s1528_s20 = sphi %s1578_s20, %s22_s20   ;;  %s1524_s19 = sphi %s1576_s19, %s1934_s19   ;;  %s1520_s18 = sphi %s1574_s18, %s1933_s18   ;;  %s1516_s17 = sphi %s1572_s17, %s1932_s17   ;;  %s1512_s16 = sphi %s1570_s16, %s1931_s16   ;;  %s1508_s15 = sphi %s1568_s15, %s1930_s15  }
   0xc   : > { %p57_p0 = scmp.ne.s32.totalorder %s1516_s17, %s1512_s16  ;;  %p58_p1 = scmp.eq.s32.totalorder %s1528_s20, 0 }
   0xd   : > { %p63_p2 = scmp.ne.s32.totalorder %s1512_s16, %s1508_s15  ;;  %p1909_p3 = scmp.eq.s32.totalorder %s1597_s21, 0 }
   0xe   : > { %p59_p4 = por %p58_p1, %p57_p0  ;;  %p1025_p5 = scmp.ge.s32.totalorder %s1528_s20, 1 }
   0xf   : > { %p1608_p6 = por %p1909_p3, %p63_p2  ;;  %p184_p7 = scmp.lt.s32.totalorder %s1528_s20, 3 }
  0x10   : > { %s1530_s25 = smov [#allocation8]   ;;  %p1154_p10 = scmp.lt.s32.totalorder %s1528_s20, 2 }
  0x11   : > { %s1915_s23 = scalar_select %p1608_p6, 1, 0 }
  0x12   : > { %p1613_p8 = pnand %p1025_p5, %p184_p7  ;;  %s200_s26 = sshll.u32 %s1530_s25, 4  ;;  %s201_s26 = int_to_ptr.vmem [resolvable:$true] %s200_s26 }
  0x13   : > { %p1626_p12 = pnand %p1154_p10, %p59_p4  ;;  %s1531_s29 = smov [#allocation9]  }
  0x14   : > { %s1916_s24 = scalar_select %p1613_p8, 1, 0 }
  0x15   : > { %p1138_p9 = pneg %p1613_p8  ;;  %s216_s30 = sshll.u32 %s1531_s29, 4  ;;  %s217_s30 = int_to_ptr.vmem [resolvable:$true] %s216_s30 }
  0x16   : > { %s1918_s28 = scalar_select %p1626_p12, 1, 0 }
  0x17   : > { %p1622_p11 = pnand %p1138_p9, %p1909_p3  ;;  %s1919_s2 = sld [smem:[#allocation18_spill]] }
  0x19   : > { %p1322_p0 = pneg %p1622_p11 }
  0x1d   : > { %s1320_s7 = scalar_lea.hbm %s1919_s2, 32 }
  0x1e   : > { %p1321_p13 = scmp.ne.s32.totalorder %s1919_s2, %s1320_s7  ;;  %p1327_p4 = scmp.lt.u32.totalorder %s1320_s7, %s1919_s2 }
  0x20   : > { %p1323_p1 = pnand %p1322_p0, %p1321_p13 }
  0x22   : > { %p1324_p2 = pneg %p1323_p1 }
  0x24   : > { %p1329_p5 = pnand %p1327_p4, %p1324_p2 }
  0x26   : > { %1332 = shalt.err (!%p1329_p5)
}
  0x27   : > { %s1333_s12 = scalar_lea.vmem %s201_s26, 32  ;;  %p1341_p3 = scmp.lt.s32.totalorder %s201_s26, %s201_s26 }
  0x28   : > { %p1334_p7 = scmp.ne.s32.totalorder %s201_s26, %s1333_s12  ;;  %p1342_p6 = scmp.lt.s32.totalorder %s1333_s12, %s1333_s12 }
  0x2a   : > { %p1336_p9 = pnand %p1334_p7, %p1322_p0  ;;  %p1343_p8 = por %p1342_p6, %p1341_p3 }
  0x2c   : > { %p1337_p10 = pneg %p1336_p9 }
  0x2e   : > { %p1344_p12 = pnand %p1343_p8, %p1337_p10 }
  0x30   : > { %1347 = shalt.err (!%p1344_p12)
}
  0x31   : > { %1141 = dma.hbm_to_vmem [thread:$0]  (!%p1622_p11), %s1919_s2, 32, %s201_s26, [#allocation7]  }
  0x32   : > { %s1348_s29 = scalar_lea.hbm %s1907_s3, 512 }
  0x33   : > { %p1349_p13 = scmp.ne.s32.totalorder %s1907_s3, %s1348_s29  ;;  %p1355_p8 = scmp.lt.u32.totalorder %s1348_s29, %s1907_s3 }
  0x35   : > { %p1351_p3 = pnand %p1349_p13, %p1322_p0 }
  0x37   : > { %p1352_p6 = pneg %p1351_p3 }
  0x39   : > { %p1357_p12 = pnand %p1355_p8, %p1352_p6 }
  0x3b   : > { %1360 = shalt.err (!%p1357_p12)
}
  0x3c   : > { %s1361_s26 = scalar_lea.vmem %s217_s30, 512  ;;  %p1369_p5 = scmp.lt.s32.totalorder %s217_s30, %s217_s30 }
  0x3d   : > { %p1362_p1 = scmp.ne.s32.totalorder %s217_s30, %s1361_s26  ;;  %p1370_p7 = scmp.lt.s32.totalorder %s1361_s26, %s1361_s26 }
  0x3f   : > { %p1364_p2 = pnand %p1362_p1, %p1322_p0  ;;  %p1371_p9 = por %p1370_p7, %p1369_p5 }
  0x41   : > { %p1365_p4 = pneg %p1364_p2 }
  0x43   : > { %p1372_p10 = pnand %p1371_p9, %p1365_p4 }
  0x45   : > { %1375 = shalt.err (!%p1372_p10)
}
  0x46   : > { %s1532_s9 = smov 256   ;;  %s1533_s10 = smov 16  }
  0x47   : > { %1144 = dma.hbm_to_vmem [thread:$0]  (!%p1622_p11), %s1907_s3, 512, %s217_s30, [#allocation10], %s1532_s9, %s1532_s9, %s1533_s10  }
  0x48   : > { %s1676_s13 = sand.u32 1, %s1516_s17   ;;  %s34_s14 = sadd.s32 1, %s1524_s19 }
  0x49   : > { %p35_p0 = scmp.ge.s32.totalorder %s34_s14, 2  ;;  %s1029_s15 = sshll.u32 %s1676_s13, 5 }
  0x4a   : > { %s1115_s25 = sshll.u32 %s1524_s19, 8  ;;  %s1920_s0 = sld [smem:[#allocation17_spill]] }
  0x4b   : > { %s1936_s14 = smov (%p35_p0, %s34_s14), 0  ;;  %s234_s30 = scalar_lea.vmem [#allocation3], %s1029_s15 }
  0x4c   : > { %s244_s6 = sshll.u32 %s234_s30, 4  ;;  %s46_s7 = ssub.s32 %s1524_s19, %s1936_s14  ;;  %s1690_s6 = int_to_ptr.vmem [resolvable:$true] %s244_s6 }
  0x4d   : > { %p1692_p11 = scmp.eq.s32.totalorder %s46_s7, 0  ;;  %s231_s26 = scalar_lea.sflag [#allocation4], %s1676_s13 }
  0x4e   : > { %p1922_p3 = scmp.ne.s32.totalorder %s1918_s28, 0 }
  0x50   : > { %s1686_s5 = scalar_lea.hbm %s1920_s0, %s1115_s25  ;;  %p1378_p6 = pneg %p1922_p3 }
  0x51   : > { %s1376_s11 = scalar_lea.hbm %s1686_s5, 512  ;;  %s1381_s15 = scalar_lea.hbm %s1920_s0, 1024 }
  0x52   : > { %p1377_p13 = scmp.ne.s32.totalorder %s1686_s5, %s1376_s11  ;;  %p1382_p1 = scmp.lt.u32.totalorder %s1686_s5, %s1920_s0 }
  0x53   : > { %p1383_p2 = scmp.lt.u32.totalorder %s1381_s15, %s1376_s11  ;;  %p1385_p5 = scmp.lt.u32.totalorder %s1376_s11, %s1686_s5 }
  0x54   : > { %p1379_p8 = pnand %p1378_p6, %p1377_p13 }
  0x55   : > { %p1384_p4 = por %p1383_p2, %p1382_p1 }
  0x56   : > { %p1380_p12 = pneg %p1379_p8 }
  0x57   : > { %p1386_p7 = por %p1385_p5, %p1384_p4 }
  0x59   : > { %p1387_p9 = pnand %p1386_p7, %p1380_p12 }
  0x5b   : > { %1390 = shalt.err (!%p1387_p9)
}
  0x5c   : > { %s1391_s30 = scalar_lea.vmem %s1690_s6, 512  ;;  %s1534_s7 = smov [#allocation3]  }
  0x5d   : > { %p1392_p10 = scmp.ne.s32.totalorder %s1690_s6, %s1391_s30  ;;  %s1396_s12 = sshll.u32 %s1534_s7, 4  ;;  %s1397_s12 = int_to_ptr.vmem [resolvable:$false] %s1396_s12 }
  0x5e   : > { %s1398_s25 = scalar_lea.vmem %s1397_s12, 1024  ;;  %p1399_p8 = scmp.lt.s32.totalorder %s1690_s6, %s1397_s12 }
  0x5f   : > { %p1394_p0 = pnand %p1392_p10, %p1378_p6  ;;  %p1400_p1 = scmp.lt.s32.totalorder %s1398_s25, %s1391_s30 }
  0x61   : > { %p1395_p13 = pneg %p1394_p0  ;;  %p1401_p2 = por %p1400_p1, %p1399_p8 }
  0x63   : > { %p1402_p4 = pnand %p1401_p2, %p1395_p13 }
  0x65   : > { %1405 = shalt.err (!%p1402_p4)
}
  0x66   : > { %s1535_s11 = smov 512   ;;  %s254_s27 = sand.u32 1, %s1528_s20  }
  0x67   : > { %1148 = dma.hbm_to_vmem [thread:$0]  (!%p1922_p3), %s1686_s5, 512, %s1690_s6, %s231_s26, %s1535_s11, %s1532_s9, %s1533_s10  }
  0x68   : > { %s1731_s15 = scalar_select %p1692_p11, %s1516_s17, %s50_s22  }
  0x69   : > { %s1032_s29 = sshll.u32 %s1676_s13, 9  ;;  %s1117_s30 = sshll.u32 %s1524_s19, 13 }
  0x6a   : > { %s258_s7 = scalar_lea.vmem [#allocation6], %s1032_s29  ;;  %s1739_s2 = scalar_lea.hbm %s1905_s1, %s1117_s30 }
  0x6b   : > { %s268_s12 = sshll.u32 %s258_s7, 4  ;;  %s1743_s9 = scalar_lea.sflag [#allocation7], %s254_s27  ;;  %s1741_s12 = int_to_ptr.vmem [resolvable:$true] %s268_s12 }
  0x6c   : > { %s1406_s22 = scalar_lea.hbm %s1739_s2, 8192  ;;  %s1411_s0 = scalar_lea.hbm %s1905_s1, 16384 }
  0x6d   : > { %p1407_p11 = scmp.ne.s32.totalorder %s1739_s2, %s1406_s22  ;;  %p1412_p7 = scmp.lt.u32.totalorder %s1739_s2, %s1905_s1 }
  0x6e   : > { %p1413_p9 = scmp.lt.u32.totalorder %s1411_s0, %s1406_s22  ;;  %p1415_p0 = scmp.lt.u32.totalorder %s1406_s22, %s1739_s2 }
  0x6f   : > { %p1409_p12 = pnand %p1407_p11, %p1378_p6 }
  0x70   : > { %p1414_p10 = por %p1413_p9, %p1412_p7 }
  0x71   : > { %p1410_p5 = pneg %p1409_p12 }
  0x72   : > { %p1416_p13 = por %p1415_p0, %p1414_p10 }
  0x74   : > { %p1417_p8 = pnand %p1416_p13, %p1410_p5 }
  0x76   : > { %1420 = shalt.err (!%p1417_p8)
}
  0x77   : > { %s1421_s8 = scalar_lea.vmem %s1741_s12, 8192  ;;  %s1536_s26 = smov [#allocation6]  }
  0x78   : > { %p1422_p1 = scmp.ne.s32.totalorder %s1741_s12, %s1421_s8  ;;  %s1426_s11 = sshll.u32 %s1536_s26, 4  ;;  %s1427_s11 = int_to_ptr.vmem [resolvable:$false] %s1426_s11 }
  0x79   : > { %s1428_s27 = scalar_lea.vmem %s1427_s11, 16384  ;;  %p1429_p11 = scmp.lt.s32.totalorder %s1741_s12, %s1427_s11 }
  0x7a   : > { %p1424_p2 = pnand %p1422_p1, %p1378_p6  ;;  %p1430_p12 = scmp.lt.s32.totalorder %s1428_s27, %s1421_s8 }
  0x7c   : > { %p1425_p4 = pneg %p1424_p2  ;;  %p1431_p7 = por %p1430_p12, %p1429_p11 }
  0x7e   : > { %p1432_p9 = pnand %p1431_p7, %p1425_p4 }
  0x80   : > { %1435 = shalt.err (!%p1432_p9)
}
  0x81   : > { %s1537_s29 = smov 128   ;;  %s1538_s30 = smov 8  }
  0x82   : > { %1151 = dma.hbm_to_vmem [thread:$0]  (!%p1922_p3), %s1739_s2, 8192, %s1741_s12, %s1743_s9, %s1537_s29, %s1537_s29, %s1538_s30  }
  0x83   : > { %p1923_p6 = scmp.ne.s32.totalorder %s1916_s24, 0 }
  0x84   : > { %s282_s7 = sand.u32 (!%p1923_p6), 1, %s1512_s16   ;;  %p1924_p5 = scmp.ne.s32.totalorder (!%p1923_p6), %s1915_s23, 0 }
  0x85   : > { %280 = sbr.rel (%p1923_p6) target bundleno = 483 (0x1e3), region = 36  ;;  %s1037_s25 = sshll.u32 (!%p1923_p6), %s282_s7, 5 }
  0x86   : > { %s283_s22 = scalar_lea.sflag (!%p1923_p6), [#allocation4], %s282_s7  ;;  %s1772_s10 = scalar_lea.vmem (!%p1923_p6), [#allocation3], %s1037_s25 }
  0x8c   : > { %1487 = dma.done.wait (%p1924_p5), %s283_s22, 512  }
  0x8d   : > { %1489 = vsyncadd (%p1924_p5), %s283_s22, 4294966784  ;;  %s291_s13 = sand.u32 1, %s1597_s21   ;;  %s1038_s28 = sshll.u32 %s282_s7, 9 }
  0x8e   : > { %s292_s2 = scalar_lea.sflag [#allocation7], %s291_s13  ;;  %s1779_s12 = scalar_lea.vmem [#allocation6], %s1038_s28 }
  0x8f   : > { %1491 = dma.done.wait (%p1924_p5), %s292_s2, 8192  }
  0x90   : > { %1493 = vsyncadd (%p1924_p5), %s292_s2, 4294959104  ;;  %p1925_p3 = scmp.eq.s32.totalorder %s1597_s21, 0 }
  0x92   : > { %1495 = dma.done.wait (%p1925_p3), [#allocation7], 32   ;;  %p1926_p10 = pmov %p1925_p3 }
  0x93   : > { %p1927_p0 = pmov %p1925_p3 }
  0x94   : > { %1497 = vsyncadd (%p1926_p10), [#allocation7], 4294967264 }
  0x95   : > { %1499 = dma.done.wait (%p1927_p0), [#allocation10], 512   ;;  %p1928_p13 = pmov %p1927_p0 }
  0x96   : > { %p1041_p8 = scmp.ne.s32.totalorder %s1520_s18, 0 }
  0x97   : > { %1501 = vsyncadd (%p1928_p13), [#allocation10], 4294966784  ;;  %v1539_v0 = vmov (!%p1041_p8), 0.0  }
  0x98   : > { %340 = sbr.rel (%p1041_p8) target bundleno = 159 (0x9f), region = 56  ;;  %341 = vst [vmem:[#allocation2] sm:$0xff] (!%p1041_p8), %v1539_v0  ;;  %342 = vst [vmem:[#allocation2 + $0x8] sm:$0xff] (!%p1041_p8), %v1539_v0 }
  0x99   : > { %343 = vst [vmem:[#allocation2 + $0x10] sm:$0xff] (!%p1041_p8), %v1539_v0  ;;  %344 = vst [vmem:[#allocation2 + $0x18] sm:$0xff] (!%p1041_p8), %v1539_v0 }
  0x9f PF: > { %v1218_v1 = vld [vmem:[%s1779_s12 + $0x4] ss:$8 sps:$4 sm:$0xff]   ;;  %v1222_v3 = vld [vmem:[%s1779_s12] ss:$8 sps:$4 sm:$0xff]   ;;  %v1224_v5 = vld [vmem:[%s1779_s12 + $0x14] ss:$8 sps:$4 sm:$0xff]  }
  0xa0   : > { %v1220_v2 = vld [vmem:[%s1779_s12 + $0x104] ss:$8 sps:$4 sm:$0xff]   ;;  %757 = vmatprep.subr.bf16.mxu1 %v1218_v1  ;;  %v1223_v4 = vld [vmem:[%s1779_s12 + $0x100] ss:$8 sps:$4 sm:$0xff]   ;;  %v1226_v6 = vld [vmem:[%s1779_s12 + $0x114] ss:$8 sps:$4 sm:$0xff]  }
  0xa1   : > { %800 = vmatprep.subr.bf16.mxu0 %v1220_v2  ;;  %758 = vmatpush1.bf16.msra.mxu1 %v1222_v3  ;;  %v1228_v7 = vld [vmem:[%s1779_s12 + $0x10] ss:$8 sps:$4 sm:$0xff]   ;;  %v1230_v9 = vld [vmem:[%s1779_s12 + $0x24] ss:$8 sps:$4 sm:$0xff]   ;;  %v1234_v11 = vld [vmem:[%s1779_s12 + $0x20] ss:$8 sps:$4 sm:$0xff]  }
  0xa2   : > { %801 = vmatpush1.bf16.msra.mxu0 %v1223_v4  ;;  %759 = vmatprep.subr.bf16.mxu1 %v1224_v5  ;;  %v1229_v8 = vld [vmem:[%s1779_s12 + $0x110] ss:$8 sps:$4 sm:$0xff]   ;;  %v1232_v10 = vld [vmem:[%s1779_s12 + $0x124] ss:$8 sps:$4 sm:$0xff]   ;;  %v1235_v12 = vld [vmem:[%s1779_s12 + $0x120] ss:$8 sps:$4 sm:$0xff]  }
  0xa3   : > { %802 = vmatprep.subr.bf16.mxu0 %v1226_v6  ;;  %v1236_v13 = vld [vmem:[%s1779_s12 + $0x34] ss:$8 sps:$4 sm:$0xff]   ;;  %v1240_v15 = vld [vmem:[%s1779_s12 + $0x30] ss:$8 sps:$4 sm:$0xff]   ;;  %v1242_v17 = vld [vmem:[%s1779_s12 + $0x44] ss:$8 sps:$4 sm:$0xff]  }
  0xa4   : > { %v1238_v14 = vld [vmem:[%s1779_s12 + $0x134] ss:$8 sps:$4 sm:$0xff]   ;;  %v1241_v16 = vld [vmem:[%s1779_s12 + $0x130] ss:$8 sps:$4 sm:$0xff]   ;;  %v1244_v18 = vld [vmem:[%s1779_s12 + $0x144] ss:$8 sps:$4 sm:$0xff]  }
  0xa5   : > { %760 = vmatpush1.bf16.msra.mxu1 %v1228_v7  ;;  %v1246_v19 = vld [vmem:[%s1779_s12 + $0x40] ss:$8 sps:$4 sm:$0xff]   ;;  %v1248_v21 = vld [vmem:[%s1779_s12 + $0x54] ss:$8 sps:$4 sm:$0xff]   ;;  %v1252_v23 = vld [vmem:[%s1779_s12 + $0x50] ss:$8 sps:$4 sm:$0xff]  }
  0xa6   : > { %803 = vmatpush1.bf16.msra.mxu0 %v1229_v8  ;;  %761 = vmatprep.subr.bf16.mxu1 %v1230_v9  ;;  %v1247_v20 = vld [vmem:[%s1779_s12 + $0x140] ss:$8 sps:$4 sm:$0xff]   ;;  %v1250_v22 = vld [vmem:[%s1779_s12 + $0x154] ss:$8 sps:$4 sm:$0xff]   ;;  %v1253_v24 = vld [vmem:[%s1779_s12 + $0x150] ss:$8 sps:$4 sm:$0xff]  }
  0xa7   : > { %804 = vmatprep.subr.bf16.mxu0 %v1232_v10  ;;  %v1254_v25 = vld [vmem:[%s1779_s12 + $0x64] ss:$8 sps:$4 sm:$0xff]   ;;  %v1258_v27 = vld [vmem:[%s1779_s12 + $0x60] ss:$8 sps:$4 sm:$0xff]   ;;  %v1260_v29 = vld [vmem:[%s1779_s12 + $0x74] ss:$8 sps:$4 sm:$0xff]  }
  0xa8   : > { %v1256_v26 = vld [vmem:[%s1779_s12 + $0x164] ss:$8 sps:$4 sm:$0xff]   ;;  %v1259_v28 = vld [vmem:[%s1779_s12 + $0x160] ss:$8 sps:$4 sm:$0xff]   ;;  %v1262_v30 = vld [vmem:[%s1779_s12 + $0x174] ss:$8 sps:$4 sm:$0xff]  }
  0xa9   : > { %762 = vmatpush1.bf16.msra.mxu1 %v1234_v11  ;;  %v1264_v31 = vld [vmem:[%s1779_s12 + $0x70] ss:$8 sps:$4 sm:$0xff]   ;;  %v1266_v33 = vld [vmem:[%s1779_s12 + $0x84] ss:$8 sps:$4 sm:$0xff]   ;;  %v1270_v35 = vld [vmem:[%s1779_s12 + $0x80] ss:$8 sps:$4 sm:$0xff]  }
  0xaa   : > { %805 = vmatpush1.bf16.msra.mxu0 %v1235_v12  ;;  %763 = vmatprep.subr.bf16.mxu1 %v1236_v13  ;;  %v1265_v32 = vld [vmem:[%s1779_s12 + $0x170] ss:$8 sps:$4 sm:$0xff]   ;;  %v1268_v34 = vld [vmem:[%s1779_s12 + $0x184] ss:$8 sps:$4 sm:$0xff]   ;;  %v1271_v36 = vld [vmem:[%s1779_s12 + $0x180] ss:$8 sps:$4 sm:$0xff]  }
  0xab   : > { %806 = vmatprep.subr.bf16.mxu0 %v1238_v14  ;;  %v1272_v37 = vld [vmem:[%s1779_s12 + $0x94] ss:$8 sps:$4 sm:$0xff]   ;;  %v1276_v39 = vld [vmem:[%s1779_s12 + $0x90] ss:$8 sps:$4 sm:$0xff]   ;;  %v1278_v41 = vld [vmem:[%s1779_s12 + $0xa4] ss:$8 sps:$4 sm:$0xff]  }
  0xac   : > { %v1274_v38 = vld [vmem:[%s1779_s12 + $0x194] ss:$8 sps:$4 sm:$0xff]   ;;  %v1277_v40 = vld [vmem:[%s1779_s12 + $0x190] ss:$8 sps:$4 sm:$0xff]   ;;  %v1280_v42 = vld [vmem:[%s1779_s12 + $0x1a4] ss:$8 sps:$4 sm:$0xff]  }
  0xad   : > { %764 = vmatpush1.bf16.msra.mxu1 %v1240_v15  ;;  %v1282_v43 = vld [vmem:[%s1779_s12 + $0xa0] ss:$8 sps:$4 sm:$0xff]   ;;  %v1284_v45 = vld [vmem:[%s1779_s12 + $0xb4] ss:$8 sps:$4 sm:$0xff]   ;;  %v1288_v47 = vld [vmem:[%s1779_s12 + $0xb0] ss:$8 sps:$4 sm:$0xff]  }
  0xae   : > { %807 = vmatpush1.bf16.msra.mxu0 %v1241_v16  ;;  %765 = vmatprep.subr.bf16.mxu1 %v1242_v17  ;;  %v1283_v44 = vld [vmem:[%s1779_s12 + $0x1a0] ss:$8 sps:$4 sm:$0xff]   ;;  %v1286_v46 = vld [vmem:[%s1779_s12 + $0x1b4] ss:$8 sps:$4 sm:$0xff]   ;;  %v1289_v49 = vld [vmem:[%s1779_s12 + $0x1b0] ss:$8 sps:$4 sm:$0xff]  }
  0xaf   : > { %808 = vmatprep.subr.bf16.mxu0 %v1244_v18  ;;  %v1316_v48 = vld [vmem:[%s1772_s10 + $0x4] ss:$16 sps:$4 sm:$0xff]   ;;  %v1319_v52 = vld [vmem:[%s1772_s10 + $0xc] ss:$16 sps:$4 sm:$0xff]   ;;  %v1294_v53 = vld [vmem:[%s1779_s12 + $0xc0] ss:$8 sps:$4 sm:$0xff]  }
  0xb0   : > { %v1290_v50 = vld [vmem:[%s1779_s12 + $0xc4] ss:$8 sps:$4 sm:$0xff]   ;;  %789 = vmatprep.mubr.bf16.mxu1 %v1316_v48  ;;  %832 = vmatprep.mubr.bf16.mxu0 %v1319_v52  ;;  %v1295_v54 = vld [vmem:[%s1779_s12 + $0x1c0] ss:$8 sps:$4 sm:$0xff]   ;;  %v1296_v55 = vld [vmem:[%s1779_s12 + $0xd4] ss:$8 sps:$4 sm:$0xff]  }
  0xb1   : > { %766 = vmatpush1.bf16.msra.mxu1 %v1246_v19  ;;  %v1292_v51 = vld [vmem:[%s1779_s12 + $0x1c4] ss:$8 sps:$4 sm:$0xff]   ;;  %v1298_v56 = vld [vmem:[%s1779_s12 + $0x1d4] ss:$8 sps:$4 sm:$0xff]   ;;  %v1300_v57 = vld [vmem:[%s1779_s12 + $0xd0] ss:$8 sps:$4 sm:$0xff]  }
  0xb2   : > { %809 = vmatpush1.bf16.msra.mxu0 %v1247_v20  ;;  %767 = vmatprep.subr.bf16.mxu1 %v1248_v21  ;;  %v1301_v58 = vld [vmem:[%s1779_s12 + $0x1d0] ss:$8 sps:$4 sm:$0xff]   ;;  %v1302_v59 = vld [vmem:[%s1779_s12 + $0xe4] ss:$8 sps:$4 sm:$0xff]   ;;  %v1306_v61 = vld [vmem:[%s1779_s12 + $0xe0] ss:$8 sps:$4 sm:$0xff]  }
  0xb3   : > { %810 = vmatprep.subr.bf16.mxu0 %v1250_v22  ;;  %v1304_v60 = vld [vmem:[%s1779_s12 + $0x1e4] ss:$8 sps:$4 sm:$0xff]   ;;  %v1307_v62 = vld [vmem:[%s1779_s12 + $0x1e0] ss:$8 sps:$4 sm:$0xff]   ;;  %v1308_v63 = vld [vmem:[%s1779_s12 + $0xf4] ss:$8 sps:$4 sm:$0xff]  }
  0xb4   : > { %v1310_v0 = vld [vmem:[%s1779_s12 + $0x1f4] ss:$8 sps:$4 sm:$0xff]   ;;  %v1312_v1 = vld [vmem:[%s1779_s12 + $0xf0] ss:$8 sps:$4 sm:$0xff]   ;;  %v345_v6 = vld [vmem:[#allocation2] sm:$0xff]  ;;  %p1110_p1 = scmp.ne.s32.totalorder %s1520_s18, 1 }
  0xb5   : > { %768 = vmatpush1.bf16.msra.mxu1 %v1252_v23  ;;  %v1313_v2 = vld [vmem:[%s1779_s12 + $0x1f0] ss:$8 sps:$4 sm:$0xff]   ;;  %v346_v10 = vld [vmem:[#allocation2 + $0x8] sm:$0xff] }
  0xb6   : > { %811 = vmatpush1.bf16.msra.mxu0 %v1253_v24  ;;  %769 = vmatprep.subr.bf16.mxu1 %v1254_v25  ;;  %v1314_v3 = vld [vmem:[%s1772_s10] ss:$16 sps:$4 sm:$0xff]   ;;  %v1317_v4 = vld [vmem:[%s1772_s10 + $0x8] ss:$16 sps:$4 sm:$0xff]   ;;  %v861_v25 = vlaneseq (!%p1110_p1) }
  0xb7   : > { %812 = vmatprep.subr.bf16.mxu0 %v1256_v26  ;;  %v347_v14 = vld [vmem:[#allocation2 + $0x10] sm:$0xff]  ;;  %v348_v19 = vld [vmem:[#allocation2 + $0x18] sm:$0xff] }
  0xb8   : > { %v862_v26 = vshrl.u32 (!%p1110_p1), %v861_v25, 7 }
  0xb9   : > { %770 = vmatpush1.bf16.msra.mxu1 %v1258_v27  ;;  %v859_v27 = vld [vmem:[#allocation8] sm:$0x3] (!%p1110_p1) }
  0xba   : > { %813 = vmatpush1.bf16.msra.mxu0 %v1259_v28  ;;  %771 = vmatprep.subr.bf16.mxu1 %v1260_v29  ;;  %v863_v29 = vsub.s32 (!%p1110_p1), 0, %v862_v26 }
  0xbb   : > { %814 = vmatprep.subr.bf16.mxu0 %v1262_v30  ;;  %v867_v30 = vsub.s32 (!%p1110_p1), 1, %v862_v26 }
  0xbd   : > { %772 = vmatpush1.bf16.msra.mxu1 %v1264_v31 }
  0xbe   : > { %815 = vmatpush1.bf16.msra.mxu0 %v1265_v32  ;;  %773 = vmatprep.subr.bf16.mxu1 %v1266_v33 }
  0xbf   : > { %816 = vmatprep.subr.bf16.mxu0 %v1268_v34  ;;  %v864_v34 = vrot.slane (!%p1110_p1), %v859_v27, %v863_v29 }
  0xc1   : > { %774 = vmatpush1.bf16.msra.mxu1 %v1270_v35  ;;  %v875_v35 = vld [vmem:[#allocation9] sm:$0xff] (!%p1110_p1) }
  0xc2   : > { %817 = vmatpush1.bf16.msra.mxu0 %v1271_v36  ;;  %775 = vmatprep.subr.bf16.mxu1 %v1272_v37  ;;  %v868_v36 = vrot.slane (!%p1110_p1), %v859_v27, %v867_v30  ;;  %v876_v37 = vld [vmem:[#allocation9 + $0x8] sm:$0xff] (!%p1110_p1) }
  0xc3   : > { %818 = vmatprep.subr.bf16.mxu0 %v1274_v38  ;;  %v877_v38 = vld [vmem:[#allocation9 + $0x10] sm:$0xff] (!%p1110_p1) }
  0xc5   : > { %776 = vmatpush1.bf16.msra.mxu1 %v1276_v39  ;;  %v878_v39 = vld [vmem:[#allocation9 + $0x18] sm:$0xff] (!%p1110_p1) }
  0xc6   : > { %819 = vmatpush1.bf16.msra.mxu0 %v1277_v40  ;;  %777 = vmatprep.subr.bf16.mxu1 %v1278_v41 }
  0xc7   : > { %820 = vmatprep.subr.bf16.mxu0 %v1280_v42 }
  0xc9   : > { %778 = vmatpush1.bf16.msra.mxu1 %v1282_v43 }
  0xca   : > { %821 = vmatpush1.bf16.msra.mxu0 %v1283_v44  ;;  %779 = vmatprep.subr.bf16.mxu1 %v1284_v45 }
  0xcb   : > { %822 = vmatprep.subr.bf16.mxu0 %v1286_v46 }
  0xcd   : > { %780 = vmatpush1.bf16.msra.mxu1 %v1288_v47 }
  0xce   : > { %823 = vmatpush1.bf16.msra.mxu0 %v1289_v49  ;;  %781 = vmatprep.subr.bf16.mxu1 %v1290_v50 }
  0xcf   : > { %824 = vmatprep.subr.bf16.mxu0 %v1292_v51 }
  0xd1   : > { %782 = vmatpush1.bf16.msra.mxu1 %v1294_v53 }
  0xd2   : > { %825 = vmatpush1.bf16.msra.mxu0 %v1295_v54  ;;  %783 = vmatprep.subr.bf16.mxu1 %v1296_v55 }
  0xd3   : > { %826 = vmatprep.subr.bf16.mxu0 %v1298_v56 }
  0xd5   : > { %784 = vmatpush1.bf16.msra.mxu1 %v1300_v57 }
  0xd6   : > { %827 = vmatpush1.bf16.msra.mxu0 %v1301_v58  ;;  %785 = vmatprep.subr.bf16.mxu1 %v1302_v59 }
  0xd7   : > { %828 = vmatprep.subr.bf16.mxu0 %v1304_v60 }
  0xd9   : > { %786 = vmatpush1.bf16.msra.mxu1 %v1306_v61 }
  0xda   : > { %829 = vmatpush1.bf16.msra.mxu0 %v1307_v62  ;;  %787 = vmatprep.subr.bf16.mxu1 %v1308_v63 }
  0xdb   : > { %830 = vmatprep.subr.bf16.mxu0 %v1310_v0 }
  0xdd   : > { %788 = vmatpush1.bf16.msra.mxu1 %v1312_v1 }
  0xde   : > { %831 = vmatpush1.bf16.msra.mxu0 %v1313_v2 }
  0xe0   : > { %790 = vmatmul.mubr.bf16.vlgmr.msra.gmra.mrb[0].mxu1 %v1314_v3 }
  0xe1   : > { %833 = vmatmul.mubr.bf16.vlgmr.msra.gmra.mrb[0].mxu0 %v1317_v4 }
 0x1b3   : > { %v791_v5 = vpop.f32.mrb[0].mxu1 }
 0x1b4   : > { %v834_v7 = vpop.f32.mrb[0].mxu0  ;;  %v793_v9 = vpop.f32.mrb[1].mxu1 }
 0x1b5   : > { %v835_v8 = vadd.f32 %v834_v7, %v791_v5  ;;  %v836_v11 = vpop.f32.mrb[1].mxu0  ;;  %v795_v13 = vpop.f32.mrb[2].mxu1 }
 0x1b6   : > { %v837_v12 = vadd.f32 %v836_v11, %v793_v9  ;;  %v838_v15 = vpop.f32.mrb[2].mxu0  ;;  %v797_v18 = vpop.f32.mrb[3].mxu1  ;;  %854 = sbr.rel (%p1110_p1) target bundleno = 457 (0x1c9), region = 60 }
 0x1b7   : > { %v843_v16 = vadd.f32 %v835_v8, %v345_v6  ;;  %v839_v17 = vadd.f32 %v838_v15, %v795_v13  ;;  %v840_v20 = vpop.f32.mrb[3].mxu0 }
 0x1b8   : > { %v844_v21 = vadd.f32 %v837_v12, %v346_v10  ;;  %v841_v22 = vadd.f32 %v840_v20, %v797_v18 }
 0x1b9   : > { %847 = vst [vmem:[#allocation2] sm:$0xff] %v843_v16  ;;  %v845_v23 = vadd.f32 %v839_v17, %v347_v14 }
 0x1ba   : > { %848 = vst [vmem:[#allocation2 + $0x8] sm:$0xff] %v844_v21  ;;  %v846_v24 = vadd.f32 %v841_v22, %v348_v19 }
 0x1bb   : > { %849 = vst [vmem:[#allocation2 + $0x10] sm:$0xff] %v845_v23 }
 0x1bc   : > { %850 = vst [vmem:[#allocation2 + $0x18] sm:$0xff] %v846_v24 }
 0x1c0   : > { %v855_v28 = vld [vmem:[#allocation2] sm:$0xff] }
 0x1c1   : > { %v856_v31 = vld [vmem:[#allocation2 + $0x8] sm:$0xff]  ;;  %v871_v40 = vadd.f32 %v864_v34, %v855_v28 }
 0x1c2   : > { %v857_v32 = vld [vmem:[#allocation2 + $0x10] sm:$0xff]  ;;  %v872_v41 = vadd.f32 %v868_v36, %v856_v31 }
 0x1c3   : > { %v858_v33 = vld [vmem:[#allocation2 + $0x18] sm:$0xff]  ;;  %v873_v42 = vadd.f32 %v864_v34, %v857_v32  ;;  %v879_v44 = vadd.f32 %v875_v35, %v871_v40 }
 0x1c4   : > { %v874_v43 = vadd.f32 %v868_v36, %v858_v33  ;;  %v880_v45 = vadd.f32 %v876_v37, %v872_v41 }
 0x1c5   : > { %v881_v46 = vadd.f32 %v877_v38, %v873_v42  ;;  %883 = vst [vmem:[#allocation11] sm:$0xff] %v879_v44 }
 0x1c6   : > { %v882_v47 = vadd.f32 %v878_v39, %v874_v43  ;;  %884 = vst [vmem:[#allocation11 + $0x8] sm:$0xff] %v880_v45 }
 0x1c7   : > { %885 = vst [vmem:[#allocation11 + $0x10] sm:$0xff] %v881_v46 }
 0x1c8   : > { %886 = vst [vmem:[#allocation11 + $0x18] sm:$0xff] %v882_v47 }
 0x1c9 PF: > { %p1157_p2 = scmp.eq.s32.totalorder %s1597_s21, 1  ;;  %s1540_s18 = smov [#allocation11]  }
 0x1ca   : > { %s899_s23 = sshll.u32 %s1540_s18, 4  ;;  %s900_s23 = int_to_ptr.vmem [resolvable:$true] %s899_s23 }
 0x1cb   : > { %s1436_s24 = scalar_lea.vmem %s900_s23, 512  ;;  %p1443_p7 = scmp.lt.s32.totalorder %s900_s23, %s900_s23 }
 0x1cc   : > { %p1437_p4 = scmp.ne.s32.totalorder %s900_s23, %s1436_s24  ;;  %p1444_p9 = scmp.lt.s32.totalorder %s1436_s24, %s1436_s24 }
 0x1ce   : > { %p1438_p11 = pnand %p1437_p4, %p1157_p2  ;;  %p1445_p6 = por %p1444_p9, %p1443_p7 }
 0x1d0   : > { %p1439_p12 = pneg %p1438_p11 }
 0x1d2   : > { %p1446_p5 = pnand %p1445_p6, %p1439_p12 }
 0x1d4   : > { %1449 = shalt.err (!%p1446_p5)
}
 0x1d5   : > { %s1450_s5 = scalar_lea.hbm %s1908_s4, 512 }
 0x1d6   : > { %p1451_p3 = scmp.ne.s32.totalorder %s1908_s4, %s1450_s5  ;;  %p1456_p13 = scmp.lt.u32.totalorder %s1450_s5, %s1908_s4 }
 0x1d8   : > { %p1452_p10 = pnand %p1451_p3, %p1157_p2 }
 0x1da   : > { %p1453_p0 = pneg %p1452_p10 }
 0x1dc   : > { %p1458_p8 = pnand %p1456_p13, %p1453_p0 }
 0x1de   : > { %1461 = shalt.err (!%p1458_p8)
}
 0x1df   : > { %s1541_s27 = smov 256   ;;  %s1542_s29 = smov 16  }
 0x1e0   : > { %1135 = dma.vmem_to_hbm [thread:$0]  (%p1157_p2), %s900_s23, 512, %s1908_s4, [#allocation5], %s1541_s27, %s1541_s27, %s1542_s29  }
 0x1e1   : > { %1503 = dma.done.wait (%p1157_p2), [#allocation5], 512  }
 0x1e2   : > { %1505 = vsyncadd (%p1157_p2), [#allocation5], 4294966784 }
 0x1e3 PF: > { %s22_s20 = sadd.s32 1, %s1528_s20   ;;  %s1929_s25 = smov %s1731_s15 }
 0x1e4   : > { %p19_p1 = scmp.ge.s32.totalorder %s22_s20, 4   ;;  %s1930_s15 = smov %s1512_s16 }
 0x1e5   : > { %s1931_s16 = smov %s1516_s17  ;;  %s1932_s17 = smov %s1929_s25 }
 0x1e6   : > { %s1933_s18 = smov %s1524_s19  ;;  %s1934_s19 = smov %s1936_s14 }
 0x1e7   :  { %21 = sbr.rel (!%p19_p1) target bundleno = 11 (0xb), region = 105 }
 0x1ee   :  { %915 = vsyncpa [#allocation4], 1 }
 0x1ef   :  { %917 = vsyncpa [#allocation4 + $0x1], 1 }
 0x1f0   :  { %918 = vsyncpa [#allocation7], 1 }
 0x1f1   :  { %920 = vsyncpa [#allocation7 + $0x1], 1 }
 0x1f2   :  { %921 = vsyncpa [#allocation10], 1 }
 0x1f3   :  { %922 = vsyncpa [#allocation5], 1 }
 0x1f4   :  { %924 = vsyncpa [#allocation5 + $0x1], 1 }

// kernel: lora_gpt_neo_forward.21
= control target key start
LH: loop header
LB: loop body
LE: loop exit
PB: predicated region body
PF: predicated region fallthrough
CT: control target
= control target key end

     0   :  { %13 = vsyncpa [#allocation7], 0  ;;  %s1560_s0 = inlined_call_operand.hbm [shape: f32[16,256], index: 0, kind: input, shape index: {}]   ;;  %s1561_s1 = inlined_call_operand.hbm [shape: f32[1,256], index: 1, kind: input, shape index: {}]   ;;  %s1562_s2 = inlined_call_operand.hbm [shape: f32[1,256], index: 2, kind: input, shape index: {}]   ;;  %s1563_s3 = inlined_call_operand.hbm [shape: bf16[256,512], index: 3, kind: input, shape index: {}]   ;;  %s1564_s4 = inlined_call_operand.hbm [shape: s32[16,1], index: 4, kind: input, shape index: {}]   ;;  %s1565_s5 = inlined_call_operand.hbm [shape: f32[16,1], index: 5, kind: input, shape index: {}]   ;;  %s1566_s6 = inlined_call_operand.hbm [shape: bf16[16,512], index: 6, kind: output, shape index: {0}]   ;;  %s1567_s7 = inlined_call_operand.hbm [shape: f32[16,1], index: 7, kind: output, shape index: {1}]  }
   0x1   :  { %14 = vsyncpa [#allocation10], 0 }
   0x2   :  { %15 = vsyncpa [#allocation13], 0 }
   0x3   :  { %16 = vsyncpa [#allocation16], 0 }
   0x4   :  { %17 = vsyncpa [#allocation8], 0 }
   0x5   :  { %18 = vsyncpa [#allocation19], 0  ;;  %s1282_s24 = smov [#allocation9]   ;;  %s1094_s28 = scalar_lea.hbm %s1561_s1, 32 }
   0x6   :  { %s37_s25 = sshll.u32 %s1282_s24, 4  ;;  %p1095_p0 = scmp.ne.s32.totalorder %s1561_s1, %s1094_s28  ;;  %s38_s25 = int_to_ptr.vmem [resolvable:$true] %s37_s25 }
   0x7   :  { %p1098_p1 = scmp.lt.u32.totalorder %s1094_s28, %s1561_s1 }
   0x9   :  { %p1100_p2 = pnand %p1098_p1, %p1095_p0 }
   0xb   :  { %1103 = shalt.err (!%p1100_p2)
}
   0xc   :  { %s1104_s10 = scalar_lea.vmem %s38_s25, 32  ;;  %p1109_p4 = scmp.lt.s32.totalorder %s38_s25, %s38_s25 }
   0xd   :  { %p1105_p3 = scmp.ne.s32.totalorder %s38_s25, %s1104_s10  ;;  %p1110_p5 = scmp.lt.s32.totalorder %s1104_s10, %s1104_s10 }
   0xf   :  { %p1111_p6 = por %p1110_p5, %p1109_p4 }
  0x11   :  { %p1112_p7 = pnand %p1111_p6, %p1105_p3 }
  0x13   :  { %1115 = shalt.err (!%p1112_p7)
}
  0x14   :  { %40 = dma.hbm_to_vmem [thread:$0]  %s1561_s1, 32, %s38_s25, [#allocation10]  }
  0x15   :  { %s1283_s13 = smov [#allocation12]   ;;  %s1284_s15 = smov [#allocation6]  }
  0x16   :  { %s56_s14 = sshll.u32 %s1283_s13, 4  ;;  %s24_s16 = sshll.u32 %s1284_s15, 4  ;;  %s57_s14 = int_to_ptr.vmem [resolvable:$true] %s56_s14  ;;  %s25_s16 = int_to_ptr.vmem [resolvable:$true] %s24_s16 }
  0x17   :  { %s1116_s19 = scalar_lea.hbm %s1563_s3, 8192 }
  0x18   :  { %p1117_p8 = scmp.ne.s32.totalorder %s1563_s3, %s1116_s19  ;;  %p1120_p9 = scmp.lt.u32.totalorder %s1116_s19, %s1563_s3 }
  0x1a   :  { %p1122_p10 = pnand %p1120_p9, %p1117_p8 }
  0x1c   :  { %1125 = shalt.err (!%p1122_p10)
}
  0x1d   :  { %s1126_s1 = scalar_lea.vmem %s57_s14, 8192  ;;  %p1131_p12 = scmp.lt.s32.totalorder %s57_s14, %s57_s14 }
  0x1e   :  { %p1127_p11 = scmp.ne.s32.totalorder %s57_s14, %s1126_s1  ;;  %p1132_p13 = scmp.lt.s32.totalorder %s1126_s1, %s1126_s1 }
  0x20   :  { %p1133_p0 = por %p1132_p13, %p1131_p12 }
  0x22   :  { %p1134_p1 = pnand %p1133_p0, %p1127_p11 }
  0x24   :  { %1137 = shalt.err (!%p1134_p1)
}
  0x25   :  { %s1285_s24 = smov 256   ;;  %s1286_s25 = smov 16  }
  0x26   :  { %62 = dma.hbm_to_vmem [thread:$0]  %s1563_s3, 8192, %s57_s14, [#allocation13], %s1285_s24, %s1285_s24, %s1286_s25  }
  0x27   :  { %s1138_s30 = scalar_lea.hbm %s1560_s0, 512 }
  0x28   :  { %p1139_p2 = scmp.ne.s32.totalorder %s1560_s0, %s1138_s30  ;;  %p1142_p3 = scmp.lt.u32.totalorder %s1138_s30, %s1560_s0 }
  0x2a   :  { %p1144_p4 = pnand %p1142_p3, %p1139_p2 }
  0x2c   :  { %1147 = shalt.err (!%p1144_p4)
}
  0x2d   :  { %s1148_s12 = scalar_lea.vmem %s25_s16, 512  ;;  %p1153_p6 = scmp.lt.s32.totalorder %s25_s16, %s25_s16 }
  0x2e   :  { %p1149_p5 = scmp.ne.s32.totalorder %s25_s16, %s1148_s12  ;;  %p1154_p7 = scmp.lt.s32.totalorder %s1148_s12, %s1148_s12 }
  0x30   :  { %p1155_p8 = por %p1154_p7, %p1153_p6 }
  0x32   :  { %p1156_p9 = pnand %p1155_p8, %p1149_p5 }
  0x34   :  { %1159 = shalt.err (!%p1156_p9)
}
  0x35   :  { %30 = dma.hbm_to_vmem [thread:$0]  %s1560_s0, 512, %s25_s16, [#allocation7], %s1285_s24, %s1285_s24, %s1286_s25  }
  0x36   :  { %s1287_s14 = smov [#allocation11]   ;;  %s1288_s17 = smov [#allocation14]  }
  0x37   :  { %s47_s15 = sshll.u32 %s1287_s14, 4  ;;  %s68_s18 = sshll.u32 %s1288_s17, 4  ;;  %s48_s15 = int_to_ptr.vmem [resolvable:$true] %s47_s15  ;;  %s69_s18 = int_to_ptr.vmem [resolvable:$true] %s68_s18 }
  0x38   :  { %s1160_s21 = scalar_lea.hbm %s1562_s2, 32 }
  0x39   :  { %p1161_p10 = scmp.ne.s32.totalorder %s1562_s2, %s1160_s21  ;;  %p1164_p11 = scmp.lt.u32.totalorder %s1160_s21, %s1562_s2 }
  0x3b   :  { %p1166_p12 = pnand %p1164_p11, %p1161_p10 }
  0x3d   :  { %1169 = shalt.err (!%p1166_p12)
}
  0x3e   :  { %s1170_s0 = scalar_lea.vmem %s48_s15, 32  ;;  %p1175_p0 = scmp.lt.s32.totalorder %s48_s15, %s48_s15 }
  0x3f   :  { %p1171_p13 = scmp.ne.s32.totalorder %s48_s15, %s1170_s0  ;;  %p1176_p1 = scmp.lt.s32.totalorder %s1170_s0, %s1170_s0 }
  0x41   :  { %p1177_p2 = por %p1176_p1, %p1175_p0 }
  0x43   :  { %p1178_p3 = pnand %p1177_p2, %p1171_p13 }
  0x45   :  { %1181 = shalt.err (!%p1178_p3)
}
  0x46   :  { %50 = dma.hbm_to_vmem [thread:$0]  %s1562_s2, 32, %s48_s15, [#allocation10]  }
  0x47   :  { %s1182_s30 = scalar_lea.hbm %s1564_s4, 256 }
  0x48   :  { %p1183_p4 = scmp.ne.s32.totalorder %s1564_s4, %s1182_s30  ;;  %p1186_p5 = scmp.lt.u32.totalorder %s1182_s30, %s1564_s4 }
  0x4a   :  { %p1188_p6 = pnand %p1186_p5, %p1183_p4 }
  0x4c   :  { %1191 = shalt.err (!%p1188_p6)
}
  0x4d   :  { %s1192_s12 = scalar_lea.vmem %s69_s18, 256  ;;  %p1197_p8 = scmp.lt.s32.totalorder %s69_s18, %s69_s18 }
  0x4e   :  { %p1193_p7 = scmp.ne.s32.totalorder %s69_s18, %s1192_s12  ;;  %p1198_p9 = scmp.lt.s32.totalorder %s1192_s12, %s1192_s12 }
  0x50   :  { %p1199_p10 = por %p1198_p9, %p1197_p8 }
  0x52   :  { %p1200_p11 = pnand %p1199_p10, %p1193_p7 }
  0x54   :  { %1203 = shalt.err (!%p1200_p11)
}
  0x55   :  { %s1289_s2 = smov 128   ;;  %s1290_s3 = smov 8  }
  0x56   :  { %74 = dma.hbm_to_vmem [thread:$0]  %s1564_s4, 256, %s69_s18, [#allocation13], %s1289_s2, %s1289_s2, %s1290_s3  }
  0x57   :  { %s1291_s15 = smov [#allocation15]   ;;  %s1204_s21 = scalar_lea.hbm %s1565_s5, 256 }
  0x58   :  { %s80_s17 = sshll.u32 %s1291_s15, 4  ;;  %p1205_p12 = scmp.ne.s32.totalorder %s1565_s5, %s1204_s21  ;;  %s81_s17 = int_to_ptr.vmem [resolvable:$true] %s80_s17 }
  0x59   :  { %p1208_p13 = scmp.lt.u32.totalorder %s1204_s21, %s1565_s5 }
  0x5b   :  { %p1210_p0 = pnand %p1208_p13, %p1205_p12 }
  0x5d   :  { %1213 = shalt.err (!%p1210_p0)
}
  0x5e   :  { %s1214_s0 = scalar_lea.vmem %s81_s17, 256  ;;  %p1219_p2 = scmp.lt.s32.totalorder %s81_s17, %s81_s17 }
  0x5f   :  { %p1215_p1 = scmp.ne.s32.totalorder %s81_s17, %s1214_s0  ;;  %p1220_p3 = scmp.lt.s32.totalorder %s1214_s0, %s1214_s0 }
  0x61   :  { %p1221_p4 = por %p1220_p3, %p1219_p2 }
  0x63   :  { %p1222_p5 = pnand %p1221_p4, %p1215_p1 }
  0x65   :  { %1225 = shalt.err (!%p1222_p5)
}
  0x66   :  { %86 = dma.hbm_to_vmem [thread:$0]  %s1565_s5, 256, %s81_s17, [#allocation16], %s1289_s2, %s1289_s2, %s1290_s3  }
  0x67   :  { %1270 = dma.done.wait [#allocation7], 512  }
  0x68   :  { %1271 = vsyncadd [#allocation7], 4294966784 }
  0x69   :  { %1272 = dma.done.wait [#allocation10], 64  }
  0x6a   :  { %1273 = vsyncadd [#allocation10], 4294967232 }
  0x6b   :  { %1274 = dma.done.wait [#allocation13], 8448  }
  0x6c   :  { %1275 = vsyncadd [#allocation13], 4294958848 }
  0x6d   :  { %1276 = dma.done.wait [#allocation16], 256  }
  0x6e   :  { %1277 = vsyncadd [#allocation16], 4294967040  ;;  %v1422_v0 = vld [vmem:[#allocation6] sm:$0xff]  ;;  %v1424_v1 = vld [vmem:[#allocation6 + $0x8] sm:$0xff]  ;;  %vm182_vm0 = vcmask 7168   ;;  %s1296_s5 = smov [#allocation17]  }
  0x6f   :  { %v1426_v2 = vld [vmem:[#allocation6 + $0x10] sm:$0xff]  ;;  %v113_v3 = vadd.f32 %v1424_v1, %v1422_v0  ;;  %v1430_v4 = vld [vmem:[#allocation6 + $0x18] sm:$0xff]  ;;  %s855_s16 = sshll.u32 %s1296_s5, 4  ;;  %s856_s16 = int_to_ptr.vmem [resolvable:$true] %s855_s16 }
  0x70   :  { %v116_v5 = vadd.f32 %v1430_v4, %v1426_v2  ;;  %v974_v6 = vld [vmem:[#allocation12 + $0x4] ss:$16 sps:$4 sm:$0xff]   ;;  %v976_v7 = vld [vmem:[#allocation12 + $0xc] ss:$16 sps:$4 sm:$0xff]   ;;  %v978_v8 = vld [vmem:[#allocation12] ss:$16 sps:$4 sm:$0xff]   ;;  %p1231_p7 = scmp.lt.s32.totalorder %s856_s16, %s856_s16 }
  0x71   :  { %114 = vadd.xlane.f32.xlu0 %v113_v3  ;;  %v979_v9 = vld [vmem:[#allocation12 + $0x8] ss:$16 sps:$4 sm:$0xff]   ;;  %v980_v10 = vld [vmem:[#allocation12 + $0x24] ss:$16 sps:$4 sm:$0xff]   ;;  %v982_v11 = vld [vmem:[#allocation12 + $0x2c] ss:$16 sps:$4 sm:$0xff]   ;;  %575 = vmatprep.subr.bf16.mxu0 %v974_v6 }
  0x72   :  { %618 = vmatprep.subr.bf16.mxu1 %v976_v7  ;;  %576 = vmatpush1.bf16.msra.mxu0 %v978_v8  ;;  %v984_v12 = vld [vmem:[#allocation12 + $0x20] ss:$16 sps:$4 sm:$0xff]   ;;  %v985_v13 = vld [vmem:[#allocation12 + $0x28] ss:$16 sps:$4 sm:$0xff]   ;;  %v986_v14 = vld [vmem:[#allocation12 + $0x44] ss:$16 sps:$4 sm:$0xff]  }
  0x73   :  { %619 = vmatpush1.bf16.msra.mxu1 %v979_v9  ;;  %577 = vmatprep.subr.bf16.mxu0 %v980_v10  ;;  %v988_v15 = vld [vmem:[#allocation12 + $0x4c] ss:$16 sps:$4 sm:$0xff]   ;;  %v990_v16 = vld [vmem:[#allocation12 + $0x40] ss:$16 sps:$4 sm:$0xff]   ;;  %v991_v17 = vld [vmem:[#allocation12 + $0x48] ss:$16 sps:$4 sm:$0xff]  }
  0x74   :  { %620 = vmatprep.subr.bf16.mxu1 %v982_v11  ;;  %v992_v18 = vld [vmem:[#allocation12 + $0x64] ss:$16 sps:$4 sm:$0xff]   ;;  %v994_v19 = vld [vmem:[#allocation12 + $0x6c] ss:$16 sps:$4 sm:$0xff]   ;;  %v996_v20 = vld [vmem:[#allocation12 + $0x60] ss:$16 sps:$4 sm:$0xff]  }
  0x75   :  { %117 = vadd.xlane.f32.xlu0 %v116_v5  ;;  %v997_v21 = vld [vmem:[#allocation12 + $0x68] ss:$16 sps:$4 sm:$0xff]   ;;  %v998_v22 = vld [vmem:[#allocation12 + $0x84] ss:$16 sps:$4 sm:$0xff]   ;;  %v1000_v23 = vld [vmem:[#allocation12 + $0x8c] ss:$16 sps:$4 sm:$0xff]  }
  0x76   :  { %578 = vmatpush1.bf16.msra.mxu0 %v984_v12  ;;  %v1002_v24 = vld [vmem:[#allocation12 + $0x80] ss:$16 sps:$4 sm:$0xff]   ;;  %v1003_v25 = vld [vmem:[#allocation12 + $0x88] ss:$16 sps:$4 sm:$0xff]   ;;  %v1004_v26 = vld [vmem:[#allocation12 + $0xa4] ss:$16 sps:$4 sm:$0xff]  }
  0x77   :  { %621 = vmatpush1.bf16.msra.mxu1 %v985_v13  ;;  %579 = vmatprep.subr.bf16.mxu0 %v986_v14  ;;  %v1006_v27 = vld [vmem:[#allocation12 + $0xac] ss:$16 sps:$4 sm:$0xff]   ;;  %v1008_v28 = vld [vmem:[#allocation12 + $0xa0] ss:$16 sps:$4 sm:$0xff]   ;;  %v1009_v29 = vld [vmem:[#allocation12 + $0xa8] ss:$16 sps:$4 sm:$0xff]  }
  0x78   :  { %622 = vmatprep.subr.bf16.mxu1 %v988_v15  ;;  %v1010_v30 = vld [vmem:[#allocation12 + $0xc4] ss:$16 sps:$4 sm:$0xff]   ;;  %v1012_v31 = vld [vmem:[#allocation12 + $0xcc] ss:$16 sps:$4 sm:$0xff]   ;;  %v1014_v32 = vld [vmem:[#allocation12 + $0xc0] ss:$16 sps:$4 sm:$0xff]  }
  0x79   :  { %v1015_v33 = vld [vmem:[#allocation12 + $0xc8] ss:$16 sps:$4 sm:$0xff]   ;;  %v1016_v34 = vld [vmem:[#allocation12 + $0xe4] ss:$16 sps:$4 sm:$0xff]   ;;  %v1018_v35 = vld [vmem:[#allocation12 + $0xec] ss:$16 sps:$4 sm:$0xff]  }
  0x7a   :  { %580 = vmatpush1.bf16.msra.mxu0 %v990_v16  ;;  %v1020_v36 = vld [vmem:[#allocation12 + $0xe0] ss:$16 sps:$4 sm:$0xff]   ;;  %v1021_v37 = vld [vmem:[#allocation12 + $0xe8] ss:$16 sps:$4 sm:$0xff]   ;;  %v1022_v38 = vld [vmem:[#allocation12 + $0x104] ss:$16 sps:$4 sm:$0xff]  }
  0x7b   :  { %623 = vmatpush1.bf16.msra.mxu1 %v991_v17  ;;  %581 = vmatprep.subr.bf16.mxu0 %v992_v18  ;;  %v1024_v39 = vld [vmem:[#allocation12 + $0x10c] ss:$16 sps:$4 sm:$0xff]   ;;  %v1026_v40 = vld [vmem:[#allocation12 + $0x100] ss:$16 sps:$4 sm:$0xff]   ;;  %v1027_v41 = vld [vmem:[#allocation12 + $0x108] ss:$16 sps:$4 sm:$0xff]  }
  0x7c   :  { %624 = vmatprep.subr.bf16.mxu1 %v994_v19  ;;  %v1028_v56 = vld [vmem:[#allocation12 + $0x124] ss:$16 sps:$4 sm:$0xff]   ;;  %v1030_v57 = vld [vmem:[#allocation12 + $0x12c] ss:$16 sps:$4 sm:$0xff]   ;;  %v1032_v58 = vld [vmem:[#allocation12 + $0x120] ss:$16 sps:$4 sm:$0xff]  }
  0x7d   :  { %v1033_v59 = vld [vmem:[#allocation12 + $0x128] ss:$16 sps:$4 sm:$0xff]   ;;  %v1034_v60 = vld [vmem:[#allocation12 + $0x144] ss:$16 sps:$4 sm:$0xff]   ;;  %v1036_v61 = vld [vmem:[#allocation12 + $0x14c] ss:$16 sps:$4 sm:$0xff]  }
  0x7e   :  { %582 = vmatpush1.bf16.msra.mxu0 %v996_v20  ;;  %v1038_v62 = vld [vmem:[#allocation12 + $0x140] ss:$16 sps:$4 sm:$0xff]   ;;  %v1039_v63 = vld [vmem:[#allocation12 + $0x148] ss:$16 sps:$4 sm:$0xff]   ;;  %v1048_v5 = vld [vmem:[#allocation12 + $0x18c] ss:$16 sps:$4 sm:$0xff]  }
  0x7f   :  { %625 = vmatpush1.bf16.msra.mxu1 %v997_v21  ;;  %583 = vmatprep.subr.bf16.mxu0 %v998_v22  ;;  %v1045_v3 = vld [vmem:[#allocation12 + $0x168] ss:$16 sps:$4 sm:$0xff]   ;;  %v1050_v6 = vld [vmem:[#allocation12 + $0x180] ss:$16 sps:$4 sm:$0xff]   ;;  %v1052_v8 = vld [vmem:[#allocation12 + $0x1a4] ss:$16 sps:$4 sm:$0xff]  }
  0x80   :  { %626 = vmatprep.subr.bf16.mxu1 %v1000_v23  ;;  %v1051_v7 = vld [vmem:[#allocation12 + $0x188] ss:$16 sps:$4 sm:$0xff]   ;;  %v1054_v9 = vld [vmem:[#allocation12 + $0x1ac] ss:$16 sps:$4 sm:$0xff]   ;;  %v1056_v10 = vld [vmem:[#allocation12 + $0x1a0] ss:$16 sps:$4 sm:$0xff]  }
  0x81   :  { %v1057_v11 = vld [vmem:[#allocation12 + $0x1a8] ss:$16 sps:$4 sm:$0xff]   ;;  %v1058_v12 = vld [vmem:[#allocation12 + $0x1c4] ss:$16 sps:$4 sm:$0xff]   ;;  %v1060_v13 = vld [vmem:[#allocation12 + $0x1cc] ss:$16 sps:$4 sm:$0xff]  }
  0x82   :  { %584 = vmatpush1.bf16.msra.mxu0 %v1002_v24  ;;  %v1062_v14 = vld [vmem:[#allocation12 + $0x1c0] ss:$16 sps:$4 sm:$0xff]   ;;  %v1063_v15 = vld [vmem:[#allocation12 + $0x1c8] ss:$16 sps:$4 sm:$0xff]   ;;  %v1064_v16 = vld [vmem:[#allocation12 + $0x1e4] ss:$16 sps:$4 sm:$0xff]   ;;  %v148_v24 = vlaneseq }
  0x83   :  { %627 = vmatpush1.bf16.msra.mxu1 %v1003_v25  ;;  %585 = vmatprep.subr.bf16.mxu0 %v1004_v26  ;;  %v1066_v17 = vld [vmem:[#allocation12 + $0x1ec] ss:$16 sps:$4 sm:$0xff]   ;;  %v1068_v18 = vld [vmem:[#allocation12 + $0x1e0] ss:$16 sps:$4 sm:$0xff]   ;;  %v1069_v19 = vld [vmem:[#allocation12 + $0x1e8] ss:$16 sps:$4 sm:$0xff]  }
  0x84   :  { %628 = vmatprep.subr.bf16.mxu1 %v1006_v27  ;;  %v149_v27 = vshrl.u32 %v148_v24, 7  ;;  %s1226_s27 = scalar_lea.vmem %s856_s16, 512 }
  0x85   :  { %p1227_p6 = scmp.ne.s32.totalorder %s856_s16, %s1226_s27  ;;  %p1232_p8 = scmp.lt.s32.totalorder %s1226_s27, %s1226_s27 }
  0x86   :  { %586 = vmatpush1.bf16.msra.mxu0 %v1008_v28  ;;  %v150_v28 = vsub.s32 0, %v149_v27 }
  0x87   :  { %629 = vmatpush1.bf16.msra.mxu1 %v1009_v29  ;;  %587 = vmatprep.subr.bf16.mxu0 %v1010_v30  ;;  %v154_v29 = vsub.s32 1, %v149_v27  ;;  %v146_v30 = vld [vmem:[#allocation9] sm:$0x3]  ;;  %p1233_p9 = por %p1232_p8, %p1231_p7 }
  0x88   :  { %630 = vmatprep.subr.bf16.mxu1 %v1012_v31 }
  0x89   :  { %p1234_p10 = pnand %p1233_p9, %p1227_p6 }
  0x8a   :  { %588 = vmatpush1.bf16.msra.mxu0 %v1014_v32 }
  0x8b   :  { %631 = vmatpush1.bf16.msra.mxu1 %v1015_v33  ;;  %589 = vmatprep.subr.bf16.mxu0 %v1016_v34  ;;  %v151_v33 = vrot.slane %v146_v30, %v150_v28  ;;  %v155_v34 = vrot.slane %v146_v30, %v154_v29 }
  0x8c   :  { %632 = vmatprep.subr.bf16.mxu1 %v1018_v35  ;;  %v162_v35 = vld [vmem:[#allocation11] sm:$0x3] }
  0x8e   :  { %590 = vmatpush1.bf16.msra.mxu0 %v1020_v36 }
  0x8f   :  { %633 = vmatpush1.bf16.msra.mxu1 %v1021_v37  ;;  %591 = vmatprep.subr.bf16.mxu0 %v1022_v38  ;;  %v167_v38 = vrot.slane %v162_v35, %v150_v28 }
  0x90   :  { %634 = vmatprep.subr.bf16.mxu1 %v1024_v39  ;;  %v171_v39 = vrot.slane %v162_v35, %v154_v29 }
  0x92   :  { %592 = vmatpush1.bf16.msra.mxu0 %v1026_v40 }
  0x93   :  { %635 = vmatpush1.bf16.msra.mxu1 %v1027_v41  ;;  %593 = vmatprep.subr.bf16.mxu0 %v1028_v56 }
  0x94   :  { %636 = vmatprep.subr.bf16.mxu1 %v1030_v57 }
  0x96   :  { %594 = vmatpush1.bf16.msra.mxu0 %v1032_v58 }
  0x97   :  { %637 = vmatpush1.bf16.msra.mxu1 %v1033_v59  ;;  %595 = vmatprep.subr.bf16.mxu0 %v1034_v60 }
  0x98   :  { %638 = vmatprep.subr.bf16.mxu1 %v1036_v61 }
  0x9a   :  { %596 = vmatpush1.bf16.msra.mxu0 %v1038_v62 }
  0x9b   :  { %639 = vmatpush1.bf16.msra.mxu1 %v1039_v63 }
  0xfe   :  { %v115_v42 = vpop.xlane.xlu0 %114 }
  0xff   :  { %v120_v43 = vmul.f32 0.00390625, %v115_v42 }
 0x101   :  { %v1435_v44 = vsub.f32 %v1422_v0, %v120_v43  ;;  %v1438_v45 = vsub.f32 %v1424_v1, %v120_v43  ;;  %v1040_v0 = vld [vmem:[#allocation12 + $0x164] ss:$16 sps:$4 sm:$0xff]   ;;  %v1042_v1 = vld [vmem:[#allocation12 + $0x16c] ss:$16 sps:$4 sm:$0xff]  }
 0x102   :  { %v118_v46 = vpop.xlane.xlu0 %117  ;;  %597 = vmatprep.subr.bf16.mxu0 %v1040_v0  ;;  %640 = vmatprep.subr.bf16.mxu1 %v1042_v1 }
 0x103   :  { %v121_v47 = vmul.f32 0.00390625, %v118_v46  ;;  %v126_v48 = vmul.f32 %v1435_v44, %v1435_v44  ;;  %v127_v49 = vmul.f32 %v1438_v45, %v1438_v45  ;;  %641 = vmatpush1.bf16.msra.mxu1 %v1045_v3 }
 0x104   :  { %642 = vmatprep.subr.bf16.mxu1 %v1048_v5  ;;  %v1293_v5 = vmov 0  }
 0x105   :  { %v1445_v50 = vsub.f32 %v1426_v2, %v121_v47  ;;  %v1448_v51 = vsub.f32 %v1430_v4, %v121_v47  ;;  %v130_v52 = vadd.f32 %v127_v49, %v126_v48  ;;  %v1044_v2 = vld [vmem:[#allocation12 + $0x160] ss:$16 sps:$4 sm:$0xff]   ;;  %v1046_v4 = vld [vmem:[#allocation12 + $0x184] ss:$16 sps:$4 sm:$0xff]   ;;  %972 = vset.pattern.permute.xlu0 %v1293_v5  ;;  %973 = vset.pattern.permute.xlu1 %v1293_v5 }
 0x106   :  { %598 = vmatpush1.bf16.msra.mxu0 %v1044_v2 }
 0x107   :  { %131 = vadd.xlane.f32.xlu1 %v130_v52  ;;  %v128_v53 = vmul.f32 %v1445_v50, %v1445_v50  ;;  %v129_v54 = vmul.f32 %v1448_v51, %v1448_v51  ;;  %599 = vmatprep.subr.bf16.mxu0 %v1046_v4 }
 0x108   :  { %643 = vmatpush1.bf16.msra.mxu1 %v1051_v7 }
 0x109   :  { %v133_v55 = vadd.f32 %v129_v54, %v128_v53  ;;  %644 = vmatprep.subr.bf16.mxu1 %v1054_v9 }
 0x10a   :  { %600 = vmatpush1.bf16.msra.mxu0 %v1050_v6  ;;  %v1294_v6 = vmov 0.0  }
 0x10b   :  { %134 = vadd.xlane.f32.xlu1 %v133_v55  ;;  %601 = vmatprep.subr.bf16.mxu0 %v1052_v8  ;;  %185 = vst.msk [vmem:[#allocation4] sm:$0xff] %vm182_vm0, %v1294_v6  ;;  %186 = vst.msk [vmem:[#allocation4 + $0x8] sm:$0xff] %vm182_vm0, %v1294_v6 }
 0x10c   :  { %645 = vmatpush1.bf16.msra.mxu1 %v1057_v11  ;;  %187 = vst.msk [vmem:[#allocation5] sm:$0xff] %vm182_vm0, %v1294_v6  ;;  %188 = vst.msk [vmem:[#allocation5 + $0x8] sm:$0xff] %vm182_vm0, %v1294_v6 }
 0x10d   :  { %646 = vmatprep.subr.bf16.mxu1 %v1060_v13 }
 0x10e   :  { %602 = vmatpush1.bf16.msra.mxu0 %v1056_v10 }
 0x10f   :  { %603 = vmatprep.subr.bf16.mxu0 %v1058_v12 }
 0x110   :  { %647 = vmatpush1.bf16.msra.mxu1 %v1063_v15  ;;  %v787_v15 = vld [vmem:[#allocation14] sm:$0xff] }
 0x111   :  { %648 = vmatprep.subr.bf16.mxu1 %v1066_v17  ;;  %v663_v17 = vand.u32 127, %v148_v24 }
 0x112   :  { %604 = vmatpush1.bf16.msra.mxu0 %v1062_v14 }
 0x113   :  { %605 = vmatprep.subr.bf16.mxu0 %v1064_v16  ;;  %v788_v16 = vld [vmem:[#allocation14 + $0x8] sm:$0xff]  ;;  %v666_v24 = vadd.s32 384, %v663_v17 }
 0x114   :  { %649 = vmatpush1.bf16.msra.mxu1 %v1069_v19 }
 0x116   :  { %606 = vmatpush1.bf16.msra.mxu0 %v1068_v18 }
 0x194   :  { %v132_v20 = vpop.xlane.xlu1 %131 }
 0x195   :  { %v136_v21 = vmul.f32 0.00390625, %v132_v20 }
 0x197   :  { %v138_v22 = vadd.f32 1e-05, %v136_v21 }
 0x198   :  { %v135_v23 = vpop.xlane.xlu1 %134 }
 0x199   :  { %1070 = vrsqrt.f32 %v138_v22  ;;  %v137_v25 = vmul.f32 0.00390625, %v135_v23  ;;  %v664_v23 = vadd.s32 128, %v663_v17 }
 0x19b   :  { %v139_v26 = vadd.f32 1e-05, %v137_v25  ;;  %v665_v25 = vadd.s32 256, %v663_v17 }
 0x19d   :  { %1072 = vrsqrt.f32 %v139_v26 }
 0x1a3   :  { %v1071_v31 = vpop.eup %1070 }
 0x1a4   :  { %v143_v32 = vmul.f32 %v1071_v31, %v1438_v45  ;;  %v142_v36 = vmul.f32 %v1071_v31, %v1435_v44  ;;  %v1292_v44 = vmov -1e+30  }
 0x1a5   :  { %183 = vst.msk [vmem:[#allocation3] sm:$0xff] %vm182_vm0, %v1292_v44  ;;  %184 = vst.msk [vmem:[#allocation3 + $0x8] sm:$0xff] %vm182_vm0, %v1292_v44 }
 0x1a6   :  { %v159_v41 = vmul.f32 %v155_v34, %v143_v32  ;;  %v158_v43 = vmul.f32 %v151_v33, %v142_v36 }
 0x1a7   :  { %v1073_v37 = vpop.eup %1072 }
 0x1a8   :  { %v145_v40 = vmul.f32 %v1073_v37, %v1448_v51  ;;  %v144_v42 = vmul.f32 %v1073_v37, %v1445_v50  ;;  %v175_v48 = vadd.f32 %v171_v39, %v159_v41  ;;  %v174_v52 = vadd.f32 %v167_v38, %v158_v43 }
 0x1aa   :  { %v161_v46 = vmul.f32 %v155_v34, %v145_v40  ;;  %v160_v47 = vmul.f32 %v151_v33, %v144_v42 }
 0x1ac   :  { %v177_v49 = vadd.f32 %v171_v39, %v161_v46  ;;  %v176_v45 = vadd.f32 %v167_v38, %v160_v47  ;;  %v1485_v7 = vld [vmem:[#allocation3] sm:$0xff]  ;;  %v1487_v9 = vld [vmem:[#allocation3 + $0x8] sm:$0xff] }
 0x1ae   :  { %v179_v53 = vpack.c.bf16 %v177_v49, %v175_v48  ;;  %v178_v54 = vpack.c.bf16 %v176_v45, %v174_v52 }
 0x1b0   :  { %607 = vmatprep.mubr.bf16.mxu0 %v179_v53  ;;  %650 = vmatprep.mubr.bf16.mxu1 %v179_v53 }
 0x1b1   :  { %608 = vmatmul.mubr.bf16.vlgmr.msra.gmra.mrb[0].mxu0 %v178_v54  ;;  %651 = vmatmul.mubr.bf16.vlgmr.msra.gmra.mrb[0].mxu1 %v178_v54 }
 0x284   :  { %v1461_v50 = vpop.f32.mrb[0].mxu0  ;;  %v652_v51 = vpop.f32.mrb[0].mxu1 }
 0x285   :  { %v1463_v55 = vpop.f32.mrb[1].mxu0  ;;  %v654_v56 = vpop.f32.mrb[1].mxu1  ;;  %v714_v57 = vmax.f32 %v1461_v50, -1e+30 }
 0x286   :  { %v954_v58 = vpack.c.bf16 %v1463_v55, %v1461_v50  ;;  %v1468_v59 = vpop.f32.mrb[2].mxu0  ;;  %v656_v60 = vpop.f32.mrb[2].mxu1  ;;  %v715_v61 = vmax.f32 %v1463_v55, -1e+30 }
 0x287   :  { %v1471_v62 = vpop.f32.mrb[3].mxu0  ;;  %v658_v63 = vpop.f32.mrb[3].mxu1  ;;  %v719_v0 = vmax.f32 %v1468_v59, -1e+30 }
 0x288   :  { %708 = vst [vmem:[#allocation17] sm:$0xff] %v954_v58  ;;  %v955_v1 = vpack.c.bf16 %v1471_v62, %v1468_v59  ;;  %v716_v2 = vmax.f32 %v714_v57, %v715_v61  ;;  %v720_v3 = vmax.f32 %v1471_v62, -1e+30  ;;  %v1295_v63 = vmov -1.00025555e+30|-1.00025555e+30  }
 0x28a   :  { %710 = vst [vmem:[#allocation17 + $0x10] sm:$0xff] %v955_v1  ;;  %717 = vmax.xlane.f32.xlu0 %v716_v2  ;;  %v721_v4 = vmax.f32 %v719_v0, %v720_v3  ;;  %v951_v0 = vcombine.low %v1295_v63, %v1295_v63  ;;  %v953_v1 = vcombine.high %v1295_v63, %v1295_v63 }
 0x28c   :  { %722 = vmax.xlane.f32.xlu1 %v721_v4  ;;  %709 = vst [vmem:[#allocation17 + $0x8] sm:$0xff] %v951_v0  ;;  %711 = vst [vmem:[#allocation17 + $0x18] sm:$0xff] %v953_v1 }
 0x317   :  { %v718_v8 = vpop.xlane.xlu0 %717 }
 0x318   :  { %v1490_v10 = vmax.f32 %v1485_v7, %v718_v8 }
 0x319   :  { %v723_v11 = vpop.xlane.xlu1 %722 }
 0x31a   :  { %v728_v12 = vsub.f32 %v1485_v7, %v1490_v10  ;;  %785 = vst.msk [vmem:[#allocation3] sm:$0xff] %vm182_vm0, %v1490_v10  ;;  %v1497_v13 = vmax.f32 %v1487_v9, %v723_v11  ;;  %738 = vperm.xlu0 %972, %v1490_v10  }
 0x31c   :  { %v729_v14 = vsub.f32 %v1487_v9, %v1497_v13  ;;  %786 = vst.msk [vmem:[#allocation3 + $0x8] sm:$0xff] %vm182_vm0, %v1497_v13  ;;  %743 = vperm.xlu1 %973, %v1497_v13  }
 0x320   :  { %790 = vperm.xlu1 %973, %v787_v15  }
 0x324   :  { %793 = vperm.xlu1 %973, %v788_v16  }
 0x399   :  { %v739_v18 = vpop.permute.xlu0 %738 }
 0x39a   :  { %v746_v19 = vsub.f32 %v1461_v50, %v739_v18  ;;  %v747_v20 = vsub.f32 %v1463_v55, %v739_v18  ;;  %v748_v21 = vsub.f32 -1e+30, %v739_v18 }
 0x39b   :  { %v744_v22 = vpop.permute.xlu1 %743 }
 0x39c   :  { %v754_v26 = vmul.f32 1.442695, %v746_v19  ;;  %v756_v27 = vmul.f32 1.442695, %v747_v20  ;;  %v758_v28 = vmul.f32 1.442695, %v748_v21  ;;  %v750_v29 = vsub.f32 %v1468_v59, %v744_v22 }
 0x39d   :  { %v751_v30 = vsub.f32 %v1471_v62, %v744_v22  ;;  %v752_v31 = vsub.f32 -1e+30, %v744_v22 }
 0x39e   :  { %1074 = vpow2.f32 %v754_v26  ;;  %v762_v32 = vmul.f32 1.442695, %v750_v29 }
 0x39f   :  { %1076 = vpow2.f32 %v756_v27  ;;  %v764_v33 = vmul.f32 1.442695, %v751_v30  ;;  %v766_v34 = vmul.f32 1.442695, %v752_v31  ;;  %v791_v35 = vpop.permute.xlu1 %790 }
 0x3a0   :  { %1078 = vpow2.f32 %v758_v28  ;;  %vm795_vm1 = vcmp.eq.s32.totalorder %v663_v17, %v791_v35  ;;  %vm796_vm2 = vcmp.eq.s32.totalorder %v664_v23, %v791_v35  ;;  %vm797_vm3 = vcmp.eq.s32.totalorder %v665_v25, %v791_v35 }
 0x3a1   :  { %1080 = vpow2.f32 %v762_v32  ;;  %v805_v36 = vsel %vm795_vm1, %v1461_v50, 0.0  ;;  %v806_v37 = vsel %vm796_vm2, %v1463_v55, 0.0  ;;  %vm798_vm4 = vcmp.eq.s32.totalorder %v666_v24, %v791_v35 }
 0x3a2   :  { %1082 = vpow2.f32 %v764_v33  ;;  %v813_v38 = vadd.f32 %v806_v37, %v805_v36  ;;  %v807_v40 = vsel %vm797_vm3, -1e+30, %v1294_v6  ;;  %v808_v42 = vsel %vm798_vm4, -1e+30, %v1294_v6 }
 0x3a3   :  { %1084 = vpow2.f32 %v766_v34  ;;  %v794_v39 = vpop.permute.xlu1 %793 }
 0x3a4   :  { %vm799_vm5 = vcmp.eq.s32.totalorder %v663_v17, %v794_v39  ;;  %vm800_vm6 = vcmp.eq.s32.totalorder %v664_v23, %v794_v39  ;;  %v814_v41 = vadd.f32 %v813_v38, %v807_v40  ;;  %vm801_vm7 = vcmp.eq.s32.totalorder %v665_v25, %v794_v39 }
 0x3a5   :  { %v809_v43 = vsel %vm799_vm5, %v1468_v59, 0.0  ;;  %v810_v46 = vsel %vm800_vm6, %v1471_v62, 0.0  ;;  %vm802_vm8 = vcmp.eq.s32.totalorder %v666_v24, %v794_v39  ;;  %v811_v49 = vsel %vm801_vm7, -1e+30, %v1294_v6 }
 0x3a6   :  { %v815_v47 = vadd.f32 %v814_v41, %v808_v42  ;;  %v818_v48 = vadd.f32 %v810_v46, %v809_v43  ;;  %v812_v54 = vsel %vm802_vm8, -1e+30, %v1294_v6 }
 0x3a8   :  { %v1075_v52 = vpop.eup %1074  ;;  %v819_v45 = vadd.f32 %v818_v48, %v811_v49 }
 0x3a9   :  { %v1077_v53 = vpop.eup %1076 }
 0x3aa   :  { %v1079_v44 = vpop.eup %1078  ;;  %v770_v50 = vadd.f32 %v1077_v53, %v1075_v52  ;;  %v820_v51 = vadd.f32 %v819_v45, %v812_v54 }
 0x3ab   :  { %v1081_v55 = vpop.eup %1080 }
 0x3ac   :  { %v1083_v56 = vpop.eup %1082  ;;  %v771_v57 = vadd.f32 %v1079_v44, %v770_v50 }
 0x3ad   :  { %v1085_v58 = vpop.eup %1084  ;;  %v775_v59 = vadd.f32 %v1083_v56, %v1081_v55 }
 0x3ae   :  { %v772_v60 = vadd.f32 %v1079_v44, %v771_v57 }
 0x3af   :  { %v776_v61 = vadd.f32 %v1085_v58, %v775_v59 }
 0x3b0   :  { %773 = vadd.xlane.f32.xlu1 %v772_v60 }
 0x3b1   :  { %v777_v62 = vadd.f32 %v1085_v58, %v776_v61 }
 0x3b3   :  { %778 = vadd.xlane.f32.xlu0 %v777_v62 }
 0x3b4   :  { %816 = vadd.xlane.f32.xlu1 %v815_v47 }
 0x3b8   :  { %821 = vadd.xlane.f32.xlu1 %v820_v51 }
 0x3b9   :  { %1237 = shalt.err (!%p1234_p10)
}
 0x3ba   :  { %s1238_s30 = scalar_lea.hbm %s1566_s6, 512 }
 0x3bb   :  { %p1239_p11 = scmp.ne.s32.totalorder %s1566_s6, %s1238_s30  ;;  %p1242_p12 = scmp.lt.u32.totalorder %s1238_s30, %s1566_s6 }
 0x3bd   :  { %p1244_p13 = pnand %p1242_p12, %p1239_p11 }
 0x3bf   :  { %1247 = shalt.err (!%p1244_p13)
}
 0x3c0   :  { %861 = dma.vmem_to_hbm [thread:$0]  %s856_s16, 512, %s1566_s6, [#allocation8], %s1285_s24, %s1285_s24, %s1286_s25   ;;  %v730_v2 = vmul.f32 1.442695, %v728_v12  ;;  %v732_v3 = vmul.f32 1.442695, %v729_v14 }
 0x3c1   :  { %v726_v5 = vld [vmem:[#allocation4] sm:$0xff]  ;;  %v727_v11 = vld [vmem:[#allocation4 + $0x8] sm:$0xff]  ;;  %v803_v18 = vld [vmem:[#allocation5] sm:$0xff]  ;;  %s1297_s6 = smov [#allocation18]  }
 0x3c2   :  { %1086 = vpow2.f32 %v730_v2  ;;  %v804_v9 = vld [vmem:[#allocation5 + $0x8] sm:$0xff]  ;;  %v830_v25 = vld [vmem:[#allocation3] sm:$0xff]  ;;  %s867_s24 = sshll.u32 %s1297_s6, 4  ;;  %s868_s24 = int_to_ptr.vmem [resolvable:$true] %s867_s24 }
 0x3c3   :  { %1088 = vpow2.f32 %v732_v3  ;;  %v844_v30 = vld [vmem:[#allocation15] sm:$0xff]  ;;  %v845_v34 = vld [vmem:[#allocation15 + $0x8] sm:$0xff]  ;;  %s1248_s25 = scalar_lea.vmem %s868_s24, 256  ;;  %p1253_p1 = scmp.lt.s32.totalorder %s868_s24, %s868_s24 }
 0x3c4   :  { %v831_v31 = vld [vmem:[#allocation3 + $0x8] sm:$0xff]  ;;  %p1249_p0 = scmp.ne.s32.totalorder %s868_s24, %s1248_s25  ;;  %p1254_p2 = scmp.lt.s32.totalorder %s1248_s25, %s1248_s25 }
 0x3c6   :  { %p1255_p3 = por %p1254_p2, %p1253_p1 }
 0x3c8   :  { %p1256_p4 = pnand %p1255_p3, %p1249_p0 }
 0x3cc   :  { %v1087_v4 = vpop.eup %1086 }
 0x3cd   :  { %v1089_v6 = vpop.eup %1088  ;;  %v734_v8 = vmul.f32 %v1087_v4, %v726_v5 }
 0x3ce   :  { %v735_v17 = vmul.f32 %v1089_v6, %v727_v11 }
 0x43d   :  { %v774_v15 = vpop.xlane.xlu1 %773 }
 0x43e   :  { %v780_v16 = vadd.f32 %v774_v15, %v734_v8 }
 0x440   :  { %783 = vst.msk [vmem:[#allocation4] sm:$0xff] %vm182_vm0, %v780_v16  ;;  %v779_v19 = vpop.xlane.xlu0 %778 }
 0x441   :  { %v781_v7 = vadd.f32 %v779_v19, %v735_v17  ;;  %v817_v10 = vpop.xlane.xlu1 %816 }
 0x442   :  { %v823_v12 = vadd.f32 %v817_v10, %v803_v18 }
 0x443   :  { %784 = vst.msk [vmem:[#allocation4 + $0x8] sm:$0xff] %vm182_vm0, %v781_v7 }
 0x444   :  { %825 = vst.msk [vmem:[#allocation5] sm:$0xff] %vm182_vm0, %v823_v12 }
 0x445   :  { %v822_v13 = vpop.xlane.xlu1 %821 }
 0x446   :  { %v824_v14 = vadd.f32 %v822_v13, %v804_v9 }
 0x447   :  { %v832_v20 = vld [vmem:[#allocation4] sm:$0xff] }
 0x448   :  { %826 = vst.msk [vmem:[#allocation5 + $0x8] sm:$0xff] %vm182_vm0, %v824_v14  ;;  %1090 = vlog2.f32 %v832_v20 }
 0x44a   :  { %v833_v21 = vld [vmem:[#allocation4 + $0x8] sm:$0xff] }
 0x44b   :  { %1092 = vlog2.f32 %v833_v21  ;;  %v840_v29 = vld [vmem:[#allocation5] sm:$0xff] }
 0x44f   :  { %v841_v33 = vld [vmem:[#allocation5 + $0x8] sm:$0xff] }
 0x452   :  { %v1091_v22 = vpop.eup %1090 }
 0x453   :  { %v835_v23 = vmul.f32 0.6931472, %v1091_v22 }
 0x455   :  { %v1093_v26 = vpop.eup %1092  ;;  %v838_v27 = vadd.f32 %v835_v23, %v830_v25 }
 0x456   :  { %v837_v28 = vmul.f32 0.6931472, %v1093_v26 }
 0x457   :  { %v842_v32 = vsub.f32 %v838_v27, %v840_v29 }
 0x458   :  { %v839_v24 = vadd.f32 %v837_v28, %v831_v31 }
 0x459   :  { %v846_v35 = vmul.f32 %v844_v30, %v842_v32 }
 0x45a   :  { %v843_v36 = vsub.f32 %v839_v24, %v841_v33 }
 0x45b   :  { %848 = vst.msk [vmem:[#allocation18] sm:$0xff] %vm182_vm0, %v846_v35 }
 0x45c   :  { %v847_v37 = vmul.f32 %v845_v34, %v843_v36 }
 0x45e   :  { %849 = vst.msk [vmem:[#allocation18 + $0x8] sm:$0xff] %vm182_vm0, %v847_v37 }
 0x45f   :  { %1259 = shalt.err (!%p1256_p4)
}
 0x460   :  { %s1260_s17 = scalar_lea.hbm %s1567_s7, 256 }
 0x461   :  { %p1261_p5 = scmp.ne.s32.totalorder %s1567_s7, %s1260_s17  ;;  %p1264_p6 = scmp.lt.u32.totalorder %s1260_s17, %s1567_s7 }
 0x463   :  { %p1266_p7 = pnand %p1264_p6, %p1261_p5 }
 0x465   :  { %1269 = shalt.err (!%p1266_p7)
}
 0x466   :  { %873 = dma.vmem_to_hbm [thread:$0]  %s868_s24, 256, %s1567_s7, [#allocation19], %s1289_s2, %s1289_s2, %s1290_s3  }
 0x467   :  { %1278 = dma.done.wait [#allocation8], 512  }
 0x468   :  { %1279 = vsyncadd [#allocation8], 4294966784 }
 0x469   :  { %1280 = dma.done.wait [#allocation19], 256  }
 0x46a   :  { %1281 = vsyncadd [#allocation19], 4294967040 }
 0x46b   :  { %880 = vsyncpa [#allocation7], 1 }
 0x46c   :  { %881 = vsyncpa [#allocation10], 1 }
 0x46d   :  { %882 = vsyncpa [#allocation13], 1 }
 0x46e   :  { %883 = vsyncpa [#allocation16], 1 }
 0x46f   :  { %884 = vsyncpa [#allocation8], 1 }
 0x470   :  { %885 = vsyncpa [#allocation19], 1 }

</bundles_post_ra>
